<compile_context>
chip_gen: v5e
topology: v5e:2x2
jax: 0.10.0
libtpu: 0.0.40
codegen_flags: <defaults>
</compile_context>

<pallas_src>
import functools

import jax
import jax.numpy as jnp
from jax.experimental import pallas as pl
from jax.experimental.pallas import tpu as pltpu

EPS = 1e-5


# ------------------------------------------------------------------ kernel
def _bn_train(x, gamma, beta):
    """Training-mode BatchNorm over rows (rows = N*H*W), one-pass f32 stats."""
    mean = jnp.mean(x, axis=0, keepdims=True)
    mean_sq = jnp.mean(x * x, axis=0, keepdims=True)
    var = mean_sq - mean * mean
    return (x - mean) * jax.lax.rsqrt(var + EPS) * gamma + beta


def _resblock_kernel(p1_ref, w1_ref, g1_ref, b1_ref,
                     sc_ref, ws_ref, gs_ref, bs_ref,
                     w2g_ref, g2_ref, b2_ref, tmask_ref,
                     o_ref, o1p_ref, *, wo, pad, has_projection):
    m, cp = o_ref.shape  # (N*Ho*Wo, Cout padded to 128 lanes)

    # ---- conv1 (im2col matmul, bf16 MXU operands, f32 accumulate) + BN1 + ReLU
    acc1 = jnp.dot(p1_ref[...], w1_ref[...], preferred_element_type=jnp.float32)
    out1 = jnp.maximum(_bn_train(acc1, g1_ref[...], b1_ref[...]), 0.0)

    # ---- stage out1 into the row-padded scratch; zero only the pad strips
    o1p_ref[0:pad, :] = jnp.zeros((pad, cp), jnp.float32)
    o1p_ref[pl.ds(pad, m), :] = out1
    o1p_ref[pl.ds(pad + m, pad), :] = jnp.zeros((pad, cp), jnp.float32)

    # ---- conv2 (3x3, stride 1, pad 1): 3 K-grouped matmuls over constant
    #      row-shifted windows; per-tap (M,1) masks implement the zero padding
    #      at the image / image-row boundaries.
    acc2 = jnp.zeros((m, cp), jnp.float32)
    for dh in range(3):
        pieces = []
        for dw in range(3):
            shift = (dh - 1) * wo + (dw - 1)            # static offset
            win = o1p_ref[pl.ds(pad + shift, m), :]     # (m, cp) f32 window
            pieces.append((win * tmask_ref[3 * dh + dw]).astype(jnp.bfloat16))
        acc2 = acc2 + jnp.dot(jnp.concatenate(pieces, axis=-1),   # (m, 3*cp), K=3*cp
                              w2g_ref[dh],
                              preferred_element_type=jnp.float32)
    out2 = _bn_train(acc2, g2_ref[...], b2_ref[...])

    # ---- shortcut branch (1x1 conv + BN, or identity)
    if has_projection:
        accs = jnp.dot(sc_ref[...], ws_ref[...], preferred_element_type=jnp.float32)
        shortcut = _bn_train(accs, gs_ref[...], bs_ref[...])
    else:
        shortcut = sc_ref[...]

    # ---- residual add + final ReLU, lane-dense f32 store
    o_ref[...] = jnp.maximum(out2 + shortcut, 0.0)


# ------------------------------------------------------------------ wrapper / glue
def _round_up(x, m):
    return (x + m - 1) // m * m


def _full_spec(shape):
    return pl.BlockSpec(shape, lambda i: (0,) * len(shape))


def _im2col(x_nhwc, ksize, stride, padding):
    """Patches: rows ordered (n, ho, wo); cols ordered (kh, kw, cin)."""
    N, H, W, C = x_nhwc.shape
    xp = jnp.pad(x_nhwc, ((0, 0), (padding, padding), (padding, padding), (0, 0)))
    Ho = (H + 2 * padding - ksize) // stride + 1
    Wo = (W + 2 * padding - ksize) // stride + 1
    cols = [xp[:, dh:dh + (Ho - 1) * stride + 1:stride,
               dw:dw + (Wo - 1) * stride + 1:stride, :]
            for dh in range(ksize) for dw in range(ksize)]
    p = jnp.stack(cols, axis=3)                        # (N, Ho, Wo, k*k, C)
    return p.reshape(N * Ho * Wo, ksize * ksize * C)


def _w_to_2d(w_oihw, cin_p, cout_p):
    """(Cout, Cin, kh, kw) -> (kh*kw*cin_p, cout_p) bf16 (matches im2col col order)."""
    Cout, Cin, kh, kw = w_oihw.shape
    w = jnp.transpose(w_oihw, (2, 3, 1, 0))            # (kh, kw, Cin, Cout)
    w = jnp.pad(w, ((0, 0), (0, 0), (0, cin_p - Cin), (0, cout_p - Cout)))
    return w.reshape(kh * kw * cin_p, cout_p).astype(jnp.bfloat16)


def _w2_grouped(w_oihw, cp):
    """3x3 (Cout, Cin, 3, 3) -> (3, 3*cp, cp) bf16: per dh, rows ordered (dw, cin)."""
    Cout, Cin, kh, kw = w_oihw.shape
    w = jnp.transpose(w_oihw, (2, 3, 1, 0))            # (kh, kw, Cin, Cout)
    w = jnp.pad(w, ((0, 0), (0, 0), (0, cp - Cin), (0, cp - Cout)))
    return w.reshape(kh, kw * cp, cp).astype(jnp.bfloat16)


def _pad_vec(v, cout_p):
    # Zero-padding gamma/beta keeps padded lanes exactly 0 through BN (invariant).
    return jnp.pad(v, ((0, 0), (0, cout_p - v.shape[1]))).astype(jnp.float32)


def _tap_masks(N, Ho, Wo):
    """(9, M, 1) f32: mask[3*dh+dw, r] = 1 iff tap (dh,dw) of output row r is in-image."""
    r = jnp.arange(N * Ho * Wo)
    h = (r % (Ho * Wo)) // Wo
    w = r % Wo
    hv = [h >= 1, jnp.ones(r.shape, bool), h <= Ho - 2]
    wv = [w >= 1, jnp.ones(r.shape, bool), w <= Wo - 2]
    m = jnp.stack([(hv[dh] & wv[dw]) for dh in range(3) for dw in range(3)])
    return m.astype(jnp.float32)[..., None]


def residual_block_forward(x_nhwc, params, stride):
    N, H, W, Cin = x_nhwc.shape
    Cout = params["w1"].shape[0]
    use_shortcut = (stride != 1) or (Cin != Cout)

    cin_p = _round_up(Cin, 8)          # conv1/shortcut contraction alignment
    cout_p = _round_up(Cout, 128)      # lane-dense MXU columns / unmasked stores
    Ho = (H + 2 - 3) // stride + 1
    Wo = (W + 2 - 3) // stride + 1
    M = N * Ho * Wo
    PAD = _round_up(Wo + 1, 8)         # >= max |row shift| of conv2 taps

    xc = jnp.pad(x_nhwc, ((0, 0), (0, 0), (0, 0), (0, cin_p - Cin)))

    # TODO(synk): for non-toy shapes build conv1 patches in-kernel (im2col reads
    #             ~9/stride^2 x the input from HBM); fine at this size.
    p1 = _im2col(xc, 3, stride, 1).astype(jnp.bfloat16)          # (M, 9*cin_p)
    w1 = _w_to_2d(params["w1"], cin_p, cout_p)                   # (9*cin_p, cout_p)
    w2g = _w2_grouped(params["w2"], cout_p)                      # (3, 3*cout_p, cout_p)
    g1 = _pad_vec(params["g1"], cout_p); b1 = _pad_vec(params["b1"], cout_p)
    g2 = _pad_vec(params["g2"], cout_p); b2 = _pad_vec(params["b2"], cout_p)
    tmask = _tap_masks(N, Ho, Wo)                                # (9, M, 1)

    if use_shortcut:
        sc_in = xc[:, ::stride, ::stride, :].reshape(M, cin_p).astype(jnp.bfloat16)
        ws = _w_to_2d(params["ws"], cin_p, cout_p)               # (cin_p, cout_p)
        gs = _pad_vec(params["gs"], cout_p); bs = _pad_vec(params["bs"], cout_p)
    else:
        # identity shortcut: pre-flattened, channel-padded activations (f32, used as-is)
        sc_in = jnp.pad(x_nhwc, ((0, 0), (0, 0), (0, 0), (0, cout_p - Cin))).reshape(M, cout_p)
        ws = jnp.zeros((cin_p, cout_p), jnp.bfloat16)            # unused dummies
        gs = jnp.zeros((1, cout_p), jnp.float32)
        bs = jnp.zeros((1, cout_p), jnp.float32)

    kernel = functools.partial(_resblock_kernel, wo=Wo, pad=PAD,
                               has_projection=use_shortcut)
    # TODO(synk): tile M over the grid (two-pass BN first) for DMA/compute overlap
    #             and v7x megacore; single step is fine at these sizes.
    out2d = pl.pallas_call(
        kernel,
        out_shape=jax.ShapeDtypeStruct((M, cout_p), jnp.float32),
        grid=(1,),
        in_specs=[_full_spec(p1.shape), _full_spec(w1.shape),
                  _full_spec(g1.shape), _full_spec(b1.shape),
                  _full_spec(sc_in.shape), _full_spec(ws.shape),
                  _full_spec(gs.shape), _full_spec(bs.shape),
                  _full_spec(w2g.shape), _full_spec(g2.shape), _full_spec(b2.shape),
                  _full_spec(tmask.shape)],
        out_specs=_full_spec((M, cout_p)),
        scratch_shapes=[pltpu.VMEM((M + 2 * PAD, cout_p), jnp.float32)],
        compiler_params=pltpu.CompilerParams(
            dimension_semantics=("arbitrary",),
            vmem_limit_bytes=64 * 1024 * 1024),
    )(p1, w1, g1, b1, sc_in, ws, gs, bs, w2g, g2, b2, tmask)

    return out2d.reshape(N, Ho, Wo, cout_p)[..., :Cout]


# ------------------------------------------------------------------ reference (pure JAX)
def _ref_forward(x_nhwc, params, stride):
    """Same math via lax.conv. Conv inputs cast to bf16 like the kernel's MXU path."""
    in_c = x_nhwc.shape[-1]; out_c = params["w1"].shape[0]
    use_shortcut = (stride != 1) or (in_c != out_c)

    def conv(x, w_oihw, s, padding):
        return jax.lax.conv_general_dilated(
            x.astype(jnp.bfloat16), w_oihw.astype(jnp.bfloat16), (s, s),
            [(padding, padding), (padding, padding)],
            dimension_numbers=("NHWC", "OIHW", "NHWC"),
            preferred_element_type=jnp.float32)

    def bn(y, g, b):
        m = jnp.mean(y, axis=(0, 1, 2), keepdims=True)
        v = jnp.mean(jnp.square(y - m), axis=(0, 1, 2), keepdims=True)
        return (y - m) * jax.lax.rsqrt(v + EPS) * g.reshape(1, 1, 1, -1) + b.reshape(1, 1, 1, -1)

    out = jax.nn.relu(bn(conv(x_nhwc, params["w1"], stride, 1), params["g1"], params["b1"]))
    out = bn(conv(out, params["w2"], 1, 1), params["g2"], params["b2"])
    if use_shortcut:
        sc = bn(conv(x_nhwc, params["ws"], stride, 0), params["gs"], params["bs"])
    else:
        sc = x_nhwc
    return jax.nn.relu(out + sc)


# ------------------------------------------------------------------ main
if __name__ == "__main__":
    key = jax.random.PRNGKey(0)
    N, Cin, H, W = 2, 4, 16, 16
    Cout, stride = 8, 2

    ks = jax.random.split(key, 9)
    x_nchw = jax.random.normal(ks[0], (N, Cin, H, W), jnp.float32)   # PyTorch layout
    x_nhwc = jnp.transpose(x_nchw, (0, 2, 3, 1))                     # kernel layout

    params = {
        "w1": 0.1 * jax.random.normal(ks[1], (Cout, Cin, 3, 3), jnp.float32),
        "w2": 0.1 * jax.random.normal(ks[2], (Cout, Cout, 3, 3), jnp.float32),
        "ws": 0.1 * jax.random.normal(ks[3], (Cout, Cin, 1, 1), jnp.float32),
        "g1": 1.0 + 0.1 * jax.random.normal(ks[4], (1, Cout), jnp.float32),
        "b1": 0.05 * jax.random.normal(ks[5], (1, Cout), jnp.float32),
        "g2": 1.0 + 0.1 * jax.random.normal(ks[6], (1, Cout), jnp.float32),
        "b2": 0.05 * jax.random.normal(ks[7], (1, Cout), jnp.float32),
        "gs": jnp.ones((1, Cout), jnp.float32),
        "bs": 0.05 * jax.random.normal(ks[8], (1, Cout), jnp.float32),
    }

    fwd = jax.jit(residual_block_forward, static_argnums=2)
    out = jax.block_until_ready(fwd(x_nhwc, params, stride))
    ref = jax.block_until_ready(_ref_forward(x_nhwc, params, stride))

    assert out.shape == (N, H // stride, W // stride, Cout)
    max_err = float(jnp.max(jnp.abs(out - ref)))
    assert jnp.allclose(out, ref, atol=5e-3, rtol=5e-3), max_err

    print("KERNEL_OK")
</pallas_src>

<mosaic_0001>
module attributes {stable_mosaic.version = 11 : i64} {
  func.func @_resblock_kernel(%arg0: i32, %arg1: memref<128x72xbf16, #tpu.memory_space<vmem>>, %arg2: memref<72x128xbf16, #tpu.memory_space<vmem>>, %arg3: memref<1x128xf32, #tpu.memory_space<vmem>>, %arg4: memref<1x128xf32, #tpu.memory_space<vmem>>, %arg5: memref<128x8xbf16, #tpu.memory_space<vmem>>, %arg6: memref<8x128xbf16, #tpu.memory_space<vmem>>, %arg7: memref<1x128xf32, #tpu.memory_space<vmem>>, %arg8: memref<1x128xf32, #tpu.memory_space<vmem>>, %arg9: memref<3x384x128xbf16, #tpu.memory_space<vmem>>, %arg10: memref<1x128xf32, #tpu.memory_space<vmem>>, %arg11: memref<1x128xf32, #tpu.memory_space<vmem>>, %arg12: memref<9x128x1xf32, #tpu.memory_space<vmem>>, %arg13: memref<128x128xf32, #tpu.memory_space<vmem>>, %arg14: memref<160x128xf32, #tpu.memory_space<vmem>>) attributes {dimension_semantics = [#tpu.dimension_semantics<arbitrary>], iteration_bounds = array<i64: 1>, scalar_prefetch = 0 : i64, scratch_operands = 1 : i64, tpu.core_type = #tpu.core_type<tc>, window_params = [{pipeline_mode = #tpu.pipeline_mode<synchronous>, transform_indices = @transform_0, window_bounds = array<i64: 128, 72>}, {pipeline_mode = #tpu.pipeline_mode<synchronous>, transform_indices = @transform_1, window_bounds = array<i64: 72, 128>}, {pipeline_mode = #tpu.pipeline_mode<synchronous>, transform_indices = @transform_2, window_bounds = array<i64: 1, 128>}, {pipeline_mode = #tpu.pipeline_mode<synchronous>, transform_indices = @transform_3, window_bounds = array<i64: 1, 128>}, {pipeline_mode = #tpu.pipeline_mode<synchronous>, transform_indices = @transform_4, window_bounds = array<i64: 128, 8>}, {pipeline_mode = #tpu.pipeline_mode<synchronous>, transform_indices = @transform_5, window_bounds = array<i64: 8, 128>}, {pipeline_mode = #tpu.pipeline_mode<synchronous>, transform_indices = @transform_6, window_bounds = array<i64: 1, 128>}, {pipeline_mode = #tpu.pipeline_mode<synchronous>, transform_indices = @transform_7, window_bounds = array<i64: 1, 128>}, {pipeline_mode = #tpu.pipeline_mode<synchronous>, transform_indices = @transform_8, window_bounds = array<i64: 3, 384, 128>}, {pipeline_mode = #tpu.pipeline_mode<synchronous>, transform_indices = @transform_9, window_bounds = array<i64: 1, 128>}, {pipeline_mode = #tpu.pipeline_mode<synchronous>, transform_indices = @transform_10, window_bounds = array<i64: 1, 128>}, {pipeline_mode = #tpu.pipeline_mode<synchronous>, transform_indices = @transform_11, window_bounds = array<i64: 9, 128, 1>}, {pipeline_mode = #tpu.pipeline_mode<synchronous>, transform_indices = @transform_12, window_bounds = array<i64: 128, 128>}]} {
    %c0 = arith.constant 0 : index
    %c0_0 = arith.constant 0 : index
    %0 = vector.load %arg1[%c0, %c0_0] : memref<128x72xbf16, #tpu.memory_space<vmem>>, vector<128x72xbf16>
    %c0_1 = arith.constant 0 : index
    %c0_2 = arith.constant 0 : index
    %1 = vector.load %arg2[%c0_1, %c0_2] : memref<72x128xbf16, #tpu.memory_space<vmem>>, vector<72x128xbf16>
    %cst = arith.constant dense<0.000000e+00> : vector<128x128xf32>
    %2 = tpu.matmul %0, %1, %cst {dimension_numbers = #tpu.dot_dimension_numbers<[1], [0], [0], [1], [0, 0, 1, 1], [], []>} : vector<128x72xbf16>, vector<72x128xbf16>, vector<128x128xf32> -> vector<128x128xf32>
    %c0_3 = arith.constant 0 : index
    %c0_4 = arith.constant 0 : index
    %3 = vector.load %arg3[%c0_3, %c0_4] : memref<1x128xf32, #tpu.memory_space<vmem>>, vector<1x128xf32>
    %c0_5 = arith.constant 0 : index
    %c0_6 = arith.constant 0 : index
    %4 = vector.load %arg4[%c0_5, %c0_6] : memref<1x128xf32, #tpu.memory_space<vmem>>, vector<1x128xf32>
    %cst_7 = arith.constant dense<0.000000e+00> : vector<128xf32>
    %5 = vector.multi_reduction <add>, %2, %cst_7 [0] : vector<128x128xf32> to vector<128xf32>
    %6 = vector.shape_cast %5 : vector<128xf32> to vector<1x128xf32>
    %cst_8 = arith.constant 1.280000e+02 : f32
    %7 = vector.broadcast %cst_8 : f32 to vector<1x128xf32>
    %8 = arith.divf %6, %7 : vector<1x128xf32>
    %9 = arith.mulf %2, %2 : vector<128x128xf32>
    %cst_9 = arith.constant dense<0.000000e+00> : vector<128xf32>
    %10 = vector.multi_reduction <add>, %9, %cst_9 [0] : vector<128x128xf32> to vector<128xf32>
    %11 = vector.shape_cast %10 : vector<128xf32> to vector<1x128xf32>
    %cst_10 = arith.constant 1.280000e+02 : f32
    %12 = vector.broadcast %cst_10 : f32 to vector<1x128xf32>
    %13 = arith.divf %11, %12 : vector<1x128xf32>
    %14 = arith.mulf %8, %8 : vector<1x128xf32>
    %15 = arith.subf %13, %14 : vector<1x128xf32>
    %16 = vector.broadcast %8 : vector<1x128xf32> to vector<128x128xf32>
    %17 = arith.subf %2, %16 : vector<128x128xf32>
    %cst_11 = arith.constant 9.99999974E-6 : f32
    %18 = vector.broadcast %cst_11 : f32 to vector<1x128xf32>
    %19 = arith.addf %15, %18 : vector<1x128xf32>
    %20 = math.rsqrt %19 : vector<1x128xf32>
    %21 = vector.broadcast %20 : vector<1x128xf32> to vector<128x128xf32>
    %22 = arith.mulf %17, %21 : vector<128x128xf32>
    %23 = vector.broadcast %3 : vector<1x128xf32> to vector<128x128xf32>
    %24 = arith.mulf %22, %23 : vector<128x128xf32>
    %25 = vector.broadcast %4 : vector<1x128xf32> to vector<128x128xf32>
    %26 = arith.addf %24, %25 : vector<128x128xf32>
    %cst_12 = arith.constant 0.000000e+00 : f32
    %27 = vector.broadcast %cst_12 : f32 to vector<128x128xf32>
    %28 = arith.maximumf %26, %27 : vector<128x128xf32>
    %cst_13 = arith.constant 0.000000e+00 : f32
    %29 = vector.broadcast %cst_13 : f32 to vector<16x128xf32>
    %c0_14 = arith.constant 0 : index
    %c0_15 = arith.constant 0 : index
    %30 = vector.load %arg14[%c0_14, %c0_15] : memref<160x128xf32, #tpu.memory_space<vmem>>, vector<16x128xf32>
    tpu.vector_store %arg14[%c0_14, %c0_15], %29 {strides = array<i32>} : memref<160x128xf32, #tpu.memory_space<vmem>>, vector<16x128xf32>,
    %c16 = arith.constant 16 : index
    %c0_16 = arith.constant 0 : index
    %31 = vector.load %arg14[%c16, %c0_16] : memref<160x128xf32, #tpu.memory_space<vmem>>, vector<128x128xf32>
    tpu.vector_store %arg14[%c16, %c0_16], %28 {strides = array<i32>} : memref<160x128xf32, #tpu.memory_space<vmem>>, vector<128x128xf32>,
    %cst_17 = arith.constant 0.000000e+00 : f32
    %32 = vector.broadcast %cst_17 : f32 to vector<16x128xf32>
    %c144 = arith.constant 144 : index
    %c0_18 = arith.constant 0 : index
    %33 = vector.load %arg14[%c144, %c0_18] : memref<160x128xf32, #tpu.memory_space<vmem>>, vector<16x128xf32>
    tpu.vector_store %arg14[%c144, %c0_18], %32 {strides = array<i32>} : memref<160x128xf32, #tpu.memory_space<vmem>>, vector<16x128xf32>,
    %cst_19 = arith.constant 0.000000e+00 : f32
    %34 = vector.broadcast %cst_19 : f32 to vector<128x128xf32>
    %c7 = arith.constant 7 : index
    %c0_20 = arith.constant 0 : index
    %35 = vector.load %arg14[%c7, %c0_20] : memref<160x128xf32, #tpu.memory_space<vmem>>, vector<128x128xf32>
    %c0_21 = arith.constant 0 : index
    %c0_22 = arith.constant 0 : index
    %c0_23 = arith.constant 0 : index
    %36 = vector.load %arg12[%c0_21, %c0_22, %c0_23] : memref<9x128x1xf32, #tpu.memory_space<vmem>>, vector<1x128x1xf32>
    %37 = vector.shape_cast %36 : vector<1x128x1xf32> to vector<128x1xf32>
    %38 = vector.broadcast %37 : vector<128x1xf32> to vector<128x128xf32>
    %39 = arith.mulf %35, %38 : vector<128x128xf32>
    %40 = arith.truncf %39 : vector<128x128xf32> to vector<128x128xbf16>
    %c8 = arith.constant 8 : index
    %c0_24 = arith.constant 0 : index
    %41 = vector.load %arg14[%c8, %c0_24] : memref<160x128xf32, #tpu.memory_space<vmem>>, vector<128x128xf32>
    %c1 = arith.constant 1 : index
    %c0_25 = arith.constant 0 : index
    %c0_26 = arith.constant 0 : index
    %42 = vector.load %arg12[%c1, %c0_25, %c0_26] : memref<9x128x1xf32, #tpu.memory_space<vmem>>, vector<1x128x1xf32>
    %43 = vector.shape_cast %42 : vector<1x128x1xf32> to vector<128x1xf32>
    %44 = vector.broadcast %43 : vector<128x1xf32> to vector<128x128xf32>
    %45 = arith.mulf %41, %44 : vector<128x128xf32>
    %46 = arith.truncf %45 : vector<128x128xf32> to vector<128x128xbf16>
    %c9 = arith.constant 9 : index
    %c0_27 = arith.constant 0 : index
    %47 = vector.load %arg14[%c9, %c0_27] : memref<160x128xf32, #tpu.memory_space<vmem>>, vector<128x128xf32>
    %c2 = arith.constant 2 : index
    %c0_28 = arith.constant 0 : index
    %c0_29 = arith.constant 0 : index
    %48 = vector.load %arg12[%c2, %c0_28, %c0_29] : memref<9x128x1xf32, #tpu.memory_space<vmem>>, vector<1x128x1xf32>
    %49 = vector.shape_cast %48 : vector<1x128x1xf32> to vector<128x1xf32>
    %50 = vector.broadcast %49 : vector<128x1xf32> to vector<128x128xf32>
    %51 = arith.mulf %47, %50 : vector<128x128xf32>
    %52 = arith.truncf %51 : vector<128x128xf32> to vector<128x128xbf16>
    %53 = tpu.concatenate %40, %46, %52 in 1 : vector<128x128xbf16>, vector<128x128xbf16>, vector<128x128xbf16> -> vector<128x384xbf16>
    %c0_30 = arith.constant 0 : index
    %c0_31 = arith.constant 0 : index
    %c0_32 = arith.constant 0 : index
    %54 = vector.load %arg9[%c0_30, %c0_31, %c0_32] : memref<3x384x128xbf16, #tpu.memory_space<vmem>>, vector<1x384x128xbf16>
    %55 = vector.shape_cast %54 : vector<1x384x128xbf16> to vector<384x128xbf16>
    %cst_33 = arith.constant dense<0.000000e+00> : vector<128x128xf32>
    %56 = tpu.matmul %53, %55, %cst_33 {dimension_numbers = #tpu.dot_dimension_numbers<[1], [0], [0], [1], [0, 0, 1, 1], [], []>} : vector<128x384xbf16>, vector<384x128xbf16>, vector<128x128xf32> -> vector<128x128xf32>
    %57 = arith.addf %34, %56 : vector<128x128xf32>
    %c15 = arith.constant 15 : index
    %c0_34 = arith.constant 0 : index
    %58 = vector.load %arg14[%c15, %c0_34] : memref<160x128xf32, #tpu.memory_space<vmem>>, vector<128x128xf32>
    %c3 = arith.constant 3 : index
    %c0_35 = arith.constant 0 : index
    %c0_36 = arith.constant 0 : index
    %59 = vector.load %arg12[%c3, %c0_35, %c0_36] : memref<9x128x1xf32, #tpu.memory_space<vmem>>, vector<1x128x1xf32>
    %60 = vector.shape_cast %59 : vector<1x128x1xf32> to vector<128x1xf32>
    %61 = vector.broadcast %60 : vector<128x1xf32> to vector<128x128xf32>
    %62 = arith.mulf %58, %61 : vector<128x128xf32>
    %63 = arith.truncf %62 : vector<128x128xf32> to vector<128x128xbf16>
    %c16_37 = arith.constant 16 : index
    %c0_38 = arith.constant 0 : index
    %64 = vector.load %arg14[%c16_37, %c0_38] : memref<160x128xf32, #tpu.memory_space<vmem>>, vector<128x128xf32>
    %c4 = arith.constant 4 : index
    %c0_39 = arith.constant 0 : index
    %c0_40 = arith.constant 0 : index
    %65 = vector.load %arg12[%c4, %c0_39, %c0_40] : memref<9x128x1xf32, #tpu.memory_space<vmem>>, vector<1x128x1xf32>
    %66 = vector.shape_cast %65 : vector<1x128x1xf32> to vector<128x1xf32>
    %67 = vector.broadcast %66 : vector<128x1xf32> to vector<128x128xf32>
    %68 = arith.mulf %64, %67 : vector<128x128xf32>
    %69 = arith.truncf %68 : vector<128x128xf32> to vector<128x128xbf16>
    %c17 = arith.constant 17 : index
    %c0_41 = arith.constant 0 : index
    %70 = vector.load %arg14[%c17, %c0_41] : memref<160x128xf32, #tpu.memory_space<vmem>>, vector<128x128xf32>
    %c5 = arith.constant 5 : index
    %c0_42 = arith.constant 0 : index
    %c0_43 = arith.constant 0 : index
    %71 = vector.load %arg12[%c5, %c0_42, %c0_43] : memref<9x128x1xf32, #tpu.memory_space<vmem>>, vector<1x128x1xf32>
    %72 = vector.shape_cast %71 : vector<1x128x1xf32> to vector<128x1xf32>
    %73 = vector.broadcast %72 : vector<128x1xf32> to vector<128x128xf32>
    %74 = arith.mulf %70, %73 : vector<128x128xf32>
    %75 = arith.truncf %74 : vector<128x128xf32> to vector<128x128xbf16>
    %76 = tpu.concatenate %63, %69, %75 in 1 : vector<128x128xbf16>, vector<128x128xbf16>, vector<128x128xbf16> -> vector<128x384xbf16>
    %c1_44 = arith.constant 1 : index
    %c0_45 = arith.constant 0 : index
    %c0_46 = arith.constant 0 : index
    %77 = vector.load %arg9[%c1_44, %c0_45, %c0_46] : memref<3x384x128xbf16, #tpu.memory_space<vmem>>, vector<1x384x128xbf16>
    %78 = vector.shape_cast %77 : vector<1x384x128xbf16> to vector<384x128xbf16>
    %cst_47 = arith.constant dense<0.000000e+00> : vector<128x128xf32>
    %79 = tpu.matmul %76, %78, %cst_47 {dimension_numbers = #tpu.dot_dimension_numbers<[1], [0], [0], [1], [0, 0, 1, 1], [], []>} : vector<128x384xbf16>, vector<384x128xbf16>, vector<128x128xf32> -> vector<128x128xf32>
    %80 = arith.addf %57, %79 : vector<128x128xf32>
    %c23 = arith.constant 23 : index
    %c0_48 = arith.constant 0 : index
    %81 = vector.load %arg14[%c23, %c0_48] : memref<160x128xf32, #tpu.memory_space<vmem>>, vector<128x128xf32>
    %c6 = arith.constant 6 : index
    %c0_49 = arith.constant 0 : index
    %c0_50 = arith.constant 0 : index
    %82 = vector.load %arg12[%c6, %c0_49, %c0_50] : memref<9x128x1xf32, #tpu.memory_space<vmem>>, vector<1x128x1xf32>
    %83 = vector.shape_cast %82 : vector<1x128x1xf32> to vector<128x1xf32>
    %84 = vector.broadcast %83 : vector<128x1xf32> to vector<128x128xf32>
    %85 = arith.mulf %81, %84 : vector<128x128xf32>
    %86 = arith.truncf %85 : vector<128x128xf32> to vector<128x128xbf16>
    %c24 = arith.constant 24 : index
    %c0_51 = arith.constant 0 : index
    %87 = vector.load %arg14[%c24, %c0_51] : memref<160x128xf32, #tpu.memory_space<vmem>>, vector<128x128xf32>
    %c7_52 = arith.constant 7 : index
    %c0_53 = arith.constant 0 : index
    %c0_54 = arith.constant 0 : index
    %88 = vector.load %arg12[%c7_52, %c0_53, %c0_54] : memref<9x128x1xf32, #tpu.memory_space<vmem>>, vector<1x128x1xf32>
    %89 = vector.shape_cast %88 : vector<1x128x1xf32> to vector<128x1xf32>
    %90 = vector.broadcast %89 : vector<128x1xf32> to vector<128x128xf32>
    %91 = arith.mulf %87, %90 : vector<128x128xf32>
    %92 = arith.truncf %91 : vector<128x128xf32> to vector<128x128xbf16>
    %c25 = arith.constant 25 : index
    %c0_55 = arith.constant 0 : index
    %93 = vector.load %arg14[%c25, %c0_55] : memref<160x128xf32, #tpu.memory_space<vmem>>, vector<128x128xf32>
    %c8_56 = arith.constant 8 : index
    %c0_57 = arith.constant 0 : index
    %c0_58 = arith.constant 0 : index
    %94 = vector.load %arg12[%c8_56, %c0_57, %c0_58] : memref<9x128x1xf32, #tpu.memory_space<vmem>>, vector<1x128x1xf32>
    %95 = vector.shape_cast %94 : vector<1x128x1xf32> to vector<128x1xf32>
    %96 = vector.broadcast %95 : vector<128x1xf32> to vector<128x128xf32>
    %97 = arith.mulf %93, %96 : vector<128x128xf32>
    %98 = arith.truncf %97 : vector<128x128xf32> to vector<128x128xbf16>
    %99 = tpu.concatenate %86, %92, %98 in 1 : vector<128x128xbf16>, vector<128x128xbf16>, vector<128x128xbf16> -> vector<128x384xbf16>
    %c2_59 = arith.constant 2 : index
    %c0_60 = arith.constant 0 : index
    %c0_61 = arith.constant 0 : index
    %100 = vector.load %arg9[%c2_59, %c0_60, %c0_61] : memref<3x384x128xbf16, #tpu.memory_space<vmem>>, vector<1x384x128xbf16>
    %101 = vector.shape_cast %100 : vector<1x384x128xbf16> to vector<384x128xbf16>
    %cst_62 = arith.constant dense<0.000000e+00> : vector<128x128xf32>
    %102 = tpu.matmul %99, %101, %cst_62 {dimension_numbers = #tpu.dot_dimension_numbers<[1], [0], [0], [1], [0, 0, 1, 1], [], []>} : vector<128x384xbf16>, vector<384x128xbf16>, vector<128x128xf32> -> vector<128x128xf32>
    %103 = arith.addf %80, %102 : vector<128x128xf32>
    %c0_63 = arith.constant 0 : index
    %c0_64 = arith.constant 0 : index
    %104 = vector.load %arg10[%c0_63, %c0_64] : memref<1x128xf32, #tpu.memory_space<vmem>>, vector<1x128xf32>
    %c0_65 = arith.constant 0 : index
    %c0_66 = arith.constant 0 : index
    %105 = vector.load %arg11[%c0_65, %c0_66] : memref<1x128xf32, #tpu.memory_space<vmem>>, vector<1x128xf32>
    %cst_67 = arith.constant dense<0.000000e+00> : vector<128xf32>
    %106 = vector.multi_reduction <add>, %103, %cst_67 [0] : vector<128x128xf32> to vector<128xf32>
    %107 = vector.shape_cast %106 : vector<128xf32> to vector<1x128xf32>
    %cst_68 = arith.constant 1.280000e+02 : f32
    %108 = vector.broadcast %cst_68 : f32 to vector<1x128xf32>
    %109 = arith.divf %107, %108 : vector<1x128xf32>
    %110 = arith.mulf %103, %103 : vector<128x128xf32>
    %cst_69 = arith.constant dense<0.000000e+00> : vector<128xf32>
    %111 = vector.multi_reduction <add>, %110, %cst_69 [0] : vector<128x128xf32> to vector<128xf32>
    %112 = vector.shape_cast %111 : vector<128xf32> to vector<1x128xf32>
    %cst_70 = arith.constant 1.280000e+02 : f32
    %113 = vector.broadcast %cst_70 : f32 to vector<1x128xf32>
    %114 = arith.divf %112, %113 : vector<1x128xf32>
    %115 = arith.mulf %109, %109 : vector<1x128xf32>
    %116 = arith.subf %114, %115 : vector<1x128xf32>
    %117 = vector.broadcast %109 : vector<1x128xf32> to vector<128x128xf32>
    %118 = arith.subf %103, %117 : vector<128x128xf32>
    %cst_71 = arith.constant 9.99999974E-6 : f32
    %119 = vector.broadcast %cst_71 : f32 to vector<1x128xf32>
    %120 = arith.addf %116, %119 : vector<1x128xf32>
    %121 = math.rsqrt %120 : vector<1x128xf32>
    %122 = vector.broadcast %121 : vector<1x128xf32> to vector<128x128xf32>
    %123 = arith.mulf %118, %122 : vector<128x128xf32>
    %124 = vector.broadcast %104 : vector<1x128xf32> to vector<128x128xf32>
    %125 = arith.mulf %123, %124 : vector<128x128xf32>
    %126 = vector.broadcast %105 : vector<1x128xf32> to vector<128x128xf32>
    %127 = arith.addf %125, %126 : vector<128x128xf32>
    %c0_72 = arith.constant 0 : index
    %c0_73 = arith.constant 0 : index
    %128 = vector.load %arg5[%c0_72, %c0_73] : memref<128x8xbf16, #tpu.memory_space<vmem>>, vector<128x8xbf16>
    %c0_74 = arith.constant 0 : index
    %c0_75 = arith.constant 0 : index
    %129 = vector.load %arg6[%c0_74, %c0_75] : memref<8x128xbf16, #tpu.memory_space<vmem>>, vector<8x128xbf16>
    %cst_76 = arith.constant dense<0.000000e+00> : vector<128x128xf32>
    %130 = tpu.matmul %128, %129, %cst_76 {dimension_numbers = #tpu.dot_dimension_numbers<[1], [0], [0], [1], [0, 0, 1, 1], [], []>} : vector<128x8xbf16>, vector<8x128xbf16>, vector<128x128xf32> -> vector<128x128xf32>
    %c0_77 = arith.constant 0 : index
    %c0_78 = arith.constant 0 : index
    %131 = vector.load %arg7[%c0_77, %c0_78] : memref<1x128xf32, #tpu.memory_space<vmem>>, vector<1x128xf32>
    %c0_79 = arith.constant 0 : index
    %c0_80 = arith.constant 0 : index
    %132 = vector.load %arg8[%c0_79, %c0_80] : memref<1x128xf32, #tpu.memory_space<vmem>>, vector<1x128xf32>
    %cst_81 = arith.constant dense<0.000000e+00> : vector<128xf32>
    %133 = vector.multi_reduction <add>, %130, %cst_81 [0] : vector<128x128xf32> to vector<128xf32>
    %134 = vector.shape_cast %133 : vector<128xf32> to vector<1x128xf32>
    %cst_82 = arith.constant 1.280000e+02 : f32
    %135 = vector.broadcast %cst_82 : f32 to vector<1x128xf32>
    %136 = arith.divf %134, %135 : vector<1x128xf32>
    %137 = arith.mulf %130, %130 : vector<128x128xf32>
    %cst_83 = arith.constant dense<0.000000e+00> : vector<128xf32>
    %138 = vector.multi_reduction <add>, %137, %cst_83 [0] : vector<128x128xf32> to vector<128xf32>
    %139 = vector.shape_cast %138 : vector<128xf32> to vector<1x128xf32>
    %cst_84 = arith.constant 1.280000e+02 : f32
    %140 = vector.broadcast %cst_84 : f32 to vector<1x128xf32>
    %141 = arith.divf %139, %140 : vector<1x128xf32>
    %142 = arith.mulf %136, %136 : vector<1x128xf32>
    %143 = arith.subf %141, %142 : vector<1x128xf32>
    %144 = vector.broadcast %136 : vector<1x128xf32> to vector<128x128xf32>
    %145 = arith.subf %130, %144 : vector<128x128xf32>
    %cst_85 = arith.constant 9.99999974E-6 : f32
    %146 = vector.broadcast %cst_85 : f32 to vector<1x128xf32>
    %147 = arith.addf %143, %146 : vector<1x128xf32>
    %148 = math.rsqrt %147 : vector<1x128xf32>
    %149 = vector.broadcast %148 : vector<1x128xf32> to vector<128x128xf32>
    %150 = arith.mulf %145, %149 : vector<128x128xf32>
    %151 = vector.broadcast %131 : vector<1x128xf32> to vector<128x128xf32>
    %152 = arith.mulf %150, %151 : vector<128x128xf32>
    %153 = vector.broadcast %132 : vector<1x128xf32> to vector<128x128xf32>
    %154 = arith.addf %152, %153 : vector<128x128xf32>
    %155 = arith.addf %127, %154 : vector<128x128xf32>
    %cst_86 = arith.constant 0.000000e+00 : f32
    %156 = vector.broadcast %cst_86 : f32 to vector<128x128xf32>
    %157 = arith.maximumf %155, %156 : vector<128x128xf32>
    %c0_87 = arith.constant 0 : index
    %c0_88 = arith.constant 0 : index
    %158 = vector.load %arg13[%c0_87, %c0_88] : memref<128x128xf32, #tpu.memory_space<vmem>>, vector<128x128xf32>
    tpu.vector_store %arg13[%c0_87, %c0_88], %157 {strides = array<i32>} : memref<128x128xf32, #tpu.memory_space<vmem>>, vector<128x128xf32>,
    return
  }
  func.func @transform_0(%arg0: i32) -> (i32, i32) {
    %c0_i32 = arith.constant 0 : i32
    %c0_i32_0 = arith.constant 0 : i32
    %c0_i32_1 = arith.constant 0 : i32
    return %c0_i32, %c0_i32_0 : i32, i32
  }
  func.func @transform_1(%arg0: i32) -> (i32, i32) {
    %c0_i32 = arith.constant 0 : i32
    %c0_i32_0 = arith.constant 0 : i32
    %c0_i32_1 = arith.constant 0 : i32
    return %c0_i32, %c0_i32_0 : i32, i32
  }
  func.func @transform_2(%arg0: i32) -> (i32, i32) {
    %c0_i32 = arith.constant 0 : i32
    %c0_i32_0 = arith.constant 0 : i32
    %c0_i32_1 = arith.constant 0 : i32
    return %c0_i32, %c0_i32_0 : i32, i32
  }
  func.func @transform_3(%arg0: i32) -> (i32, i32) {
    %c0_i32 = arith.constant 0 : i32
    %c0_i32_0 = arith.constant 0 : i32
    %c0_i32_1 = arith.constant 0 : i32
    return %c0_i32, %c0_i32_0 : i32, i32
  }
  func.func @transform_4(%arg0: i32) -> (i32, i32) {
    %c0_i32 = arith.constant 0 : i32
    %c0_i32_0 = arith.constant 0 : i32
    %c0_i32_1 = arith.constant 0 : i32
    return %c0_i32, %c0_i32_0 : i32, i32
  }
  func.func @transform_5(%arg0: i32) -> (i32, i32) {
    %c0_i32 = arith.constant 0 : i32
    %c0_i32_0 = arith.constant 0 : i32
    %c0_i32_1 = arith.constant 0 : i32
    return %c0_i32, %c0_i32_0 : i32, i32
  }
  func.func @transform_6(%arg0: i32) -> (i32, i32) {
    %c0_i32 = arith.constant 0 : i32
    %c0_i32_0 = arith.constant 0 : i32
    %c0_i32_1 = arith.constant 0 : i32
    return %c0_i32, %c0_i32_0 : i32, i32
  }
  func.func @transform_7(%arg0: i32) -> (i32, i32) {
    %c0_i32 = arith.constant 0 : i32
    %c0_i32_0 = arith.constant 0 : i32
    %c0_i32_1 = arith.constant 0 : i32
    return %c0_i32, %c0_i32_0 : i32, i32
  }
  func.func @transform_8(%arg0: i32) -> (i32, i32, i32) {
    %c0_i32 = arith.constant 0 : i32
    %c0_i32_0 = arith.constant 0 : i32
    %c0_i32_1 = arith.constant 0 : i32
    %c0_i32_2 = arith.constant 0 : i32
    return %c0_i32, %c0_i32_0, %c0_i32_1 : i32, i32, i32
  }
  func.func @transform_9(%arg0: i32) -> (i32, i32) {
    %c0_i32 = arith.constant 0 : i32
    %c0_i32_0 = arith.constant 0 : i32
    %c0_i32_1 = arith.constant 0 : i32
    return %c0_i32, %c0_i32_0 : i32, i32
  }
  func.func @transform_10(%arg0: i32) -> (i32, i32) {
    %c0_i32 = arith.constant 0 : i32
    %c0_i32_0 = arith.constant 0 : i32
    %c0_i32_1 = arith.constant 0 : i32
    return %c0_i32, %c0_i32_0 : i32, i32
  }
  func.func @transform_11(%arg0: i32) -> (i32, i32, i32) {
    %c0_i32 = arith.constant 0 : i32
    %c0_i32_0 = arith.constant 0 : i32
    %c0_i32_1 = arith.constant 0 : i32
    %c0_i32_2 = arith.constant 0 : i32
    return %c0_i32, %c0_i32_0, %c0_i32_1 : i32, i32, i32
  }
  func.func @transform_12(%arg0: i32) -> (i32, i32) {
    %c0_i32 = arith.constant 0 : i32
    %c0_i32_0 = arith.constant 0 : i32
    %c0_i32_1 = arith.constant 0 : i32
    return %c0_i32, %c0_i32_0 : i32, i32
  }
}

</mosaic_0001>

<bundles_post_ra>
// kernel: residual_block_forward.1
= control target key start
LH: loop header
LB: loop body
LE: loop exit
PB: predicated region body
PF: predicated region fallthrough
CT: control target
= control target key end

     0   :  { %v4442_v3 = vmov 0   ;;  %vm160_vm0 = vcmask 1043456   ;;  %s6659_s0 = inlined_call_operand.vmem [shape: bf16[128,72], index: 0, kind: input, shape index: {}]   ;;  %s6660_s1 = inlined_call_operand.vmem [shape: bf16[72,128], index: 1, kind: input, shape index: {}]   ;;  %s6661_s2 = inlined_call_operand.vmem [shape: f32[1,128], index: 2, kind: input, shape index: {}]   ;;  %s6662_s3 = inlined_call_operand.vmem [shape: f32[1,128], index: 3, kind: input, shape index: {}]   ;;  %s6663_s4 = inlined_call_operand.vmem [shape: bf16[128,8], index: 4, kind: input, shape index: {}]   ;;  %s6664_s5 = inlined_call_operand.vmem [shape: bf16[8,128], index: 5, kind: input, shape index: {}]   ;;  %s6665_s6 = inlined_call_operand.vmem [shape: f32[1,128], index: 6, kind: input, shape index: {}]   ;;  %s6666_s7 = inlined_call_operand.vmem [shape: f32[1,128], index: 7, kind: input, shape index: {}]   ;;  %s6667_s8 = inlined_call_operand.vmem [shape: bf16[3,384,128], index: 8, kind: input, shape index: {}]   ;;  %s6668_s9 = inlined_call_operand.vmem [shape: f32[1,128], index: 9, kind: input, shape index: {}]   ;;  %s6669_s10 = inlined_call_operand.vmem [shape: f32[1,128], index: 10, kind: input, shape index: {}]   ;;  %s6670_s11 = inlined_call_operand.vmem [shape: f32[9,128,1], index: 11, kind: input, shape index: {}]   ;;  %s6671_s12 = inlined_call_operand.hbm [shape: f32[128,128], index: 12, kind: output, shape index: {}]  }
   0x1   :  { %v421_v0 = vld [vmem:[%s6670_s11 + $0x20] sm:$0xff]  ;;  %v419_v1 = vld [vmem:[%s6670_s11 + $0x10] sm:$0xff]  ;;  %4386 = vset.pattern.permute.xlu2 %v4442_v3  ;;  %4385 = vset.pattern.permute.xlu1 %v4442_v3  ;;  %v422_v8 = vld [vmem:[%s6670_s11 + $0x28] sm:$0xff] }
   0x2   :  { %v417_v2 = vld [vmem:[%s6670_s11] sm:$0xff]  ;;  %4384 = vset.pattern.permute.xlu0 %v4442_v3  ;;  %455 = vperm.xlu2 %4386, %v421_v0   ;;  %v420_v9 = vld [vmem:[%s6670_s11 + $0x18] sm:$0xff]  ;;  %v418_v10 = vld [vmem:[%s6670_s11 + $0x8] sm:$0xff] }
   0x3   :  { %v67_v4 = vld [vmem:[%s6660_s1 + $0x20] sm:$0xf]  ;;  %445 = vperm.xlu1 %4385, %v419_v1   ;;  %435 = vperm.xlu0 %4384, %v417_v2   ;;  %v4281_v11 = vld [vmem:[%s6660_s1 + $0x18] sm:$0xff] }
   0x4   :  { %v125_v5 = vunpack.c.l.b16 %v67_v4 }
   0x6   :  { %v130_v6 = vpack.c.b16 %v125_v5, %v125_v5 }
   0x8   :  { %v162_v7 = vsel %vm160_vm0, %v130_v6, 0 }
   0x9   :  { %167 = vmatpush.bf16.msra.mxu0 %v162_v7 }
   0xa   :  { %17 = vsyncpa [#allocation4], 0  ;;  %460 = vperm.xlu2 %4386, %v422_v8   ;;  %v4280_v12 = vld [vmem:[%s6660_s1 + $0x10] sm:$0xff]  ;;  %v425_v13 = vld [vmem:[%s6670_s11 + $0x40] sm:$0xff]  ;;  %vm135_vm1 = vcmask 588800   ;;  %v4443_v46 = vmov 0.0  }
   0xb   :  { %450 = vperm.xlu1 %4385, %v420_v9   ;;  %440 = vperm.xlu0 %4384, %v418_v10   ;;  %v424_v14 = vld [vmem:[%s6670_s11 + $0x38] sm:$0xff]  ;;  %v423_v15 = vld [vmem:[%s6670_s11 + $0x30] sm:$0xff]  ;;  %v4279_v16 = vld [vmem:[%s6660_s1 + $0x8] sm:$0xff]  ;;  %381 = vst [vmem:[#allocation2] sm:$0xff] %v4443_v46  ;;  %vm3374_vm6 = vcmask 64512   ;;  %s4446_s30 = smov 128  }
   0xc   :  { %v4278_v17 = vld [vmem:[%s6660_s1] sm:$0xff]  ;;  %v428_v19 = vld [vmem:[%s6670_s11 + $0x58] sm:$0xff]  ;;  %v427_v20 = vld [vmem:[%s6670_s11 + $0x50] sm:$0xff]  ;;  %382 = vst [vmem:[#allocation2 + $0x8] sm:$0xff] %v4443_v46 }
   0xd   :  { %168 = vmatpush.bf16.msra.mxu0 %v4281_v11  ;;  %v4270_v18 = vld [vmem:[%s6659_s0] sm:$0xff]  ;;  %v426_v21 = vld [vmem:[%s6670_s11 + $0x48] sm:$0xff]  ;;  %v431_v22 = vld [vmem:[%s6670_s11 + $0x70] sm:$0xff]  ;;  %399 = vst [vmem:[#allocation2 + $0x90] sm:$0xff] %v4443_v46 }
   0xe   :  { %v430_v23 = vld [vmem:[%s6670_s11 + $0x68] sm:$0xff]  ;;  %v429_v24 = vld [vmem:[%s6670_s11 + $0x60] sm:$0xff]  ;;  %v432_v28 = vld [vmem:[%s6670_s11 + $0x78] sm:$0xff]  ;;  %400 = vst [vmem:[#allocation2 + $0x98] sm:$0xff] %v4443_v46 }
   0xf   :  { %v4271_v25 = vld [vmem:[%s6659_s0 + $0x8] sm:$0xff]  ;;  %v3718_v27 = vld [vmem:[%s6670_s11 + $0x80] sm:$0xff]  ;;  %v3721_v30 = vld [vmem:[%s6670_s11 + $0x98] sm:$0xff] }
  0x10   :  { %v3719_v26 = vld [vmem:[%s6670_s11 + $0x88] sm:$0xff]  ;;  %v3722_v29 = vld [vmem:[%s6670_s11 + $0xa0] sm:$0xff]  ;;  %v3720_v31 = vld [vmem:[%s6670_s11 + $0x90] sm:$0xff] }
  0x11   :  { %169 = vmatpush.bf16.msra.mxu0 %v4280_v12  ;;  %v4272_v32 = vld [vmem:[%s6659_s0 + $0x10] sm:$0xff]  ;;  %v3725_v33 = vld [vmem:[%s6670_s11 + $0xb8] sm:$0xff]  ;;  %v3723_v35 = vld [vmem:[%s6670_s11 + $0xa8] sm:$0xff] }
  0x12   :  { %475 = vperm.xlu2 %4386, %v425_v13   ;;  %v3724_v34 = vld [vmem:[%s6670_s11 + $0xb0] sm:$0xff]  ;;  %v3727_v37 = vld [vmem:[%s6670_s11 + $0xc8] sm:$0xff]  ;;  %v3726_v38 = vld [vmem:[%s6670_s11 + $0xc0] sm:$0xff] }
  0x13   :  { %470 = vperm.xlu1 %4385, %v424_v14   ;;  %465 = vperm.xlu0 %4384, %v423_v15   ;;  %v3728_v36 = vld [vmem:[%s6670_s11 + $0xd0] sm:$0xff]  ;;  %v4273_v39 = vld [vmem:[%s6659_s0 + $0x18] sm:$0xff]  ;;  %v3731_v40 = vld [vmem:[%s6670_s11 + $0xe8] sm:$0xff] }
  0x14   :  { %v3730_v41 = vld [vmem:[%s6670_s11 + $0xe0] sm:$0xff]  ;;  %v3729_v42 = vld [vmem:[%s6670_s11 + $0xd8] sm:$0xff]  ;;  %v3732_v45 = vld [vmem:[%s6670_s11 + $0xf0] sm:$0xff] }
  0x15   :  { %170 = vmatpush.bf16.msra.mxu0 %v4279_v16  ;;  %v3734_v43 = vld [vmem:[%s6670_s11 + $0x100] sm:$0xff]  ;;  %v3733_v44 = vld [vmem:[%s6670_s11 + $0xf8] sm:$0xff]  ;;  %v3736_v49 = vld [vmem:[%s6670_s11 + $0x110] sm:$0xff] }
  0x16   :  { %v4274_v47 = vld [vmem:[%s6659_s0 + $0x20] sm:$0xff]  ;;  %v3737_v48 = vld [vmem:[%s6670_s11 + $0x118] sm:$0xff]  ;;  %v3735_v50 = vld [vmem:[%s6670_s11 + $0x108] sm:$0xff] }
  0x17   :  { %v3740_v52 = vld [vmem:[%s6670_s11 + $0x130] sm:$0xff]  ;;  %v3739_v53 = vld [vmem:[%s6670_s11 + $0x128] sm:$0xff]  ;;  %v3738_v54 = vld [vmem:[%s6670_s11 + $0x120] sm:$0xff] }
  0x18   :  { %v4275_v56 = vld [vmem:[%s6659_s0 + $0x28] sm:$0xff]  ;;  %v3742_v58 = vld [vmem:[%s6670_s11 + $0x140] sm:$0xff]  ;;  %v3741_v59 = vld [vmem:[%s6670_s11 + $0x138] sm:$0xff] }
  0x19   :  { %171 = vmatpush.bf16.msra.mxu0 %v4278_v17  ;;  %v3743_v57 = vld [vmem:[%s6670_s11 + $0x148] sm:$0xff]  ;;  %v3746_v61 = vld [vmem:[%s6670_s11 + $0x160] sm:$0xff]  ;;  %v3745_v62 = vld [vmem:[%s6670_s11 + $0x158] sm:$0xff] }
  0x1a   :  { %490 = vperm.xlu2 %4386, %v428_v19   ;;  %v3744_v63 = vld [vmem:[%s6670_s11 + $0x150] sm:$0xff]  ;;  %v3749_v4 = vld [vmem:[%s6670_s11 + $0x178] sm:$0xff]  ;;  %v3747_v6 = vld [vmem:[%s6670_s11 + $0x168] sm:$0xff] }
  0x1b   :  { %485 = vperm.xlu1 %4385, %v427_v20   ;;  %480 = vperm.xlu0 %4384, %v426_v21   ;;  %v4276_v3 = vld [vmem:[%s6659_s0 + $0x30] sm:$0xff]  ;;  %v3770_v10 = vld [vmem:[%s6670_s11 + $0x220] sm:$0xff]  ;;  %v3755_v11 = vld [vmem:[%s6670_s11 + $0x1a8] sm:$0xff] }
  0x1c   :  { %3710 = vmatmul.msk.bf16.vlgmr.msra.gmra.mxu0 %vm135_vm1, %v4270_v18  ;;  %v3748_v5 = vld [vmem:[%s6670_s11 + $0x170] sm:$0xff]  ;;  %v3754_v12 = vld [vmem:[%s6670_s11 + $0x1a0] sm:$0xff]  ;;  %v4277_v16 = vld [vmem:[%s6659_s0 + $0x38] sm:$0xff] }
  0x1d   :  { %v3757_v17 = vld [vmem:[%s6670_s11 + $0x1b8] sm:$0xff]  ;;  %v3756_v18 = vld [vmem:[%s6670_s11 + $0x1b0] sm:$0xff]  ;;  %v3771_v19 = vld [vmem:[%s6670_s11 + $0x228] sm:$0xff] }
  0x1e   :  { %v3761_v46 = vld [vmem:[%s6670_s11 + $0x1d8] sm:$0xff] }
  0x22   :  { %505 = vperm.xlu2 %4386, %v431_v22  }
  0x23   :  { %500 = vperm.xlu1 %4385, %v430_v23   ;;  %495 = vperm.xlu0 %4384, %v429_v24   ;;  %v3758_v23 = vld [vmem:[%s6670_s11 + $0x1c0] sm:$0xff]  ;;  %v3773_v24 = vld [vmem:[%s6670_s11 + $0x238] sm:$0xff] }
  0x2a   :  { %585 = vperm.xlu2 %4386, %v3719_v26  }
  0x2b   :  { %580 = vperm.xlu1 %4385, %v3718_v27   ;;  %510 = vperm.xlu0 %4384, %v432_v28  }
  0x2c   :  { %3711 = vmatmul.msk.bf16.gmra.mxu0 %vm135_vm1, %v4271_v25  ;;  %v3772_v25 = vld [vmem:[%s6670_s11 + $0x230] sm:$0xff] }
  0x32   :  { %600 = vperm.xlu2 %4386, %v3722_v29   ;;  %v3775_v29 = vld [vmem:[%s6670_s11 + $0x248] sm:$0xff] }
  0x33   :  { %595 = vperm.xlu1 %4385, %v3721_v30   ;;  %590 = vperm.xlu0 %4384, %v3720_v31   ;;  %v3774_v31 = vld [vmem:[%s6670_s11 + $0x240] sm:$0xff] }
  0x3a   :  { %615 = vperm.xlu2 %4386, %v3725_v33  }
  0x3b   :  { %610 = vperm.xlu1 %4385, %v3724_v34   ;;  %605 = vperm.xlu0 %4384, %v3723_v35  }
  0x3c   :  { %3712 = vmatmul.msk.bf16.gmra.mxu0 %vm135_vm1, %v4272_v32  ;;  %v3759_v32 = vld [vmem:[%s6670_s11 + $0x1c8] sm:$0xff] }
  0x42   :  { %630 = vperm.xlu2 %4386, %v3728_v36   ;;  %v3760_v36 = vld [vmem:[%s6670_s11 + $0x1d0] sm:$0xff] }
  0x43   :  { %625 = vperm.xlu1 %4385, %v3727_v37   ;;  %620 = vperm.xlu0 %4384, %v3726_v38   ;;  %v3751_v38 = vld [vmem:[%s6670_s11 + $0x188] sm:$0xff] }
  0x4a   :  { %645 = vperm.xlu2 %4386, %v3731_v40  }
  0x4b   :  { %640 = vperm.xlu1 %4385, %v3730_v41   ;;  %635 = vperm.xlu0 %4384, %v3729_v42  }
  0x4c   :  { %3713 = vmatmul.msk.bf16.gmra.mxu0 %vm135_vm1, %v4273_v39  ;;  %v3750_v39 = vld [vmem:[%s6670_s11 + $0x180] sm:$0xff] }
  0x52   :  { %725 = vperm.xlu2 %4386, %v3734_v43   ;;  %v3777_v43 = vld [vmem:[%s6670_s11 + $0x258] sm:$0xff] }
  0x53   :  { %655 = vperm.xlu1 %4385, %v3733_v44   ;;  %650 = vperm.xlu0 %4384, %v3732_v45   ;;  %v3776_v45 = vld [vmem:[%s6670_s11 + $0x250] sm:$0xff] }
  0x5a   :  { %740 = vperm.xlu2 %4386, %v3737_v48  }
  0x5b   :  { %735 = vperm.xlu1 %4385, %v3736_v49   ;;  %730 = vperm.xlu0 %4384, %v3735_v50   ;;  %v3762_v50 = vld [vmem:[%s6670_s11 + $0x1e0] sm:$0xff] }
  0x5c   :  { %3714 = vmatmul.msk.bf16.gmra.mxu0 %vm135_vm1, %v4274_v47  ;;  %v4657_v51 = vpop.permute.xlu2 %455 }
  0x5d   :  { %6690 = vst [vmem:[#allocation6_spill] sm:$0xff] %v4657_v51 }
  0x62   :  { %755 = vperm.xlu2 %4386, %v3740_v52  }
  0x63   :  { %750 = vperm.xlu1 %4385, %v3739_v53   ;;  %745 = vperm.xlu0 %4384, %v3738_v54   ;;  %v3753_v53 = vld [vmem:[%s6670_s11 + $0x198] sm:$0xff]  ;;  %v3752_v54 = vld [vmem:[%s6670_s11 + $0x190] sm:$0xff] }
  0x64   :  { %v4668_v55 = vpop.permute.xlu2 %460 }
  0x65   :  { %6691 = vst [vmem:[#allocation7_spill] sm:$0xff] %v4668_v55 }
  0x6a   :  { %770 = vperm.xlu2 %4386, %v3743_v57  }
  0x6b   :  { %765 = vperm.xlu1 %4385, %v3742_v58   ;;  %760 = vperm.xlu0 %4384, %v3741_v59   ;;  %v3779_v59 = vld [vmem:[%s6670_s11 + $0x268] sm:$0xff] }
  0x6c   :  { %3715 = vmatmul.msk.bf16.gmra.mxu0 %vm135_vm1, %v4275_v56  ;;  %v4683_v60 = vpop.permute.xlu2 %475 }
  0x6d   :  { %6692 = vst [vmem:[#allocation8_spill] sm:$0xff] %v4683_v60 }
  0x72   :  { %785 = vperm.xlu2 %4386, %v3746_v61  }
  0x73   :  { %780 = vperm.xlu1 %4385, %v3745_v62   ;;  %775 = vperm.xlu0 %4384, %v3744_v63   ;;  %v3778_v62 = vld [vmem:[%s6670_s11 + $0x260] sm:$0xff]  ;;  %v3763_v63 = vld [vmem:[%s6670_s11 + $0x1e8] sm:$0xff] }
  0x74   :  { %v4694_v0 = vpop.permute.xlu2 %490 }
  0x75   :  { %6693 = vst [vmem:[#allocation9_spill] sm:$0xff] %v4694_v0  ;;  %v4696_v1 = vpop.permute.xlu1 %445  ;;  %v4698_v2 = vpop.permute.xlu0 %435 }
  0x7a   :  { %800 = vperm.xlu2 %4386, %v3749_v4  }
  0x7b   :  { %795 = vperm.xlu1 %4385, %v3748_v5   ;;  %790 = vperm.xlu0 %4384, %v3747_v6   ;;  %v3764_v6 = vld [vmem:[%s6670_s11 + $0x1f0] sm:$0xff] }
  0x7c   :  { %3716 = vmatmul.msk.bf16.gmra.mxu0 %vm135_vm1, %v4276_v3  ;;  %v4713_v7 = vpop.permute.xlu2 %505 }
  0x7d   :  { %6694 = vst [vmem:[#allocation10_spill] sm:$0xff] %v4713_v7  ;;  %v4715_v8 = vpop.permute.xlu1 %450  ;;  %v4717_v9 = vpop.permute.xlu0 %440 }
  0x82   :  { %1227 = vperm.xlu2 %4386, %v3770_v10  }
  0x83   :  { %1087 = vperm.xlu1 %4385, %v3755_v11   ;;  %1082 = vperm.xlu0 %4384, %v3754_v12   ;;  %v3767_v11 = vld [vmem:[%s6670_s11 + $0x208] sm:$0xff]  ;;  %v3766_v12 = vld [vmem:[%s6670_s11 + $0x200] sm:$0xff] }
  0x84   :  { %v4728_v13 = vpop.permute.xlu2 %585 }
  0x85   :  { %6695 = vst [vmem:[#allocation11_spill] sm:$0xff] %v4728_v13  ;;  %v4730_v14 = vpop.permute.xlu1 %470  ;;  %v4732_v15 = vpop.permute.xlu0 %465 }
  0x86   :  { %6696 = vst [vmem:[#allocation12_spill] sm:$0xff] %v4730_v14 }
  0x87   :  { %6697 = vst [vmem:[#allocation13_spill] sm:$0xff] %v4732_v15 }
  0x8a   :  { %1097 = vperm.xlu2 %4386, %v3757_v17  }
  0x8b   :  { %1092 = vperm.xlu1 %4385, %v3756_v18   ;;  %1232 = vperm.xlu0 %4384, %v3771_v19   ;;  %v3781_v19 = vld [vmem:[%s6670_s11 + $0x278] sm:$0xff] }
  0x8c   :  { %3717 = vmatmul.msk.bf16.gmra.mxu0 %vm135_vm1, %v4277_v16  ;;  %v4747_v20 = vpop.permute.xlu2 %600 }
  0x8d   :  { %6698 = vst [vmem:[#allocation14_spill] sm:$0xff] %v4747_v20  ;;  %v4749_v21 = vpop.permute.xlu1 %485  ;;  %v4751_v22 = vpop.permute.xlu0 %480  ;;  %v5095_v20 = vld [vmem:[%s6667_s8 + $0x130] sm:$0xff] }
  0x8e   :  { %6699 = vst [vmem:[#allocation15_spill] sm:$0xff] %v4749_v21 }
  0x8f   :  { %6700 = vst [vmem:[#allocation16_spill] sm:$0xff] %v4751_v22 }
  0x92   :  { %1102 = vperm.xlu2 %4386, %v3758_v23  }
  0x93   :  { %1242 = vperm.xlu1 %4385, %v3773_v24   ;;  %1237 = vperm.xlu0 %4384, %v3772_v25   ;;  %v3780_v24 = vld [vmem:[%s6670_s11 + $0x270] sm:$0xff]  ;;  %v3765_v25 = vld [vmem:[%s6670_s11 + $0x1f8] sm:$0xff] }
  0x94   :  { %v4762_v26 = vpop.permute.xlu2 %615 }
  0x95   :  { %6701 = vst [vmem:[#allocation17_spill] sm:$0xff] %v4762_v26  ;;  %v4764_v27 = vpop.permute.xlu1 %500  ;;  %v4766_v28 = vpop.permute.xlu0 %495 }
  0x96   :  { %6702 = vst [vmem:[#allocation18_spill] sm:$0xff] %v4764_v27 }
  0x97   :  { %6703 = vst [vmem:[#allocation19_spill] sm:$0xff] %v4766_v28 }
  0x99   :  { %v4771_v30 = vpop.f32.mrf.mxu0 }
  0x9a   :  { %1252 = vperm.xlu2 %4386, %v3775_v29  }
  0x9b   :  { %1247 = vperm.xlu1 %4385, %v3774_v31   ;;  %1107 = vperm.xlu0 %4384, %v3759_v32  }
  0x9c   :  { %v4779_v33 = vpop.permute.xlu2 %630 }
  0x9d   :  { %6704 = vst [vmem:[#allocation20_spill] sm:$0xff] %v4779_v33  ;;  %v4781_v34 = vpop.permute.xlu1 %580  ;;  %v4783_v35 = vpop.permute.xlu0 %510 }
  0x9e   :  { %6705 = vst [vmem:[#allocation21_spill] sm:$0xff] %v4781_v34  ;;  %v4308_v34 = vld [vmem:[%s6667_s8 + $0xd0] sm:$0xff] }
  0x9f   :  { %6706 = vst [vmem:[#allocation22_spill] sm:$0xff] %v4783_v35 }
  0xa1   :  { %v4788_v37 = vpop.f32.mrf.mxu0 }
  0xa2   :  { %1112 = vperm.xlu2 %4386, %v3760_v36   ;;  %v3782_v36 = vld [vmem:[%s6670_s11 + $0x280] sm:$0xff] }
  0xa3   :  { %1067 = vperm.xlu1 %4385, %v3751_v38   ;;  %1062 = vperm.xlu0 %4384, %v3750_v39   ;;  %v3769_v39 = vld [vmem:[%s6670_s11 + $0x218] sm:$0xff] }
  0xa4   :  { %v4796_v40 = vpop.permute.xlu2 %645 }
  0xa5   :  { %6707 = vst [vmem:[#allocation23_spill] sm:$0xff] %v4796_v40  ;;  %v4798_v41 = vpop.permute.xlu1 %595  ;;  %v4800_v42 = vpop.permute.xlu0 %590 }
  0xa6   :  { %6708 = vst [vmem:[#allocation24_spill] sm:$0xff] %v4798_v41 }
  0xa7   :  { %6709 = vst [vmem:[#allocation25_spill] sm:$0xff] %v4800_v42 }
  0xa9   :  { %v4805_v44 = vpop.f32.mrf.mxu0 }
  0xaa   :  { %1262 = vperm.xlu2 %4386, %v3777_v43   ;;  %v3768_v43 = vld [vmem:[%s6670_s11 + $0x210] sm:$0xff] }
  0xab   :  { %1257 = vperm.xlu1 %4385, %v3776_v45   ;;  %1117 = vperm.xlu0 %4384, %v3761_v46  }
  0xac   :  { %v4813_v47 = vpop.permute.xlu2 %725 }
  0xad   :  { %6710 = vst [vmem:[#allocation26_spill] sm:$0xff] %v4813_v47  ;;  %v4815_v48 = vpop.permute.xlu1 %610  ;;  %v4817_v49 = vpop.permute.xlu0 %605 }
  0xae   :  { %6711 = vst [vmem:[#allocation27_spill] sm:$0xff] %v4815_v48 }
  0xaf   :  { %6712 = vst [vmem:[#allocation28_spill] sm:$0xff] %v4817_v49 }
  0xb1   :  { %v4822_v52 = vpop.f32.mrf.mxu0 }
  0xb2   :  { %1122 = vperm.xlu2 %4386, %v3762_v50  }
  0xb3   :  { %1077 = vperm.xlu1 %4385, %v3753_v53   ;;  %1072 = vperm.xlu0 %4384, %v3752_v54   ;;  %v3785_v53 = vld [vmem:[%s6670_s11 + $0x298] sm:$0xff] }
  0xb4   :  { %v4830_v56 = vpop.permute.xlu2 %740 }
  0xb5   :  { %6713 = vst [vmem:[#allocation29_spill] sm:$0xff] %v4830_v56  ;;  %v4832_v57 = vpop.permute.xlu1 %625  ;;  %v4834_v58 = vpop.permute.xlu0 %620  ;;  %v4444_v56 = vmov 128.0  }
  0xb6   :  { %6714 = vst [vmem:[#allocation30_spill] sm:$0xff] %v4832_v57  ;;  %4393 = vrcp.f32 %v4444_v56  ;;  %v4071_v56 = vld [vmem:[%s6670_s11 + $0x408] sm:$0xff] }
  0xb7   :  { %6715 = vst [vmem:[#allocation31_spill] sm:$0xff] %v4834_v58 }
  0xb9   :  { %v4839_v61 = vpop.f32.mrf.mxu0 }
  0xba   :  { %1272 = vperm.xlu2 %4386, %v3779_v59   ;;  %v3784_v59 = vld [vmem:[%s6670_s11 + $0x290] sm:$0xff] }
  0xbb   :  { %1267 = vperm.xlu1 %4385, %v3778_v62   ;;  %1127 = vperm.xlu0 %4384, %v3763_v63   ;;  %v3783_v62 = vld [vmem:[%s6670_s11 + $0x288] sm:$0xff] }
  0xbc   :  { %v4847_v3 = vpop.permute.xlu2 %755 }
  0xbd   :  { %6716 = vst [vmem:[#allocation32_spill] sm:$0xff] %v4847_v3  ;;  %v4849_v4 = vpop.permute.xlu1 %640  ;;  %v4851_v5 = vpop.permute.xlu0 %635 }
  0xbe   :  { %6717 = vst [vmem:[#allocation33_spill] sm:$0xff] %v4849_v4  ;;  %v3796_v4 = vld [vmem:[%s6670_s11 + $0x2f0] sm:$0xff] }
  0xbf   :  { %6718 = vst [vmem:[#allocation34_spill] sm:$0xff] %v4851_v5 }
  0xc1   :  { %v4856_v10 = vpop.f32.mrf.mxu0 }
  0xc2   :  { %1132 = vperm.xlu2 %4386, %v3764_v6   ;;  %v249_v33 = vmul.f32 %v4856_v10, %v4856_v10 }
  0xc3   :  { %1212 = vperm.xlu1 %4385, %v3767_v11   ;;  %1207 = vperm.xlu0 %4384, %v3766_v12   ;;  %v3788_v12 = vld [vmem:[%s6670_s11 + $0x2b0] sm:$0xff] }
  0xc4   :  { %v4864_v16 = vpop.permute.xlu2 %770 }
  0xc5   :  { %6719 = vst [vmem:[#allocation35_spill] sm:$0xff] %v4864_v16  ;;  %v4866_v17 = vpop.permute.xlu1 %655  ;;  %v4868_v18 = vpop.permute.xlu0 %650 }
  0xc6   :  { %6720 = vst [vmem:[#allocation36_spill] sm:$0xff] %v4866_v17  ;;  %v246_v17 = vmul.f32 %v4805_v44, %v4805_v44 }
  0xc7   :  { %6721 = vst [vmem:[#allocation37_spill] sm:$0xff] %v4868_v18 }
  0xc9   :  { %v4873_v23 = vpop.f32.mrf.mxu0 }
  0xca   :  { %1282 = vperm.xlu2 %4386, %v3781_v19  }
  0xcb   :  { %1277 = vperm.xlu1 %4385, %v3780_v24   ;;  %1137 = vperm.xlu0 %4384, %v3765_v25   ;;  %v3787_v24 = vld [vmem:[%s6670_s11 + $0x2a8] sm:$0xff]  ;;  %v3786_v25 = vld [vmem:[%s6670_s11 + $0x2a0] sm:$0xff] }
  0xcc   :  { %v4881_v29 = vpop.permute.xlu2 %785 }
  0xcd   :  { %6722 = vst [vmem:[#allocation38_spill] sm:$0xff] %v4881_v29  ;;  %v4883_v31 = vpop.permute.xlu1 %735  ;;  %v4885_v32 = vpop.permute.xlu0 %730  ;;  %v3794_v29 = vld [vmem:[%s6670_s11 + $0x2e0] sm:$0xff] }
  0xce   :  { %6723 = vst [vmem:[#allocation39_spill] sm:$0xff] %v4883_v31 }
  0xcf   :  { %6724 = vst [vmem:[#allocation40_spill] sm:$0xff] %v4885_v32 }
  0xd1   :  { %v4890_v38 = vpop.f32.mrf.mxu0 }
  0xd2   :  { %1352 = vperm.xlu2 %4386, %v3782_v36  }
  0xd3   :  { %1222 = vperm.xlu1 %4385, %v3769_v39   ;;  %1217 = vperm.xlu0 %4384, %v3768_v43  }
  0xd4   :  { %v4898_v45 = vpop.permute.xlu2 %800 }
  0xd5   :  { %6725 = vst [vmem:[#allocation41_spill] sm:$0xff] %v4898_v45  ;;  %v4900_v46 = vpop.permute.xlu1 %750  ;;  %v4902_v50 = vpop.permute.xlu0 %745 }
  0xd6   :  { %6726 = vst [vmem:[#allocation42_spill] sm:$0xff] %v4900_v46 }
  0xd7   :  { %6727 = vst [vmem:[#allocation43_spill] sm:$0xff] %v4902_v50 }
  0xd9   :  { %v4907_v54 = vpop.f32.mrf.mxu0 }
  0xda   :  { %1367 = vperm.xlu2 %4386, %v3785_v53   ;;  %v3791_v53 = vld [vmem:[%s6670_s11 + $0x2c8] sm:$0xff] }
  0xdb   :  { %1362 = vperm.xlu1 %4385, %v3784_v59   ;;  %1357 = vperm.xlu0 %4384, %v3783_v62   ;;  %v3790_v62 = vld [vmem:[%s6670_s11 + $0x2c0] sm:$0xff] }
  0xdc   :  { %v4915_v63 = vpop.permute.xlu2 %1227 }
  0xdd   :  { %v4917_v6 = vpop.permute.xlu1 %765  ;;  %v4919_v11 = vpop.permute.xlu0 %760 }
  0xde   :  { %6728 = vst [vmem:[#allocation44_spill] sm:$0xff] %v4917_v6 }
  0xdf   :  { %6729 = vst [vmem:[#allocation45_spill] sm:$0xff] %v4919_v11 }
  0xe1   :  { %v4924_v19 = vpop.f32.mrf.mxu0 }
  0xe2   :  { %1382 = vperm.xlu2 %4386, %v3788_v12   ;;  %v3789_v12 = vld [vmem:[%s6670_s11 + $0x2b8] sm:$0xff]  ;;  %v253_v58 = vmul.f32 %v4924_v19, %v4924_v19 }
  0xe3   :  { %1377 = vperm.xlu1 %4385, %v3787_v24   ;;  %1372 = vperm.xlu0 %4384, %v3786_v25  }
  0xe4   :  { %v4932_v36 = vpop.permute.xlu2 %1097 }
  0xe5   :  { %v4934_v39 = vpop.permute.xlu1 %780  ;;  %v4936_v43 = vpop.permute.xlu0 %775 }
  0xe6   :  { %6730 = vst [vmem:[#allocation46_spill] sm:$0xff] %v4934_v39 }
  0xe7   :  { %6731 = vst [vmem:[#allocation47_spill] sm:$0xff] %v4936_v43  ;;  %v3793_v43 = vld [vmem:[%s6670_s11 + $0x2d8] sm:$0xff] }
  0xe9   :  { %v4941_v59 = vpop.f32.mrf.mxu0 }
  0xea   :  { %1397 = vperm.xlu2 %4386, %v3791_v53   ;;  %v3792_v53 = vld [vmem:[%s6670_s11 + $0x2d0] sm:$0xff]  ;;  %v254_v31 = vmul.f32 %v4941_v59, %v4941_v59 }
  0xeb   :  { %1392 = vperm.xlu1 %4385, %v3790_v62   ;;  %1387 = vperm.xlu0 %4384, %v3789_v12   ;;  %v245_v62 = vmul.f32 %v4788_v37, %v4788_v37 }
  0xec   :  { %v4949_v24 = vpop.permute.xlu2 %1102 }
  0xed   :  { %6732 = vst [vmem:[#allocation48_spill] sm:$0xff] %v4949_v24  ;;  %v4951_v25 = vpop.permute.xlu1 %795  ;;  %v4953_v45 = vpop.permute.xlu0 %790 }
  0xee   :  { %6733 = vst [vmem:[#allocation49_spill] sm:$0xff] %v4951_v25  ;;  %v244_v25 = vmul.f32 %v4771_v30, %v4771_v30 }
  0xef   :  { %6734 = vst [vmem:[#allocation50_spill] sm:$0xff] %v4953_v45  ;;  %v215_v45 = vadd.f32 %v4788_v37, %v4771_v30 }
  0xf0   :  { %v260_v6 = vadd.f32 %v245_v62, %v244_v25  ;;  %v3795_v25 = vld [vmem:[%s6670_s11 + $0x2e8] sm:$0xff] }
  0xf1   :  { %v4958_v39 = vpop.f32.mrf.mxu0 }
  0xf2   :  { %1412 = vperm.xlu2 %4386, %v3794_v29   ;;  %v216_v29 = vadd.f32 %v215_v45, %v4805_v44  ;;  %v261_v11 = vadd.f32 %v260_v6, %v246_v17  ;;  %v248_v45 = vmul.f32 %v4839_v61, %v4839_v61 }
  0xf3   :  { %1407 = vperm.xlu1 %4385, %v3793_v43   ;;  %1402 = vperm.xlu0 %4384, %v3792_v53   ;;  %v247_v43 = vmul.f32 %v4822_v52, %v4822_v52  ;;  %v3797_v53 = vld [vmem:[%s6670_s11 + $0x2f8] sm:$0xff] }
  0xf4   :  { %v4968_v12 = vpop.permute.xlu2 %1252  ;;  %v217_v3 = vadd.f32 %v216_v29, %v4822_v52  ;;  %v250_v29 = vmul.f32 %v4873_v23, %v4873_v23 }
  0xf5   :  { %6735 = vst [vmem:[#allocation51_spill] sm:$0xff] %v4968_v12  ;;  %v4976_v18 = vpop.permute.xlu1 %1087  ;;  %v4978_v16 = vpop.permute.xlu0 %1082  ;;  %v262_v5 = vadd.f32 %v261_v11, %v247_v43  ;;  %v251_v43 = vmul.f32 %v4890_v38, %v4890_v38 }
  0xf6   :  { %v218_v62 = vadd.f32 %v217_v3, %v4839_v61 }
  0xf7   :  { %v263_v17 = vadd.f32 %v262_v5, %v248_v45 }
  0xf8   :  { %v219_v6 = vadd.f32 %v218_v62, %v4856_v10  ;;  %v252_v62 = vmul.f32 %v4907_v54, %v4907_v54 }
  0xf9   :  { %v4986_v40 = vpop.f32.mrf.mxu0  ;;  %v264_v11 = vadd.f32 %v263_v17, %v249_v33  ;;  %v4038_v33 = vld [vmem:[%s6670_s11 + $0x300] sm:$0xff] }
  0xfa   :  { %1427 = vperm.xlu2 %4386, %v3797_v53   ;;  %v220_v3 = vadd.f32 %v219_v6, %v4873_v23  ;;  %v4039_v53 = vld [vmem:[%s6670_s11 + $0x308] sm:$0xff] }
  0xfb   :  { %1422 = vperm.xlu1 %4385, %v3796_v4   ;;  %1417 = vperm.xlu0 %4384, %v3795_v25   ;;  %v4054_v4 = vld [vmem:[%s6670_s11 + $0x380] sm:$0xff]  ;;  %v265_v45 = vadd.f32 %v264_v11, %v250_v29 }
  0xfc   :  { %v5000_v46 = vpop.permute.xlu2 %1112  ;;  %v221_v25 = vadd.f32 %v220_v3, %v4890_v38 }
  0xfd   :  { %6736 = vst [vmem:[#allocation52_spill] sm:$0xff] %v5000_v46  ;;  %v5005_v50 = vpop.permute.xlu1 %1092  ;;  %v5007_v57 = vpop.permute.xlu0 %1232  ;;  %v266_v6 = vadd.f32 %v265_v45, %v251_v43  ;;  %v4309_v46 = vld [vmem:[%s6667_s8 + $0xd8] sm:$0xff] }
  0xfe   :  { %v222_v17 = vadd.f32 %v221_v25, %v4907_v54 }
  0xff   :  { %v267_v3 = vadd.f32 %v266_v6, %v252_v62  ;;  %v4070_v62 = vld [vmem:[%s6670_s11 + $0x400] sm:$0xff] }
 0x100   :  { %v223_v11 = vadd.f32 %v222_v17, %v4924_v19 }
 0x101   :  { %v5015_v5 = vpop.f32.mrf.mxu0  ;;  %v268_v45 = vadd.f32 %v267_v3, %v253_v58  ;;  %v256_v58 = vmul.f32 %v4986_v40, %v4986_v40  ;;  %v4055_v3 = vld [vmem:[%s6670_s11 + $0x388] sm:$0xff] }
 0x102   :  { %2417 = vperm.xlu2 %4386, %v4054_v4   ;;  %v224_v43 = vadd.f32 %v223_v11, %v4941_v59  ;;  %v257_v26 = vmul.f32 %v5015_v5, %v5015_v5 }
 0x103   :  { %2277 = vperm.xlu1 %4385, %v4039_v53   ;;  %2272 = vperm.xlu0 %4384, %v4038_v33   ;;  %v255_v53 = vmul.f32 %v4958_v39, %v4958_v39  ;;  %v4394_v33 = vpop.eup %4393  ;;  %v269_v17 = vadd.f32 %v268_v45, %v254_v31 }
 0x104   :  { %v5029_v29 = vpop.permute.xlu2 %1262  ;;  %v225_v6 = vadd.f32 %v224_v43, %v4958_v39  ;;  %v237_v31 = vmul.f32 128.0, %v4394_v33  ;;  %vm241_vm2 = vweird.f32 %v4394_v33 }
 0x105   :  { %6737 = vst [vmem:[#allocation53_spill] sm:$0xff] %v5029_v29  ;;  %v5034_v35 = vpop.permute.xlu1 %1242  ;;  %v5036_v4 = vpop.permute.xlu0 %1237  ;;  %v270_v7 = vadd.f32 %v269_v17, %v255_v53 }
 0x106   :  { %v226_v11 = vadd.f32 %v225_v6, %v4986_v40 }
 0x107   :  { %v271_v43 = vadd.f32 %v270_v7, %v256_v58  ;;  %v4041_v7 = vld [vmem:[%s6670_s11 + $0x318] sm:$0xff] }
 0x108   :  { %v227_v45 = vadd.f32 %v226_v11, %v5015_v5 }
 0x109   :  { %v5044_v25 = vpop.f32.mrf.mxu0  ;;  %v272_v17 = vadd.f32 %v271_v43, %v257_v26  ;;  %v4040_v26 = vld [vmem:[%s6670_s11 + $0x310] sm:$0xff]  ;;  %v5085_v43 = vld [vmem:[%s6667_s8 + $0x138] sm:$0xff] }
 0x10a   :  { %2567 = vperm.xlu2 %4386, %v4071_v56   ;;  %v258_v32 = vmul.f32 %v5044_v25, %v5044_v25  ;;  %v228_v53 = vadd.f32 %v227_v45, %v5044_v25  ;;  %4370 = vmatpush.bf16.msra.mxu2 %v5085_v43 }
 0x10b   :  { %2562 = vperm.xlu1 %4385, %v4070_v62   ;;  %2422 = vperm.xlu0 %4384, %v4055_v3   ;;  %v4056_v62 = vld [vmem:[%s6670_s11 + $0x390] sm:$0xff]  ;;  %v238_v3 = vsub.f32 1.0, %v237_v31 }
 0x10c   :  { %v5058_v48 = vpop.permute.xlu2 %1122  ;;  %v273_v58 = vadd.f32 %v272_v17, %v258_v32 }
 0x10d   :  { %6738 = vst [vmem:[#allocation54_spill] sm:$0xff] %v5058_v48  ;;  %v5063_v47 = vpop.permute.xlu1 %1247  ;;  %v5065_v56 = vpop.permute.xlu0 %1107  ;;  %v239_v32 = vmul.f32 %v4394_v33, %v238_v3  ;;  %v4073_v3 = vld [vmem:[%s6670_s11 + $0x418] sm:$0xff] }
 0x10e   :  { %6739 = vst [vmem:[#allocation55_spill] sm:$0xff] %v5063_v47  ;;  %4371 = vmatpush.bf16.msra.mxu2 %v5095_v20 }
 0x10f   :  { %6740 = vst [vmem:[#allocation56_spill] sm:$0xff] %v5065_v56 }
 0x111   :  { %v5071_v6 = vpop.f32.mrf.mxu0 }
 0x112   :  { %v229_v11 = vadd.f32 %v228_v53, %v5071_v6  ;;  %v259_v27 = vmul.f32 %v5071_v6, %v5071_v6  ;;  %2427 = vperm.xlu2 %4386, %v4056_v62  }
 0x113   :  { %2287 = vperm.xlu1 %4385, %v4041_v7   ;;  %2282 = vperm.xlu0 %4384, %v4040_v26   ;;  %v240_v7 = vadd.f32 %v4394_v33, %v239_v32  ;;  %v5118_v32 = vld [vmem:[%s6667_s8 + $0x128] sm:$0xff] }
 0x114   :  { %v230_v31 = vrot.slane %v229_v11, 4  ;;  %v274_v45 = vadd.f32 %v273_v58, %v259_v27  ;;  %v5088_v53 = vpop.permute.xlu2 %1272  ;;  %v4072_v58 = vld [vmem:[%s6670_s11 + $0x410] sm:$0xff]  ;;  %4372 = vmatpush.bf16.msra.mxu2 %v5118_v32 }
 0x115   :  { %v5090_v49 = vpop.permute.xlu1 %1067  ;;  %v5097_v0 = vpop.permute.xlu0 %1062  ;;  %v5120_v21 = vsel %vm241_vm2, %v4394_v33, %v240_v7  ;;  %v4288_v33 = vld [vmem:[%s6667_s8 + $0x30] sm:$0xff] }
 0x116   :  { %v231_v17 = vadd.f32 %v230_v31, %v229_v11  ;;  %v275_v28 = vrot.slane %v274_v45, 4  ;;  %v4057_v31 = vld [vmem:[%s6670_s11 + $0x398] sm:$0xff]  ;;  %6741 = vst [vmem:[#allocation57_spill] sm:$0xff] %v5120_v21 }
 0x118   :  { %v232_v62 = vrot.slane %v231_v17, 2  ;;  %v276_v27 = vadd.f32 %v275_v28, %v274_v45  ;;  %v4313_v28 = vld [vmem:[%s6667_s8 + $0xf8] sm:$0xff] }
 0x119   :  { %v4289_v45 = vld [vmem:[%s6667_s8 + $0x38] sm:$0xff]  ;;  %1799 = vmatpush.bf16.msra.mxu1 %v4313_v28  ;;  %4362 = vmatpush.bf16.msra.mxu3 %v4313_v28 }
 0x11a   :  { %v233_v11 = vadd.f32 %v232_v62, %v231_v17  ;;  %v277_v26 = vrot.slane %v276_v27, 2  ;;  %2577 = vperm.xlu2 %4386, %v4073_v3   ;;  %2090 = vmatpush.bf16.msrb.mxu0 %v4289_v45  ;;  %v4312_v3 = vld [vmem:[%s6667_s8 + $0xf0] sm:$0xff]  ;;  %v4287_v45 = vld [vmem:[%s6667_s8 + $0x28] sm:$0xff] }
 0x11b   :  { %2572 = vperm.xlu1 %4385, %v4072_v58   ;;  %2432 = vperm.xlu0 %4384, %v4057_v31  }
 0x11c   :  { %v234_v17 = vrot.slane %v233_v11, 1  ;;  %v278_v62 = vadd.f32 %v277_v26, %v276_v27  ;;  %v5122_v48 = vpop.permute.xlu2 %1132  ;;  %v4043_v26 = vld [vmem:[%s6670_s11 + $0x328] sm:$0xff] }
 0x11d   :  { %6742 = vst [vmem:[#allocation58_spill] sm:$0xff] %v5122_v48  ;;  %v5124_v22 = vpop.permute.xlu1 %1257  ;;  %v5130_v27 = vpop.permute.xlu0 %1117  ;;  %1800 = vmatpush.bf16.msra.mxu1 %v4312_v3  ;;  %4363 = vmatpush.bf16.msra.mxu3 %v4312_v3 }
 0x11e   :  { %v235_v41 = vadd.f32 %v234_v17, %v233_v11  ;;  %v279_v42 = vrot.slane %v278_v62, 1  ;;  %6743 = vst [vmem:[#allocation59_spill] sm:$0xff] %v5124_v22  ;;  %v4058_v11 = vld [vmem:[%s6670_s11 + $0x3a0] sm:$0xff]  ;;  %2091 = vmatpush.bf16.msrb.mxu0 %v4288_v33 }
 0x11f   :  { %6744 = vst [vmem:[#allocation60_spill] sm:$0xff] %v5130_v27  ;;  %v5159_v17 = vld [vmem:[%s6667_s8 + $0x120] sm:$0xff]  ;;  %v4285_v27 = vld [vmem:[%s6667_s8 + $0x18] sm:$0xff] }
 0x120   :  { %v5136_v7 = vmul.f32 %v5120_v21, %v235_v41  ;;  %v280_v58 = vadd.f32 %v279_v42, %v278_v62  ;;  %v4042_v41 = vld [vmem:[%s6670_s11 + $0x320] sm:$0xff]  ;;  %v4311_v42 = vld [vmem:[%s6667_s8 + $0xe8] sm:$0xff]  ;;  %4373 = vmatpush.bf16.msra.mxu2 %v5159_v17 }
 0x121   :  { %1801 = vmatpush.bf16.msra.mxu1 %v4311_v42  ;;  %4364 = vmatpush.bf16.msra.mxu3 %v4311_v42  ;;  %v4286_v42 = vld [vmem:[%s6667_s8 + $0x20] sm:$0xff] }
 0x122   :  { %v281_v31 = vmul.f32 %v280_v58, %v5120_v21  ;;  %v282_v28 = vmul.f32 %v5136_v7, %v5136_v7  ;;  %2437 = vperm.xlu2 %4386, %v4058_v11   ;;  %2092 = vmatpush.bf16.msrb.mxu0 %v4287_v45  ;;  %v4310_v21 = vld [vmem:[%s6667_s8 + $0xe0] sm:$0xff]  ;;  %v5192_v45 = vld [vmem:[%s6667_s8 + $0x110] sm:$0xff]  ;;  %v295_v14 = vsub.f32 %v4958_v39, %v5136_v7 }
 0x123   :  { %2297 = vperm.xlu1 %4385, %v4043_v26   ;;  %2292 = vperm.xlu0 %4384, %v4042_v41   ;;  %v5174_v26 = vld [vmem:[%s6667_s8 + $0x118] sm:$0xff]  ;;  %v4059_v41 = vld [vmem:[%s6670_s11 + $0x3a8] sm:$0xff]  ;;  %v290_v47 = vsub.f32 %v4873_v23, %v5136_v7 }
 0x124   :  { %v283_v62 = vsub.f32 %v281_v31, %v282_v28  ;;  %v5161_v3 = vpop.permute.xlu2 %1282  ;;  %v4075_v31 = vld [vmem:[%s6670_s11 + $0x428] sm:$0xff]  ;;  %v4074_v28 = vld [vmem:[%s6670_s11 + $0x420] sm:$0xff]  ;;  %4374 = vmatpush.bf16.msra.mxu2 %v5174_v26 }
 0x125   :  { %v5163_v58 = vpop.permute.xlu1 %1077  ;;  %v5165_v11 = vpop.permute.xlu0 %1072  ;;  %1802 = vmatpush.bf16.msra.mxu1 %v4310_v21  ;;  %4365 = vmatpush.bf16.msra.mxu3 %v4310_v21 }
 0x126   :  { %v300_v33 = vadd.f32 1e-05, %v283_v62  ;;  %2093 = vmatpush.bf16.msrb.mxu0 %v4286_v42  ;;  %v4045_v42 = vld [vmem:[%s6670_s11 + $0x338] sm:$0xff] }
 0x128   :  { %4395 = vrsqrt.f32 %v300_v33  ;;  %4375 = vmatpush.bf16.msra.mxu2 %v5192_v45  ;;  %vm307_vm4 = vweird.f32 %v300_v33 }
 0x129   :  { %1803 = vmatpush.bf16.msra.mxu1 %v4309_v46  ;;  %4366 = vmatpush.bf16.msra.mxu3 %v4309_v46 }
 0x12a   :  { %2587 = vperm.xlu2 %4386, %v4075_v31   ;;  %2094 = vmatpush.bf16.msrb.mxu0 %v4285_v27  ;;  %v299_v27 = vsub.f32 %v5071_v6, %v5136_v7  ;;  %v285_v6 = vsub.f32 %v4788_v37, %v5136_v7  ;;  %v287_v37 = vsub.f32 %v4822_v52, %v5136_v7  ;;  %v4061_v52 = vld [vmem:[%s6670_s11 + $0x3b8] sm:$0xff] }
 0x12b   :  { %2582 = vperm.xlu1 %4385, %v4074_v28   ;;  %2442 = vperm.xlu0 %4384, %v4059_v41   ;;  %v4060_v28 = vld [vmem:[%s6670_s11 + $0x3b0] sm:$0xff] }
 0x12c   :  { %v5194_v62 = vpop.permute.xlu2 %1352 }
 0x12d   :  { %6745 = vst [vmem:[#allocation61_spill] sm:$0xff] %v5194_v62  ;;  %v5196_v60 = vpop.permute.xlu1 %1267  ;;  %v5198_v31 = vpop.permute.xlu0 %1127  ;;  %v4044_v62 = vld [vmem:[%s6670_s11 + $0x330] sm:$0xff]  ;;  %1804 = vmatpush.bf16.msra.mxu1 %v4308_v34  ;;  %4367 = vmatpush.bf16.msra.mxu3 %v4308_v34  ;;  %v5241_v34 = vld [vmem:[%s6667_s8 + $0x100] sm:$0xff] }
 0x12e   :  { %v4396_v48 = vpop.eup %4395  ;;  %6746 = vst [vmem:[#allocation62_spill] sm:$0xff] %v5198_v31 }
 0x12f   :  { %v302_v21 = vmul.f32 %v4396_v48, %v300_v33  ;;  %vm308_vm3 = vweird.f32 %v4396_v48  ;;  %v298_v33 = vsub.f32 %v5044_v25, %v5136_v7  ;;  %v4076_v25 = vld [vmem:[%s6670_s11 + $0x430] sm:$0xff] }
 0x130   :  { %vm309_vm5 = vmor %vm307_vm4, %vm308_vm3 }
 0x131   :  { %v303_v41 = vmul.f32 %v4396_v48, %v302_v21  ;;  %v5222_v21 = vld [vmem:[%s6667_s8 + $0x108] sm:$0xff] }
 0x132   :  { %2447 = vperm.xlu2 %4386, %v4060_v28   ;;  %4376 = vmatpush.bf16.msra.mxu2 %v5222_v21 }
 0x133   :  { %v304_v31 = vmul.f32 0.5, %v303_v41  ;;  %2307 = vperm.xlu1 %4385, %v4045_v42   ;;  %2302 = vperm.xlu0 %4384, %v4044_v62   ;;  %v297_v41 = vsub.f32 %v5015_v5, %v5136_v7  ;;  %v4284_v62 = vld [vmem:[%s6667_s8 + $0x10] sm:$0xff]  ;;  %v284_v5 = vsub.f32 %v4771_v30, %v5136_v7  ;;  %v286_v30 = vsub.f32 %v4805_v44, %v5136_v7 }
 0x134   :  { %v5224_v46 = vpop.permute.xlu2 %1367  ;;  %2095 = vmatpush.bf16.msrb.mxu0 %v4284_v62 }
 0x135   :  { %v305_v13 = vsub.f32 1.5, %v304_v31  ;;  %6747 = vst [vmem:[#allocation63_spill] sm:$0xff] %v5224_v46  ;;  %v5226_v22 = vpop.permute.xlu1 %1212  ;;  %v5233_v42 = vpop.permute.xlu0 %1207  ;;  %v294_v31 = vsub.f32 %v4941_v59, %v5136_v7  ;;  %v4077_v46 = vld [vmem:[%s6670_s11 + $0x438] sm:$0xff] }
 0x136   :  { %4377 = vmatpush.bf16.msra.mxu2 %v5241_v34 }
 0x137   :  { %v306_v28 = vmul.f32 %v4396_v48, %v305_v13  ;;  %v5246_v13 = vld [vmem:[%s6661_s2] ss:$0 sm:$0xff] }
 0x139   :  { %v5259_v29 = vsel %vm309_vm5, %v4396_v48, %v306_v28  ;;  %v5274_v48 = vld [vmem:[%s6662_s3] ss:$0 sm:$0xff] }
 0x13a   :  { %v326_v59 = vmul.f32 %v5259_v29, %v299_v27  ;;  %v324_v39 = vmul.f32 %v5259_v29, %v297_v41  ;;  %v311_v28 = vmul.f32 %v5259_v29, %v284_v5  ;;  %v312_v44 = vmul.f32 %v5259_v29, %v285_v6  ;;  %2597 = vperm.xlu2 %4386, %v4077_v46   ;;  %v4307_v41 = vld [vmem:[%s6667_s8 + $0xc8] sm:$0xff] }
 0x13b   :  { %v325_v62 = vmul.f32 %v5259_v29, %v298_v33  ;;  %v321_v27 = vmul.f32 %v5259_v29, %v294_v31  ;;  %v322_v15 = vmul.f32 %v5259_v29, %v295_v14  ;;  %v313_v56 = vmul.f32 %v5259_v29, %v286_v30  ;;  %2592 = vperm.xlu1 %4385, %v4076_v25   ;;  %v4283_v14 = vld [vmem:[%s6667_s8 + $0x8] sm:$0xff] }
 0x13c   :  { %v345_v5 = vmul.f32 %v5246_v13, %v326_v59  ;;  %v343_v6 = vmul.f32 %v5246_v13, %v324_v39  ;;  %v330_v24 = vmul.f32 %v5246_v13, %v311_v28  ;;  %v331_v12 = vmul.f32 %v5246_v13, %v312_v44  ;;  %2452 = vperm.xlu0 %4384, %v4061_v52   ;;  %v5301_v59 = vpop.permute.xlu2 %1382 }
 0x13d   :  { %v344_v33 = vmul.f32 %v5246_v13, %v325_v62  ;;  %v340_v46 = vmul.f32 %v5246_v13, %v321_v27  ;;  %v341_v31 = vmul.f32 %v5246_v13, %v322_v15  ;;  %v314_v30 = vmul.f32 %v5259_v29, %v287_v37  ;;  %6748 = vst [vmem:[#allocation64_spill] sm:$0xff] %v5301_v59  ;;  %v5315_v62 = vpop.permute.xlu1 %1277 }
 0x13e   :  { %v5304_v39 = vadd.f32 %v5274_v48, %v345_v5  ;;  %v5307_v25 = vadd.f32 %v5274_v48, %v343_v6  ;;  %v5310_v28 = vadd.f32 %v5274_v48, %v330_v24  ;;  %v5313_v44 = vadd.f32 %v5274_v48, %v331_v12  ;;  %1805 = vmatpush.bf16.msra.mxu1 %v4307_v41  ;;  %v5326_v5 = vpop.permute.xlu0 %1137 }
 0x13f   :  { %v5318_v15 = vadd.f32 %v5274_v48, %v344_v33  ;;  %v5321_v37 = vadd.f32 %v5274_v48, %v340_v46  ;;  %v332_v52 = vmul.f32 %v5246_v13, %v313_v56  ;;  %v296_v27 = vsub.f32 %v4986_v40, %v5136_v7  ;;  %6749 = vst [vmem:[#allocation65_spill] sm:$0xff] %v5326_v5  ;;  %v4062_v40 = vld [vmem:[%s6670_s11 + $0x3c0] sm:$0xff] }
 0x140   :  { %4368 = vmatpush.bf16.msra.mxu3 %v4307_v41  ;;  %v6674_v24 = vmax.f32 %v5304_v39, 0.0  ;;  %v6675_v12 = vmax.f32 %v5307_v25, 0.0  ;;  %v360_v33 = vadd.f32 %v5274_v48, %v341_v31  ;;  %2096 = vmatpush.bf16.msrb.mxu0 %v4283_v14  ;;  %v333_v59 = vmul.f32 %v5246_v13, %v314_v30  ;;  %v4047_v31 = vld [vmem:[%s6670_s11 + $0x348] sm:$0xff]  ;;  %v4282_v41 = vld [vmem:[%s6667_s8] sm:$0xff] }
 0x141   :  { %v288_v56 = vsub.f32 %v4839_v61, %v5136_v7  ;;  %v5343_v6 = vadd.f32 %v5274_v48, %v332_v52  ;;  %v323_v14 = vmul.f32 %v5259_v29, %v296_v27  ;;  %v4306_v61 = vld [vmem:[%s6667_s8 + $0xc0] sm:$0xff]  ;;  %v6750_v46 = vmax.f32 %v5310_v28, 0.0 }
 0x142   :  { %398 = vst [vmem:[#allocation2 + $0x88] sm:$0xff] %v6674_v24  ;;  %v5356_v24 = vadd.f32 %v5274_v48, %v333_v59  ;;  %v4046_v27 = vld [vmem:[%s6670_s11 + $0x340] sm:$0xff]  ;;  %v376_v5 = vmax.f32 %v360_v33, 0.0  ;;  %2457 = vperm.xlu2 %4386, %v4062_v40   ;;  %v6751_v59 = vmax.f32 %v5313_v44, 0.0  ;;  %v6753_v51 = vmax.f32 %v5318_v15, 0.0  ;;  %1806 = vmatpush.bf16.msra.mxu1 %v4306_v61 }
 0x143   :  { %396 = vst [vmem:[#allocation2 + $0x78] sm:$0xff] %v6675_v12  ;;  %v315_v52 = vmul.f32 %v5259_v29, %v288_v56  ;;  %v342_v12 = vmul.f32 %v5246_v13, %v323_v14  ;;  %v6676_v56 = vmax.f32 %v5343_v6, 0.0  ;;  %2317 = vperm.xlu1 %4385, %v4047_v31   ;;  %v291_v40 = vsub.f32 %v4890_v38, %v5136_v7 }
 0x144   :  { %383 = vst [vmem:[#allocation2 + $0x10] sm:$0xff] %v6750_v46  ;;  %v5374_v55 = vpop.permute.xlu2 %1397  ;;  %v6677_v33 = vmax.f32 %v5356_v24, 0.0  ;;  %2312 = vperm.xlu0 %4384, %v4046_v27   ;;  %v6754_v23 = vmax.f32 %v5321_v37, 0.0  ;;  %4369 = vmatpush.bf16.msra.mxu3 %v4306_v61 }
 0x145   :  { %384 = vst [vmem:[#allocation2 + $0x18] sm:$0xff] %v6751_v59  ;;  %v334_v30 = vmul.f32 %v5246_v13, %v315_v52  ;;  %v5380_v46 = vadd.f32 %v5274_v48, %v342_v12  ;;  %v5384_v14 = vpop.permute.xlu1 %1222  ;;  %v293_v52 = vsub.f32 %v4924_v19, %v5136_v7  ;;  %2097 = vmatpush.bf16.msrb.mxu0 %v4282_v41  ;;  %v4079_v41 = vld [vmem:[%s6670_s11 + $0x448] sm:$0xff] }
 0x146   :  { %6752 = vst [vmem:[#allocation66_spill] sm:$0xff] %v5374_v55  ;;  %v5394_v12 = vpop.permute.xlu0 %1217  ;;  %v318_v27 = vmul.f32 %v5259_v29, %v291_v40  ;;  %1848 = vmatpush.bf16.msrb.mxu1 %v5085_v43  ;;  %v4078_v43 = vld [vmem:[%s6670_s11 + $0x440] sm:$0xff]  ;;  %v289_v55 = vsub.f32 %v4856_v10, %v5136_v7 }
 0x147   :  { %397 = vst [vmem:[#allocation2 + $0x80] sm:$0xff] %v6753_v51  ;;  %v5389_v31 = vadd.f32 %v5274_v48, %v334_v30  ;;  %v317_v51 = vmul.f32 %v5259_v29, %v290_v47  ;;  %v6678_v38 = vmax.f32 %v5380_v46, 0.0  ;;  %v320_v19 = vmul.f32 %v5259_v29, %v293_v52 }
 0x148   :  { %393 = vst [vmem:[#allocation2 + $0x60] sm:$0xff] %v6754_v23  ;;  %v4063_v23 = vld [vmem:[%s6670_s11 + $0x3c8] sm:$0xff] }
 0x149   :  { %394 = vst [vmem:[#allocation2 + $0x68] sm:$0xff] %v376_v5  ;;  %v369_v30 = vmax.f32 %v5389_v31, 0.0  ;;  %v336_v47 = vmul.f32 %v5246_v13, %v317_v51  ;;  %v337_v5 = vmul.f32 %v5246_v13, %v318_v27  ;;  %v339_v40 = vmul.f32 %v5246_v13, %v320_v19 }
 0x14a   :  { %385 = vst [vmem:[#allocation2 + $0x20] sm:$0xff] %v6676_v56  ;;  %2607 = vperm.xlu2 %4386, %v4079_v41   ;;  %1849 = vmatpush.bf16.msrb.mxu1 %v5095_v20  ;;  %v4329_v41 = vld [vmem:[%s6667_s8 + $0x178] sm:$0xff] }
 0x14b   :  { %386 = vst [vmem:[#allocation2 + $0x28] sm:$0xff] %v6677_v33  ;;  %v1027_v61 = vld [vmem:[#allocation2 + $0xf] sm:$0xff]  ;;  %v5416_v59 = vadd.f32 %v5274_v48, %v336_v47  ;;  %v5426_v52 = vadd.f32 %v5274_v48, %v337_v5  ;;  %2602 = vperm.xlu1 %4385, %v4078_v43   ;;  %1897 = vmatpush.bf16.msrb.mxu3 %v4329_v41 }
 0x14c   :  { %395 = vst [vmem:[#allocation2 + $0x70] sm:$0xff] %v6678_v38  ;;  %v5422_v31 = vld [vmem:[#allocation2 + $0x17] sm:$0xff]  ;;  %v1140_v51 = vmul.f32 %v5097_v0, %v1027_v61  ;;  %v5431_v19 = vpop.permute.xlu2 %1412  ;;  %2462 = vperm.xlu0 %4384, %v4063_v23  }
 0x14d   :  { %387 = vst [vmem:[#allocation2 + $0x30] sm:$0xff] %v369_v30  ;;  %v1141_v27 = vmul.f32 %v5090_v49, %v5422_v31  ;;  %v6680_v47 = vmax.f32 %v5416_v59, 0.0  ;;  %v6679_v56 = vmax.f32 %v5426_v52, 0.0  ;;  %v5434_v33 = vpop.permute.xlu1 %1362  ;;  %v5440_v49 = vadd.f32 %v5274_v48, %v339_v40  ;;  %v4064_v43 = vld [vmem:[%s6670_s11 + $0x3d0] sm:$0xff]  ;;  %v4049_v40 = vld [vmem:[%s6670_s11 + $0x358] sm:$0xff] }
 0x14e   :  { %6755 = vst [vmem:[#allocation67_spill] sm:$0xff] %v5434_v33  ;;  %v1156_v38 = vpack.c.bf16 %v1140_v51, %v1140_v51  ;;  %v5442_v5 = vpop.permute.xlu0 %1357  ;;  %v4305_v23 = vld [vmem:[%s6667_s8 + $0xb8] sm:$0xff]  ;;  %1850 = vmatpush.bf16.msrb.mxu1 %v5118_v32  ;;  %v401_v51 = vld [vmem:[#allocation2 + $0x7] sm:$0xff]  ;;  %v4048_v41 = vld [vmem:[%s6670_s11 + $0x350] sm:$0xff] }
 0x14f   :  { %v1157_v0 = vpack.c.bf16 %v1141_v27, %v1141_v27  ;;  %389 = vst [vmem:[#allocation2 + $0x40] sm:$0xff] %v6680_v47  ;;  %v6681_v20 = vmax.f32 %v5440_v49, 0.0  ;;  %2188 = vmatpush.bf16.msrb.mxu2 %v4305_v23  ;;  %v4328_v47 = vld [vmem:[%s6667_s8 + $0x170] sm:$0xff]  ;;  %v316_v23 = vmul.f32 %v5259_v29, %v289_v55  ;;  %v4081_v55 = vld [vmem:[%s6670_s11 + $0x458] sm:$0xff] }
 0x150   :  { %6756 = vst [vmem:[#allocation68_spill] sm:$0xff] %v5442_v5  ;;  %1898 = vmatpush.bf16.msrb.mxu3 %v4328_v47 }
 0x151   :  { %390 = vst [vmem:[#allocation2 + $0x48] sm:$0xff] %v6679_v56  ;;  %v1479_v27 = vunpack.c.l.b16 %v1157_v0  ;;  %v1478_v56 = vunpack.c.l.b16 %v1156_v38  ;;  %v513_v38 = vmul.f32 %v4698_v2, %v401_v51  ;;  %v5481_v10 = vld [vmem:[#allocation2 + $0x1f] sm:$0xff]  ;;  %v1289_v2 = vmul.f32 %v4915_v63, %v369_v30 }
 0x152   :  { %392 = vst [vmem:[#allocation2 + $0x58] sm:$0xff] %v6681_v20  ;;  %2467 = vperm.xlu2 %4386, %v4064_v43   ;;  %1851 = vmatpush.bf16.msrb.mxu1 %v5159_v17  ;;  %v5479_v5 = vld [vmem:[#allocation2 + $0x27] sm:$0xff]  ;;  %v335_v43 = vmul.f32 %v5246_v13, %v316_v23  ;;  %v4080_v17 = vld [vmem:[%s6670_s11 + $0x450] sm:$0xff]  ;;  %v1142_v63 = vmul.f32 %v5165_v11, %v5481_v10 }
 0x153   :  { %2327 = vperm.xlu1 %4385, %v4049_v40   ;;  %v1494_v33 = vpack.c.b16 %v1479_v27, %v1478_v56  ;;  %v292_v40 = vsub.f32 %v4907_v54, %v5136_v7  ;;  %v529_v47 = vpack.c.bf16 %v513_v38, %v513_v38  ;;  %v514_v56 = vmul.f32 %v1027_v61, %v4717_v9  ;;  %v4065_v9 = vld [vmem:[%s6670_s11 + $0x3d8] sm:$0xff] }
 0x154   :  { %v5470_v32 = vpop.permute.xlu2 %1427  ;;  %2322 = vperm.xlu0 %4384, %v4048_v41   ;;  %v354_v30 = vadd.f32 %v5274_v48, %v335_v43  ;;  %v1305_v51 = vpack.c.bf16 %v1289_v2, %v1289_v2  ;;  %v5506_v41 = vld [vmem:[#allocation2 + $0x2f] sm:$0xff] }
 0x155   :  { %v5473_v0 = vpop.permute.xlu1 %1377  ;;  %1807 = vmatmul.bf16.vlgmr.msra.gmra.mxu1 %v1494_v33  ;;  %v1143_v33 = vmul.f32 %v5163_v58, %v5479_v5  ;;  %v319_v54 = vmul.f32 %v5259_v29, %v292_v40  ;;  %v530_v7 = vpack.c.bf16 %v514_v56, %v514_v56  ;;  %v851_v58 = vunpack.c.l.b16 %v529_v47  ;;  %v4304_v2 = vld [vmem:[%s6667_s8 + $0xb0] sm:$0xff] }
 0x156   :  { %v5476_v20 = vpop.permute.xlu0 %1372  ;;  %1852 = vmatpush.bf16.msrb.mxu1 %v5174_v26  ;;  %v370_v61 = vmax.f32 %v354_v30, 0.0  ;;  %v1158_v29 = vpack.c.bf16 %v1142_v63, %v1142_v63  ;;  %2189 = vmatpush.bf16.msrb.mxu2 %v4304_v2  ;;  %v4303_v63 = vld [vmem:[%s6667_s8 + $0xa8] sm:$0xff] }
 0x157   :  { %v852_v11 = vunpack.c.l.b16 %v530_v7  ;;  %v338_v23 = vmul.f32 %v5246_v13, %v319_v54  ;;  %v1159_v43 = vpack.c.bf16 %v1143_v33, %v1143_v33  ;;  %v4327_v13 = vld [vmem:[%s6667_s8 + $0x168] sm:$0xff]  ;;  %v4050_v54 = vld [vmem:[%s6670_s11 + $0x360] sm:$0xff]  ;;  %v515_v7 = vmul.f32 %v5422_v31, %v4696_v1 }
 0x158   :  { %388 = vst [vmem:[#allocation2 + $0x38] sm:$0xff] %v370_v61  ;;  %v1290_v26 = vmul.f32 %v5007_v57, %v370_v61  ;;  %1899 = vmatpush.bf16.msrb.mxu3 %v4327_v13  ;;  %v1480_v30 = vunpack.c.l.b16 %v1158_v29  ;;  %v516_v61 = vmul.f32 %v5481_v10, %v4715_v8 }
 0x159   :  { %v867_v47 = vpack.c.b16 %v852_v11, %v851_v58  ;;  %v5519_v56 = vadd.f32 %v5274_v48, %v338_v23  ;;  %v4051_v48 = vld [vmem:[%s6670_s11 + $0x368] sm:$0xff]  ;;  %v531_v8 = vpack.c.bf16 %v515_v7, %v515_v7 }
 0x15a   :  { %2617 = vperm.xlu2 %4386, %v4081_v55   ;;  %1853 = vmatpush.bf16.msrb.mxu1 %v5192_v45  ;;  %v1144_v55 = vmul.f32 %v4978_v16, %v5506_v41  ;;  %v1306_v57 = vpack.c.bf16 %v1290_v26, %v1290_v26  ;;  %v4066_v45 = vld [vmem:[%s6670_s11 + $0x3e0] sm:$0xff]  ;;  %v1481_v16 = vunpack.c.l.b16 %v1159_v43  ;;  %v532_v29 = vpack.c.bf16 %v516_v61, %v516_v61 }
 0x15b   :  { %2612 = vperm.xlu1 %4385, %v4080_v17   ;;  %v1530_v17 = vunpack.c.l.b16 %v1305_v51  ;;  %2098 = vmatmul.bf16.vlgmr.msrb.gmra.mxu0 %v867_v47  ;;  %v373_v33 = vmax.f32 %v5519_v56, 0.0  ;;  %v6757_v47 = vmax.f32 %v5416_v59, 0.0  ;;  %v6760_v59 = vmax.f32 %v5310_v28, 0.0  ;;  %v4085_v56 = vld [vmem:[%s6670_s11 + $0x478] sm:$0xff] }
 0x15c   :  { %v5504_v27 = vpop.permute.xlu2 %2417  ;;  %2472 = vperm.xlu0 %4384, %v4065_v9   ;;  %v1531_v9 = vunpack.c.l.b16 %v1306_v57  ;;  %v1160_v51 = vpack.c.bf16 %v1144_v55, %v1144_v55  ;;  %2190 = vmatpush.bf16.msrb.mxu2 %v4303_v63  ;;  %v1495_v1 = vpack.c.b16 %v1481_v16, %v1480_v30  ;;  %v6758_v55 = vmax.f32 %v5426_v52, 0.0  ;;  %v5579_v30 = vld [vmem:[#allocation2 + $0x47] sm:$0xff] }
 0x15d   :  { %v5508_v38 = vpop.permute.xlu1 %1392  ;;  %391 = vst [vmem:[#allocation2 + $0x50] sm:$0xff] %v373_v33  ;;  %v1291_v13 = vmul.f32 %v5036_v4, %v6757_v47  ;;  %v1285_v4 = vmul.f32 %v5233_v42, %v6760_v59  ;;  %v854_v63 = vunpack.c.l.b16 %v532_v29  ;;  %v6761_v28 = vmax.f32 %v5307_v25, 0.0  ;;  %v4296_v59 = vld [vmem:[%s6667_s8 + $0x70] sm:$0xff] }
 0x15e   :  { %v5512_v40 = vpop.permute.xlu0 %1387  ;;  %1854 = vmatpush.bf16.msrb.mxu1 %v5222_v21  ;;  %v1544_v58 = vpack.c.b16 %v1531_v9, %v1530_v17  ;;  %v1482_v2 = vunpack.c.l.b16 %v1160_v51  ;;  %v1292_v57 = vmul.f32 %v5034_v35, %v6758_v55  ;;  %v6762_v51 = vmax.f32 %v5380_v46, 0.0 }
 0x15f   :  { %v5548_v23 = vld [vmem:[#allocation2 + $0x37] sm:$0xff]  ;;  %v1307_v9 = vpack.c.bf16 %v1291_v13, %v1291_v13  ;;  %v1298_v42 = vmul.f32 %v5088_v53, %v6761_v28  ;;  %v1147_v25 = vmul.f32 %v4932_v36, %v5579_v30 }
 0x160   :  { %v1145_v21 = vmul.f32 %v4976_v18, %v5548_v23  ;;  %1866 = vmatmul.bf16.vlgmr.msra.gmra.mxu2 %v1544_v58  ;;  %v6759_v18 = vmax.f32 %v5313_v44, 0.0  ;;  %v853_v44 = vunpack.c.l.b16 %v531_v8  ;;  %v1297_v58 = vmul.f32 %v5196_v60, %v6762_v51  ;;  %v4297_v53 = vld [vmem:[%s6667_s8 + $0x78] sm:$0xff]  ;;  %v4326_v60 = vld [vmem:[%s6667_s8 + $0x160] sm:$0xff] }
 0x161   :  { %v1532_v13 = vunpack.c.l.b16 %v1307_v9  ;;  %1900 = vmatpush.bf16.msrb.mxu3 %v4326_v60 }
 0x162   :  { %2477 = vperm.xlu2 %4386, %v4066_v45   ;;  %1855 = vmatpush.bf16.msrb.mxu1 %v5241_v34  ;;  %v1161_v26 = vpack.c.bf16 %v1145_v21, %v1145_v21  ;;  %v1286_v17 = vmul.f32 %v5226_v22, %v6759_v18  ;;  %v1329_v45 = vld [vmem:[#allocation2 + $0x71] sm:$0xff]  ;;  %v4083_v34 = vld [vmem:[%s6670_s11 + $0x468] sm:$0xff]  ;;  %v1301_v21 = vpack.c.bf16 %v1285_v4, %v1285_v4 }
 0x163   :  { %2337 = vperm.xlu1 %4385, %v4051_v48   ;;  %v4082_v48 = vld [vmem:[%s6670_s11 + $0x460] sm:$0xff]  ;;  %v1442_v52 = vmul.f32 %v5431_v19, %v1329_v45  ;;  %v4067_v22 = vld [vmem:[%s6670_s11 + $0x3e8] sm:$0xff]  ;;  %v1314_v18 = vpack.c.bf16 %v1298_v42, %v1298_v42  ;;  %v1313_v4 = vpack.c.bf16 %v1297_v58, %v1297_v58 }
 0x164   :  { %v5546_v11 = vpop.permute.xlu2 %2567  ;;  %2332 = vperm.xlu0 %4384, %v4050_v54   ;;  %v1483_v35 = vunpack.c.l.b16 %v1161_v26  ;;  %v1308_v54 = vpack.c.bf16 %v1292_v57, %v1292_v57  ;;  %v1302_v7 = vpack.c.bf16 %v1286_v17, %v1286_v17  ;;  %v5584_v19 = vld [vmem:[#allocation2 + $0x3f] sm:$0xff]  ;;  %v6763_v17 = vmax.f32 %v5304_v39, 0.0 }
 0x165   :  { %v5550_v43 = vpop.permute.xlu1 %1407  ;;  %1812 = vmatmul.bf16.gmra.mxu1 %v1495_v1  ;;  %v1458_v1 = vpack.c.bf16 %v1442_v52, %v1442_v52  ;;  %v1330_v26 = vld [vmem:[#allocation2 + $0x79] sm:$0xff]  ;;  %v1146_v46 = vmul.f32 %v5005_v50, %v5584_v19  ;;  %v1526_v39 = vunpack.c.l.b16 %v1301_v21  ;;  %v5639_v21 = vunpack.c.l.b16 %v1313_v4 }
 0x166   :  { %v5554_v31 = vpop.permute.xlu0 %1402  ;;  %v1496_v16 = vpack.c.b16 %v1483_v35, %v1482_v2  ;;  %v868_v2 = vpack.c.b16 %v854_v63, %v853_v44  ;;  %v1533_v55 = vunpack.c.l.b16 %v1308_v54  ;;  %2139 = vmatpush.bf16.msra.mxu1 %v4297_v53  ;;  %v4302_v57 = vld [vmem:[%s6667_s8 + $0xa0] sm:$0xff]  ;;  %v1300_v36 = vmul.f32 %v5161_v3, %v6763_v17  ;;  %v4053_v50 = vld [vmem:[%s6670_s11 + $0x378] sm:$0xff]  ;;  %v6766_v54 = vld [vmem:[#allocation7_spill] sm:$0xff] }
 0x167   :  { %v1527_v45 = vunpack.c.l.b16 %v1302_v7  ;;  %v6764_v3 = vmax.f32 %v5318_v15, 0.0  ;;  %v5621_v35 = vunpack.c.l.b16 %v1458_v1  ;;  %2191 = vmatpush.bf16.msrb.mxu2 %v4302_v57  ;;  %v1163_v44 = vpack.c.bf16 %v1147_v25, %v1147_v25  ;;  %v2237_v25 = vld [vmem:[#allocation2 + $0x17] sm:$0xff]  ;;  %v6769_v17 = vld [vmem:[#allocation51_spill] sm:$0xff] }
 0x168   :  { %1817 = vmatmul.bf16.vlgmr.msra.gmra.mxu3 %v1496_v16  ;;  %v6765_v16 = vld [vmem:[#allocation6_spill] sm:$0xff]  ;;  %v518_v28 = vmul.f32 %v5506_v41, %v6766_v54  ;;  %v1162_v42 = vpack.c.bf16 %v1146_v46, %v1146_v46  ;;  %v1545_v15 = vpack.c.b16 %v1533_v55, %v1532_v13  ;;  %v1316_v7 = vpack.c.bf16 %v1300_v36, %v1300_v36  ;;  %v6767_v55 = vld [vmem:[#allocation55_spill] sm:$0xff] }
 0x169   :  { %v1299_v52 = vmul.f32 %v5315_v62, %v6764_v3  ;;  %v517_v9 = vmul.f32 %v5479_v5, %v6765_v16  ;;  %v5632_v62 = vunpack.c.l.b16 %v1314_v18  ;;  %v4295_v5 = vld [vmem:[%s6667_s8 + $0x68] sm:$0xff]  ;;  %v1542_v1 = vpack.c.b16 %v1527_v45, %v1526_v39  ;;  %v4069_v3 = vld [vmem:[%s6670_s11 + $0x3f8] sm:$0xff] }
 0x16a   :  { %2627 = vperm.xlu2 %4386, %v4083_v34   ;;  %2140 = vmatpush.bf16.msra.mxu1 %v4296_v59  ;;  %v534_v60 = vpack.c.bf16 %v518_v28, %v518_v28  ;;  %v1484_v13 = vunpack.c.l.b16 %v1162_v42  ;;  %v1293_v57 = vmul.f32 %v6767_v55, %v373_v33  ;;  %v6768_v18 = vmax.f32 %v5440_v49, 0.0  ;;  %v4084_v49 = vld [vmem:[%s6670_s11 + $0x470] sm:$0xff]  ;;  %v4294_v33 = vld [vmem:[%s6667_s8 + $0x60] sm:$0xff] }
 0x16b   :  { %2622 = vperm.xlu1 %4385, %v4082_v48   ;;  %2103 = vmatmul.bf16.gmra.mxu0 %v868_v2  ;;  %v4068_v48 = vld [vmem:[%s6670_s11 + $0x3f0] sm:$0xff]  ;;  %v1485_v2 = vunpack.c.l.b16 %v1163_v44  ;;  %v6810_v42 = vld [vmem:[#allocation10_spill] sm:$0xff] }
 0x16c   :  { %2482 = vperm.xlu0 %4384, %v4067_v22   ;;  %v5591_v8 = vpop.permute.xlu2 %2427  ;;  %v4052_v22 = vld [vmem:[%s6670_s11 + $0x370] sm:$0xff]  ;;  %v1294_v36 = vmul.f32 %v6769_v17, %v6768_v18  ;;  %v856_v44 = vunpack.c.l.b16 %v534_v60  ;;  %v1309_v54 = vpack.c.bf16 %v1293_v57, %v1293_v57  ;;  %s3650_s11 = sshll.u32 %s6671_s12, 4  ;;  %s3651_s11 = int_to_ptr.hbm [resolvable:$true] %s3650_s11 }
 0x16d   :  { %v5586_v61 = vpop.permute.xlu1 %1422  ;;  %v6773_v60 = vld [vmem:[#allocation56_spill] sm:$0xff] }
 0x16e   :  { %v1418_v29 = vpop.permute.xlu0 %1417  ;;  %2141 = vmatpush.bf16.msra.mxu1 %v4295_v5  ;;  %v1310_v28 = vpack.c.bf16 %v1294_v36, %v1294_v36  ;;  %v4324_v57 = vld [vmem:[%s6667_s8 + $0x150] sm:$0xff] }
 0x16f   :  { %v1443_v47 = vmul.f32 %v1418_v29, %v1330_v26  ;;  %v1315_v29 = vpack.c.bf16 %v1299_v52, %v1299_v52  ;;  %v1548_v52 = vpack.c.b16 %v5632_v62, %v5639_v21  ;;  %v4292_v18 = vld [vmem:[%s6667_s8 + $0x50] sm:$0xff]  ;;  %v6796_v21 = vld [vmem:[#allocation14_spill] sm:$0xff] }
 0x170   :  { %1871 = vmatmul.bf16.gmra.mxu2 %v1545_v15  ;;  %v1535_v55 = vunpack.c.l.b16 %v1310_v28  ;;  %v2239_v28 = vld [vmem:[#allocation2 + $0x27] sm:$0xff] }
 0x171   :  { %v1459_v34 = vpack.c.bf16 %v1443_v47, %v1443_v47  ;;  %v533_v47 = vpack.c.bf16 %v517_v9, %v517_v9  ;;  %v5664_v4 = vunpack.c.l.b16 %v1315_v29  ;;  %v1497_v9 = vpack.c.b16 %v1485_v2, %v1484_v13  ;;  %v4293_v29 = vld [vmem:[%s6667_s8 + $0x58] sm:$0xff]  ;;  %v6772_v2 = vld [vmem:[#allocation48_spill] sm:$0xff] }
 0x172   :  { %2487 = vperm.xlu2 %4386, %v4068_v48   ;;  %v6770_v48 = vmax.f32 %v5356_v24, 0.0  ;;  %v6771_v24 = vmax.f32 %v5343_v6, 0.0  ;;  %v5678_v6 = vld [vmem:[#allocation2 + $0x4f] sm:$0xff]  ;;  %2142 = vmatpush.bf16.msra.mxu1 %v4294_v33  ;;  %v1534_v13 = vunpack.c.l.b16 %v1309_v54 }
 0x173   :  { %v5626_v63 = vunpack.c.l.b16 %v1459_v34  ;;  %2347 = vperm.xlu1 %4385, %v4053_v50  }
 0x174   :  { %2342 = vperm.xlu0 %4384, %v4052_v22   ;;  %v5648_v45 = vpop.permute.xlu2 %2577  ;;  %v1288_v50 = vmul.f32 %v5384_v14, %v6770_v48  ;;  %v1287_v14 = vmul.f32 %v5394_v12, %v6771_v24  ;;  %v855_v22 = vunpack.c.l.b16 %v533_v47  ;;  %v5680_v12 = vld [vmem:[#allocation2 + $0x57] sm:$0xff]  ;;  %v1148_v47 = vmul.f32 %v6772_v2, %v5678_v6 }
 0x175   :  { %v2278_v58 = vpop.permute.xlu1 %2277  ;;  %1856 = vmatmul.bf16.vlgmr.msrb.gmra.mxu1 %v1542_v1  ;;  %v4325_v1 = vld [vmem:[%s6667_s8 + $0x158] sm:$0xff]  ;;  %v1546_v24 = vpack.c.b16 %v1535_v55, %v1534_v13  ;;  %v4290_v13 = vld [vmem:[%s6667_s8 + $0x40] sm:$0xff]  ;;  %v6778_v55 = vld [vmem:[#allocation59_spill] sm:$0xff] }
 0x176   :  { %v2351_v26 = vmul.f32 %v2278_v58, %v5481_v10  ;;  %v2273_v53 = vpop.permute.xlu0 %2272  ;;  %v5650_v10 = vunpack.c.l.b16 %v1316_v7  ;;  %v1304_v7 = vpack.c.bf16 %v1288_v50, %v1288_v50  ;;  %v1303_v58 = vpack.c.bf16 %v1287_v14, %v1287_v14  ;;  %1901 = vmatpush.bf16.msrb.mxu3 %v4325_v1  ;;  %2143 = vmatpush.bf16.msra.mxu1 %v4293_v29  ;;  %v6774_v48 = vld [vmem:[#allocation13_spill] sm:$0xff]  ;;  %v1183_v14 = vld [vmem:[#allocation2 + $0x68] sm:$0xff]  ;;  %v546_v29 = vld [vmem:[#allocation2 + $0x10] sm:$0xff] }
 0x177   :  { %v2350_v46 = vmul.f32 %v2273_v53, %v2237_v25  ;;  %v869_v53 = vpack.c.b16 %v856_v44, %v855_v22  ;;  %v4301_v25 = vld [vmem:[%s6667_s8 + $0x98] sm:$0xff]  ;;  %v519_v50 = vmul.f32 %v5548_v23, %v6774_v48  ;;  %v4291_v22 = vld [vmem:[%s6667_s8 + $0x48] sm:$0xff] }
 0x178   :  { %v2367_v34 = vpack.c.bf16 %v2351_v26, %v2351_v26  ;;  %1822 = vmatmul.bf16.gmra.mxu3 %v1497_v9  ;;  %v1549_v26 = vpack.c.b16 %v5650_v10, %v5664_v4  ;;  %v1529_v17 = vunpack.c.l.b16 %v1304_v7  ;;  %v1528_v36 = vunpack.c.l.b16 %v1303_v58  ;;  %2192 = vmatpush.bf16.msrb.mxu2 %v4301_v25  ;;  %v6776_v2 = vld [vmem:[#allocation53_spill] sm:$0xff]  ;;  %v4342_v10 = vld [vmem:[%s6667_s8 + $0x1e0] sm:$0xff]  ;;  %v6806_v4 = vld [vmem:[#allocation27_spill] sm:$0xff] }
 0x179   :  { %v2366_v59 = vpack.c.bf16 %v2350_v46, %v2350_v46  ;;  %v1149_v46 = vmul.f32 %v6773_v60, %v5680_v12  ;;  %v535_v7 = vpack.c.bf16 %v519_v50, %v519_v50 }
 0x17a   :  { %v5669_v39 = vunpack.c.l.b16 %v2367_v34  ;;  %2637 = vperm.xlu2 %4386, %v4085_v56   ;;  %1902 = vmatpush.bf16.msrb.mxu3 %v4324_v57  ;;  %v1543_v44 = vpack.c.b16 %v1529_v17, %v1528_v36  ;;  %v6780_v17 = vld [vmem:[#allocation11_spill] sm:$0xff] }
 0x17b   :  { %v5676_v16 = vunpack.c.l.b16 %v2366_v59  ;;  %2632 = vperm.xlu1 %4385, %v4084_v49   ;;  %2108 = vmatmul.bf16.gmra.mxu0 %v869_v53  ;;  %v6775_v59 = vld [vmem:[#allocation12_spill] sm:$0xff]  ;;  %v1164_v49 = vpack.c.bf16 %v1148_v47, %v1148_v47  ;;  %v1165_v33 = vpack.c.bf16 %v1149_v46, %v1149_v46  ;;  %v1296_v47 = vmul.f32 %v6776_v2, %v1183_v14 }
 0x17c   :  { %2492 = vperm.xlu0 %4384, %v4069_v3   ;;  %v5709_v34 = vpop.permute.xlu2 %2437  ;;  %v520_v56 = vmul.f32 %v5584_v19, %v6775_v59  ;;  %2144 = vmatpush.bf16.msra.mxu1 %v4292_v18  ;;  %v659_v36 = vmul.f32 %v6780_v17, %v546_v29  ;;  %v857_v48 = vunpack.c.l.b16 %v535_v7 }
 0x17d   :  { %v5684_v15 = vpop.permute.xlu1 %2562  ;;  %v1486_v53 = vunpack.c.l.b16 %v1164_v49  ;;  %v1487_v25 = vunpack.c.l.b16 %v1165_v33  ;;  %v6782_v49 = vld [vmem:[#allocation21_spill] sm:$0xff]  ;;  %v1312_v14 = vpack.c.bf16 %v1296_v47, %v1296_v47  ;;  %v6784_v47 = vld [vmem:[#allocation52_spill] sm:$0xff] }
 0x17e   :  { %v5686_v5 = vpop.permute.xlu0 %2422  ;;  %v536_v58 = vpack.c.bf16 %v520_v56, %v520_v56  ;;  %v4401_v56 = vld [vmem:[#allocation2] sm:$0xff]  ;;  %v675_v7 = vpack.c.bf16 %v659_v36, %v659_v36  ;;  %v6786_v36 = vld [vmem:[#allocation16_spill] sm:$0xff] }
 0x17f   :  { %v658_v33 = vmul.f32 %v4401_v56, %v6782_v49 }
 0x180   :  { %1876 = vmatmul.bf16.gmra.mxu2 %v1546_v24  ;;  %2145 = vmatpush.bf16.msra.mxu1 %v4291_v22  ;;  %v858_v50 = vunpack.c.l.b16 %v536_v58  ;;  %v1498_v24 = vpack.c.b16 %v1487_v25, %v1486_v53  ;;  %v1038_v22 = vld [vmem:[#allocation2 + $0x67] sm:$0xff]  ;;  %v4300_v58 = vld [vmem:[%s6667_s8 + $0x90] sm:$0xff] }
 0x181   :  { %v674_v53 = vpack.c.bf16 %v658_v33, %v658_v33  ;;  %v6783_v25 = vld [vmem:[#allocation60_spill] sm:$0xff]  ;;  %2193 = vmatpush.bf16.msrb.mxu2 %v4300_v58 }
 0x182   :  { %v870_v29 = vpack.c.b16 %v858_v50, %v857_v48  ;;  %v1151_v2 = vmul.f32 %v6783_v25, %v1038_v22  ;;  %v522_v48 = vmul.f32 %v5678_v6, %v6786_v36 }
 0x183   :  { %v899_v50 = vunpack.c.l.b16 %v674_v53 }
 0x184   :  { %2146 = vmatpush.bf16.msra.mxu1 %v4290_v13  ;;  %v4299_v13 = vld [vmem:[%s6667_s8 + $0x88] sm:$0xff]  ;;  %v1167_v56 = vpack.c.bf16 %v1151_v2, %v1151_v2 }
 0x185   :  { %v2288_v3 = vpop.permute.xlu1 %2287  ;;  %1861 = vmatmul.bf16.gmra.mxu1 %v1543_v44  ;;  %v5734_v44 = vld [vmem:[#allocation2 + $0x5f] sm:$0xff]  ;;  %2194 = vmatpush.bf16.msrb.mxu2 %v4299_v13 }
 0x186   :  { %v2353_v9 = vmul.f32 %v2288_v3, %v5506_v41  ;;  %v2283_v54 = vpop.permute.xlu0 %2282  ;;  %v6777_v41 = vmax.f32 %v5321_v37, 0.0  ;;  %v5732_v3 = vpop.permute.xlu2 %2587  ;;  %v1489_v53 = vunpack.c.l.b16 %v1167_v56  ;;  %v1040_v56 = vld [vmem:[#allocation2 + $0x77] sm:$0xff] }
 0x187   :  { %v2352_v1 = vmul.f32 %v2283_v54, %v2239_v28 }
 0x188   :  { %v2369_v60 = vpack.c.bf16 %v2353_v9, %v2353_v9  ;;  %v1295_v57 = vmul.f32 %v6778_v55, %v6777_v41  ;;  %1827 = vmatmul.bf16.gmra.mxu3 %v1498_v24  ;;  %v900_v55 = vunpack.c.l.b16 %v675_v7  ;;  %v5761_v7 = vld [vmem:[#allocation2 + $0x20] sm:$0xff] }
 0x189   :  { %v2368_v46 = vpack.c.bf16 %v2352_v1, %v2352_v1  ;;  %v4323_v1 = vld [vmem:[%s6667_s8 + $0x148] sm:$0xff] }
 0x18a   :  { %v5726_v18 = vunpack.c.l.b16 %v2369_v60  ;;  %v1311_v54 = vpack.c.bf16 %v1295_v57, %v1295_v57  ;;  %v1150_v60 = vmul.f32 %v6784_v47, %v5734_v44  ;;  %1903 = vmatpush.bf16.msrb.mxu3 %v4323_v1  ;;  %v6785_v57 = vld [vmem:[#allocation8_spill] sm:$0xff]  ;;  %v915_v22 = vpack.c.b16 %v900_v55, %v899_v50  ;;  %v547_v47 = vld [vmem:[#allocation2 + $0x18] sm:$0xff] }
 0x18b   :  { %v5729_v59 = vunpack.c.l.b16 %v2368_v46  ;;  %v1537_v46 = vunpack.c.l.b16 %v1312_v14  ;;  %2113 = vmatmul.bf16.gmra.mxu0 %v870_v29  ;;  %v521_v17 = vmul.f32 %v5579_v30, %v6785_v57  ;;  %v538_v29 = vpack.c.bf16 %v522_v48, %v522_v48  ;;  %v6789_v55 = vld [vmem:[#allocation24_spill] sm:$0xff] }
 0x18c   :  { %6779 = vst [vmem:[#allocation6_spill] sm:$0xff] %v5726_v18  ;;  %v1536_v41 = vunpack.c.l.b16 %v1311_v54  ;;  %v1166_v49 = vpack.c.bf16 %v1150_v60, %v1150_v60 }
 0x18d   :  { %6781 = vst [vmem:[#allocation7_spill] sm:$0xff] %v5729_v59  ;;  %v5738_v9 = vpop.permute.xlu1 %2572  ;;  %v537_v1 = vpack.c.bf16 %v521_v17, %v521_v17  ;;  %v3333_v17 = vld [vmem:[%s6664_s5] sm:$0xf]  ;;  %v860_v48 = vunpack.c.l.b16 %v538_v29 }
 0x18e   :  { %v5740_v28 = vpop.permute.xlu0 %2432  ;;  %v1547_v33 = vpack.c.b16 %v1537_v46, %v1536_v41  ;;  %v5758_v14 = vpop.permute.xlu2 %2447  ;;  %v1488_v2 = vunpack.c.l.b16 %v1166_v49  ;;  %v6788_v41 = vld [vmem:[#allocation25_spill] sm:$0xff]  ;;  %v5774_v49 = vld [vmem:[#allocation2 + $0x6f] sm:$0xff]  ;;  %v4298_v29 = vld [vmem:[%s6667_s8 + $0x80] sm:$0xff] }
 0x18f   :  { %v660_v57 = vmul.f32 %v6788_v41, %v547_v47  ;;  %v859_v36 = vunpack.c.l.b16 %v537_v1  ;;  %v4322_v1 = vld [vmem:[%s6667_s8 + $0x140] sm:$0xff]  ;;  %2195 = vmatpush.bf16.msrb.mxu2 %v4298_v29 }
 0x190   :  { %1881 = vmatmul.bf16.gmra.mxu2 %v1547_v33  ;;  %v1499_v50 = vpack.c.b16 %v1489_v53, %v1488_v2  ;;  %v6791_v53 = vld [vmem:[#allocation62_spill] sm:$0xff]  ;;  %1904 = vmatpush.bf16.msrb.mxu3 %v4322_v1 }
 0x191   :  { %v871_v47 = vpack.c.b16 %v860_v48, %v859_v36  ;;  %v1153_v2 = vmul.f32 %v6791_v53, %v1040_v56 }
 0x193   :  { %v1169_v36 = vpack.c.bf16 %v1153_v2, %v1153_v2 }
 0x195   :  { %v2298_v24 = vpop.permute.xlu1 %2297  ;;  %2147 = vmatmul.bf16.vlgmr.msra.gmra.mxu1 %v915_v22  ;;  %v3400_v22 = vsel %vm160_vm0, %v3333_v17, 0 }
 0x196   :  { %v2355_v58 = vmul.f32 %v2298_v24, %v5584_v19  ;;  %v2293_v54 = vpop.permute.xlu0 %2292  ;;  %v661_v19 = vmul.f32 %v5761_v7, %v6789_v55  ;;  %v5792_v41 = vpop.permute.xlu2 %2597  ;;  %3409 = vmatpush.bf16.msra.mxu2 %v3400_v22  ;;  %v5802_v22 = vld [vmem:[#allocation2 + $0x30] sm:$0xff] }
 0x197   :  { %v2354_v25 = vmul.f32 %v2293_v54, %v5548_v23  ;;  %v676_v54 = vpack.c.bf16 %v660_v57, %v660_v57 }
 0x198   :  { %v2371_v60 = vpack.c.bf16 %v2355_v58, %v2355_v58  ;;  %1832 = vmatmul.bf16.gmra.mxu3 %v1499_v50  ;;  %v6794_v50 = vld [vmem:[#allocation9_spill] sm:$0xff] }
 0x199   :  { %v2370_v46 = vpack.c.bf16 %v2354_v25, %v2354_v25  ;;  %v677_v25 = vpack.c.bf16 %v661_v19, %v661_v19  ;;  %v901_v57 = vunpack.c.l.b16 %v676_v54  ;;  %v6793_v19 = vld [vmem:[#allocation15_spill] sm:$0xff]  ;;  %v524_v33 = vmul.f32 %v5734_v44, %v6794_v50  ;;  %v1041_v50 = vld [vmem:[#allocation2 + $0x7f] sm:$0xff] }
 0x19a   :  { %v5764_v13 = vunpack.c.l.b16 %v2371_v60  ;;  %v6792_v60 = vld [vmem:[#allocation54_spill] sm:$0xff]  ;;  %v523_v17 = vmul.f32 %v5680_v12, %v6793_v19 }
 0x19b   :  { %v5772_v23 = vunpack.c.l.b16 %v2370_v46  ;;  %v1152_v46 = vmul.f32 %v6792_v60, %v5774_v49  ;;  %2118 = vmatmul.bf16.gmra.mxu0 %v871_v47  ;;  %v902_v55 = vunpack.c.l.b16 %v677_v25  ;;  %v540_v25 = vpack.c.bf16 %v524_v33, %v524_v33  ;;  %v549_v47 = vld [vmem:[#allocation2 + $0x28] sm:$0xff] }
 0x19c   :  { %6787 = vst [vmem:[#allocation55_spill] sm:$0xff] %v5764_v13  ;;  %v539_v54 = vpack.c.bf16 %v523_v17, %v523_v17  ;;  %v1491_v60 = vunpack.c.l.b16 %v1169_v36  ;;  %v1042_v36 = vld [vmem:[#allocation2 + $0x87] sm:$0xff] }
 0x19d   :  { %6790 = vst [vmem:[#allocation51_spill] sm:$0xff] %v5772_v23  ;;  %v5778_v24 = vpop.permute.xlu1 %2582  ;;  %v1168_v48 = vpack.c.bf16 %v1152_v46, %v1152_v46  ;;  %v916_v53 = vpack.c.b16 %v902_v55, %v901_v57  ;;  %v862_v17 = vunpack.c.l.b16 %v540_v25  ;;  %v4351_v23 = vld [vmem:[%s6667_s8 + $0x228] sm:$0xff]  ;;  %v6824_v13 = vld [vmem:[#allocation34_spill] sm:$0xff] }
 0x19e   :  { %v5781_v58 = vpop.permute.xlu0 %2442  ;;  %v5805_v19 = vpop.permute.xlu2 %2457  ;;  %v861_v55 = vunpack.c.l.b16 %v539_v54  ;;  %v4345_v54 = vld [vmem:[%s6667_s8 + $0x1f8] sm:$0xff] }
 0x19f   :  { %v1490_v44 = vunpack.c.l.b16 %v1168_v48  ;;  %3058 = vmatpush.bf16.msra.mxu0 %v4345_v54  ;;  %v691_v54 = vld [vmem:[#allocation2 + $0x11] sm:$0xff] }
 0x1a0   :  { %1886 = vmatmul.bf16.gmra.mxu2 %v1548_v52  ;;  %v662_v52 = vmul.f32 %v6796_v21, %v549_v47  ;;  %v872_v25 = vpack.c.b16 %v862_v17, %v861_v55  ;;  %v6799_v47 = vld [vmem:[#allocation58_spill] sm:$0xff]  ;;  %v4344_v21 = vld [vmem:[%s6667_s8 + $0x1f0] sm:$0xff] }
 0x1a1   :  { %v6802_v17 = vld [vmem:[#allocation18_spill] sm:$0xff] }
 0x1a3   :  { %3059 = vmatpush.bf16.msra.mxu0 %v4344_v21 }
 0x1a5   :  { %v2308_v56 = vpop.permute.xlu1 %2307  ;;  %2152 = vmatmul.bf16.gmra.mxu1 %v916_v53  ;;  %v678_v53 = vpack.c.bf16 %v662_v52, %v662_v52 }
 0x1a6   :  { %v2357_v1 = vmul.f32 %v2308_v56, %v5678_v6  ;;  %v2303_v29 = vpop.permute.xlu0 %2302  ;;  %v6797_v6 = vld [vmem:[#allocation28_spill] sm:$0xff] }
 0x1a7   :  { %v2356_v12 = vmul.f32 %v2303_v29, %v5579_v30  ;;  %v663_v57 = vmul.f32 %v5802_v22, %v6797_v6  ;;  %v1500_v30 = vpack.c.b16 %v1491_v60, %v1490_v44  ;;  %v4337_v29 = vld [vmem:[%s6667_s8 + $0x1b8] sm:$0xff]  ;;  %v1154_v60 = vmul.f32 %v6799_v47, %v1041_v50  ;;  %v5835_v47 = vpop.permute.xlu2 %2607 }
 0x1a8   :  { %v2373_v2 = vpack.c.bf16 %v2357_v1, %v2357_v1  ;;  %v6800_v44 = vld [vmem:[#allocation65_spill] sm:$0xff]  ;;  %3009 = vmatpush.bf16.msra.mxu3 %v4337_v29  ;;  %v903_v52 = vunpack.c.l.b16 %v678_v53  ;;  %v690_v29 = vld [vmem:[#allocation2 + $0x9] sm:$0xff] }
 0x1a9   :  { %v2372_v46 = vpack.c.bf16 %v2356_v12, %v2356_v12  ;;  %1837 = vmatmul.bf16.gmra.mxu3 %v1500_v30  ;;  %v679_v1 = vpack.c.bf16 %v663_v57, %v663_v57  ;;  %v4353_v12 = vld [vmem:[%s6667_s8 + $0x238] sm:$0xff]  ;;  %v6801_v57 = vld [vmem:[#allocation19_spill] sm:$0xff]  ;;  %v526_v30 = vmul.f32 %v5774_v49, %v6802_v17  ;;  %v1170_v48 = vpack.c.bf16 %v1154_v60, %v1154_v60 }
 0x1aa   :  { %v5807_v62 = vunpack.c.l.b16 %v2373_v2  ;;  %v1155_v2 = vmul.f32 %v6800_v44, %v1042_v36  ;;  %3107 = vmatpush.bf16.msrb.mxu1 %v4353_v12  ;;  %v4343_v36 = vld [vmem:[%s6667_s8 + $0x1e8] sm:$0xff]  ;;  %v551_v60 = vld [vmem:[#allocation2 + $0x38] sm:$0xff] }
 0x1ab   :  { %v5812_v33 = vunpack.c.l.b16 %v2372_v46  ;;  %v413_v46 = vld [vmem:[#allocation2 + $0x67] sm:$0xff]  ;;  %2123 = vmatmul.bf16.gmra.mxu0 %v872_v25  ;;  %v904_v6 = vunpack.c.l.b16 %v679_v1  ;;  %v542_v12 = vpack.c.bf16 %v526_v30, %v526_v30  ;;  %v1492_v44 = vunpack.c.l.b16 %v1170_v48 }
 0x1ac   :  { %6795 = vst [vmem:[#allocation48_spill] sm:$0xff] %v5807_v62  ;;  %v525_v55 = vmul.f32 %v6801_v57, %v413_v46  ;;  %v1171_v50 = vpack.c.bf16 %v1155_v2, %v1155_v2  ;;  %v5845_v25 = vld [vmem:[#allocation2 + $0x40] sm:$0xff]  ;;  %v6805_v57 = vld [vmem:[#allocation40_spill] sm:$0xff]  ;;  %3060 = vmatpush.bf16.msra.mxu0 %v4343_v36 }
 0x1ad   :  { %6798 = vst [vmem:[#allocation56_spill] sm:$0xff] %v5812_v33  ;;  %v5816_v56 = vpop.permute.xlu1 %2592  ;;  %v917_v53 = vpack.c.b16 %v904_v6, %v903_v52  ;;  %v6804_v46 = vld [vmem:[#allocation26_spill] sm:$0xff]  ;;  %v804_v17 = vmul.f32 %v6805_v57, %v691_v54  ;;  %v6807_v52 = vld [vmem:[#allocation17_spill] sm:$0xff]  ;;  %v864_v30 = vunpack.c.l.b16 %v542_v12 }
 0x1ae   :  { %v541_v49 = vpack.c.bf16 %v525_v55, %v525_v55  ;;  %v1493_v2 = vunpack.c.l.b16 %v1171_v50  ;;  %v803_v21 = vmul.f32 %v6804_v46, %v690_v29  ;;  %v665_v6 = vmul.f32 %v5845_v25, %v6807_v52  ;;  %v1317_v12 = vld [vmem:[#allocation2 + $0x11] sm:$0xff]  ;;  %v693_v33 = vld [vmem:[#allocation2 + $0x21] sm:$0xff] }
 0x1af   :  { %v820_v50 = vpack.c.bf16 %v804_v17, %v804_v17  ;;  %v5855_v29 = vpop.permute.xlu2 %2467  ;;  %v6808_v46 = vld [vmem:[#allocation68_spill] sm:$0xff]  ;;  %v6809_v52 = vld [vmem:[#allocation61_spill] sm:$0xff] }
 0x1b0   :  { %1891 = vmatmul.bf16.gmra.mxu2 %v1549_v26  ;;  %v664_v26 = vmul.f32 %v6806_v4, %v551_v60  ;;  %v863_v55 = vunpack.c.l.b16 %v541_v49  ;;  %v1501_v37 = vpack.c.b16 %v1493_v2, %v1492_v44  ;;  %v819_v48 = vpack.c.bf16 %v803_v21, %v803_v21  ;;  %3061 = vmatpush.bf16.msra.mxu0 %v4342_v10  ;;  %v4336_v60 = vld [vmem:[%s6667_s8 + $0x1b0] sm:$0xff]  ;;  %v4341_v49 = vld [vmem:[%s6667_s8 + $0x1d8] sm:$0xff] }
 0x1b1   :  { %v5865_v44 = vld [vmem:[#allocation2 + $0x19] sm:$0xff]  ;;  %v948_v17 = vunpack.c.l.b16 %v820_v50  ;;  %3010 = vmatpush.bf16.msra.mxu3 %v4336_v60  ;;  %v4339_v60 = vld [vmem:[%s6667_s8 + $0x1c8] sm:$0xff] }
 0x1b2   :  { %v680_v36 = vpack.c.bf16 %v664_v26, %v664_v26  ;;  %v873_v2 = vpack.c.b16 %v864_v30, %v863_v55  ;;  %v1431_v21 = vmul.f32 %v6808_v46, %v5865_v44  ;;  %v947_v57 = vunpack.c.l.b16 %v819_v48  ;;  %v415_v10 = vld [vmem:[#allocation2 + $0x77] sm:$0xff]  ;;  %v416_v4 = vld [vmem:[#allocation2 + $0x7f] sm:$0xff] }
 0x1b3   :  { %v4340_v26 = vld [vmem:[%s6667_s8 + $0x1d0] sm:$0xff]  ;;  %v527_v51 = vmul.f32 %v6810_v42, %v415_v10 }
 0x1b4   :  { %3062 = vmatpush.bf16.msra.mxu0 %v4341_v49  ;;  %v905_v55 = vunpack.c.l.b16 %v680_v36  ;;  %v1447_v48 = vpack.c.bf16 %v1431_v21, %v1431_v21  ;;  %v963_v50 = vpack.c.b16 %v948_v17, %v947_v57  ;;  %v692_v49 = vld [vmem:[#allocation2 + $0x19] sm:$0xff]  ;;  %v554_v42 = vld [vmem:[#allocation2 + $0x50] sm:$0xff]  ;;  %v6813_v21 = vld [vmem:[#allocation39_spill] sm:$0xff] }
 0x1b5   :  { %v5843_v1 = vpop.permute.xlu1 %2317  ;;  %2157 = vmatmul.bf16.gmra.mxu1 %v917_v53  ;;  %v681_v53 = vpack.c.bf16 %v665_v6, %v665_v6  ;;  %v1430_v6 = vmul.f32 %v6809_v52, %v1317_v12  ;;  %v543_v36 = vpack.c.bf16 %v527_v51, %v527_v51  ;;  %v553_v12 = vld [vmem:[#allocation2 + $0x48] sm:$0xff]  ;;  %v805_v57 = vmul.f32 %v6813_v21, %v692_v49  ;;  %v6814_v17 = vld [vmem:[#allocation29_spill] sm:$0xff] }
 0x1b6   :  { %6803 = vst [vmem:[#allocation13_spill] sm:$0xff] %v5843_v1  ;;  %v6811_v1 = vld [vmem:[#allocation22_spill] sm:$0xff]  ;;  %v1575_v10 = vunpack.c.l.b16 %v1447_v48 }
 0x1b7   :  { %v906_v30 = vunpack.c.l.b16 %v681_v53  ;;  %v528_v46 = vmul.f32 %v6811_v1, %v416_v4  ;;  %v1446_v62 = vpack.c.bf16 %v1430_v6, %v1430_v6  ;;  %v2618_v1 = vpop.permute.xlu2 %2617  ;;  %v806_v4 = vmul.f32 %v6814_v17, %v693_v33  ;;  %v5888_v6 = vld [vmem:[#allocation2 + $0x71] sm:$0xff] }
 0x1b8   :  { %3063 = vmatpush.bf16.msra.mxu0 %v4340_v26  ;;  %v4338_v26 = vld [vmem:[%s6667_s8 + $0x1c0] sm:$0xff]  ;;  %v2651_v48 = vmul.f32 %v2618_v1, %v5888_v6  ;;  %v821_v49 = vpack.c.bf16 %v805_v57, %v805_v57 }
 0x1b9   :  { %1842 = vmatmul.bf16.gmra.mxu3 %v1501_v37  ;;  %v4352_v37 = vld [vmem:[%s6667_s8 + $0x230] sm:$0xff]  ;;  %v544_v53 = vpack.c.bf16 %v528_v46, %v528_v46  ;;  %v1574_v52 = vunpack.c.l.b16 %v1446_v62  ;;  %v822_v21 = vpack.c.bf16 %v806_v4, %v806_v4 }
 0x1ba   :  { %3108 = vmatpush.bf16.msrb.mxu1 %v4352_v37  ;;  %v2667_v1 = vpack.c.bf16 %v2651_v48, %v2651_v48  ;;  %v2496_v48 = vmul.f32 %v5686_v5, %v5761_v7 }
 0x1bb   :  { %2128 = vmatmul.bf16.gmra.mxu0 %v873_v2  ;;  %v918_v2 = vpack.c.b16 %v906_v30, %v905_v55  ;;  %v6815_v55 = vld [vmem:[#allocation31_spill] sm:$0xff]  ;;  %v6816_v30 = vld [vmem:[#allocation30_spill] sm:$0xff]  ;;  %v950_v4 = vunpack.c.l.b16 %v822_v21 }
 0x1bc   :  { %3064 = vmatpush.bf16.msra.mxu0 %v4339_v60  ;;  %v666_v51 = vmul.f32 %v6815_v55, %v553_v12  ;;  %v667_v46 = vmul.f32 %v6816_v30, %v554_v42  ;;  %v5893_v60 = vld [vmem:[#allocation2 + $0x69] sm:$0xff]  ;;  %v5898_v42 = vld [vmem:[#allocation2 + $0x21] sm:$0xff]  ;;  %v2512_v7 = vpack.c.bf16 %v2496_v48, %v2496_v48 }
 0x1bd   :  { %v5857_v54 = vpop.permute.xlu1 %2602  ;;  %v4335_v12 = vld [vmem:[%s6667_s8 + $0x1a8] sm:$0xff] }
 0x1be   :  { %v682_v17 = vpack.c.bf16 %v666_v51, %v666_v51  ;;  %v683_v62 = vpack.c.bf16 %v667_v46, %v667_v46  ;;  %v1320_v55 = vld [vmem:[#allocation2 + $0x29] sm:$0xff]  ;;  %3011 = vmatpush.bf16.msra.mxu3 %v4335_v12  ;;  %3109 = vmatpush.bf16.msrb.mxu1 %v4351_v23 }
 0x1bf   :  { %v6821_v23 = vld [vmem:[#allocation43_spill] sm:$0xff] }
 0x1c0   :  { %2196 = vmatmul.bf16.vlgmr.msrb.gmra.mxu2 %v963_v50  ;;  %v865_v50 = vunpack.c.l.b16 %v543_v36  ;;  %3065 = vmatpush.bf16.msra.mxu0 %v4338_v26  ;;  %v907_v30 = vunpack.c.l.b16 %v682_v17  ;;  %v908_v46 = vunpack.c.l.b16 %v683_v62 }
 0x1c2   :  { %v919_v5 = vpack.c.b16 %v908_v46, %v907_v30 }
 0x1c5   :  { %v5881_v37 = vpop.permute.xlu1 %2327  ;;  %2162 = vmatmul.bf16.gmra.mxu1 %v918_v2  ;;  %v866_v2 = vunpack.c.l.b16 %v544_v53 }
 0x1c6   :  { %6812 = vst [vmem:[#allocation12_spill] sm:$0xff] %v5881_v37  ;;  %v1590_v37 = vpack.c.b16 %v1575_v10, %v1574_v52  ;;  %v6817_v10 = vld [vmem:[#allocation67_spill] sm:$0xff] }
 0x1c7   :  { %v874_v36 = vpack.c.b16 %v866_v2, %v865_v50  ;;  %v1432_v57 = vmul.f32 %v6817_v10, %v5898_v42  ;;  %v6818_v52 = vld [vmem:[#allocation63_spill] sm:$0xff]  ;;  %v5909_v50 = vunpack.c.l.b16 %v2667_v1  ;;  %v5920_v1 = vld [vmem:[#allocation2 + $0x60] sm:$0xff]  ;;  %v555_v10 = vld [vmem:[#allocation2 + $0x58] sm:$0xff] }
 0x1c8   :  { %v1433_v51 = vmul.f32 %v6818_v52, %v1320_v55  ;;  %v5914_v55 = vld [vmem:[#allocation2 + $0x29] sm:$0xff] }
 0x1c9   :  { %1905 = vmatmul.bf16.vlgmr.msrb.gmra.mxu3 %v1590_v37  ;;  %v949_v37 = vunpack.c.l.b16 %v821_v49  ;;  %6819 = vst [vmem:[#allocation53_spill] sm:$0xff] %v5909_v50  ;;  %v1448_v49 = vpack.c.bf16 %v1432_v57, %v1432_v57 }
 0x1cb   :  { %2133 = vmatmul.bf16.gmra.mxu0 %v874_v36  ;;  %v964_v21 = vpack.c.b16 %v950_v4, %v949_v37  ;;  %v695_v36 = vld [vmem:[#allocation2 + $0x31] sm:$0xff]  ;;  %v1576_v57 = vunpack.c.l.b16 %v1448_v49  ;;  %v6822_v37 = vld [vmem:[#allocation42_spill] sm:$0xff] }
 0x1cc   :  { %v808_v4 = vmul.f32 %v6822_v37, %v695_v36  ;;  %v5933_v36 = vld [vmem:[#allocation2 + $0x39] sm:$0xff] }
 0x1cd   :  { %v2613_v33 = vpop.permute.xlu1 %2612  ;;  %v4350_v37 = vld [vmem:[%s6667_s8 + $0x220] sm:$0xff] }
 0x1ce   :  { %v2650_v53 = vmul.f32 %v2613_v33, %v5893_v60  ;;  %v4402_v33 = vld [vmem:[#allocation2 + $0x18] sm:$0xff]  ;;  %v824_v48 = vpack.c.bf16 %v808_v4, %v808_v4  ;;  %v2498_v4 = vmul.f32 %v5740_v28, %v5802_v22  ;;  %3110 = vmatpush.bf16.msrb.mxu1 %v4350_v37  ;;  %v6825_v28 = vld [vmem:[#allocation32_spill] sm:$0xff]  ;;  %v6828_v37 = vld [vmem:[#allocation23_spill] sm:$0xff] }
 0x1cf   :  { %v2495_v12 = vmul.f32 %v4402_v33, %v5504_v27  ;;  %v807_v27 = vmul.f32 %v5914_v55, %v6821_v23  ;;  %v6823_v33 = vld [vmem:[#allocation20_spill] sm:$0xff] }
 0x1d0   :  { %v2666_v26 = vpack.c.bf16 %v2650_v53, %v2650_v53  ;;  %v1449_v53 = vpack.c.bf16 %v1433_v51, %v1433_v51  ;;  %2201 = vmatmul.bf16.gmra.mxu2 %v964_v21  ;;  %v668_v17 = vmul.f32 %v6823_v33, %v555_v10  ;;  %v669_v51 = vmul.f32 %v5920_v1, %v6824_v13 }
 0x1d1   :  { %v2737_v21 = vunpack.c.l.b16 %v2512_v7  ;;  %v823_v46 = vpack.c.bf16 %v807_v27, %v807_v27  ;;  %v1435_v13 = vmul.f32 %v5473_v0, %v5933_v36  ;;  %v952_v23 = vunpack.c.l.b16 %v824_v48  ;;  %v4403_v0 = vld [vmem:[#allocation2 + $0x28] sm:$0xff]  ;;  %v5949_v48 = vld [vmem:[#allocation2 + $0x70] sm:$0xff] }
 0x1d2   :  { %v5911_v2 = vunpack.c.l.b16 %v2666_v26  ;;  %v5918_v62 = vpop.f32.mrf.mxu1  ;;  %v2511_v26 = vpack.c.bf16 %v2495_v12, %v2495_v12  ;;  %v1577_v52 = vunpack.c.l.b16 %v1449_v53  ;;  %v684_v49 = vpack.c.bf16 %v668_v17, %v668_v17  ;;  %v4334_v12 = vld [vmem:[%s6667_s8 + $0x1a0] sm:$0xff]  ;;  %v5935_v53 = vld [vmem:[#allocation2 + $0x31] sm:$0xff] }
 0x1d3   :  { %v1434_v7 = vmul.f32 %v5476_v20, %v5935_v53  ;;  %3012 = vmatpush.bf16.msra.mxu3 %v4334_v12  ;;  %v2497_v20 = vmul.f32 %v4403_v0, %v5591_v8  ;;  %v6827_v8 = vld [vmem:[#allocation33_spill] sm:$0xff]  ;;  %v671_v0 = vmul.f32 %v5949_v48, %v6828_v37 }
 0x1d4   :  { %6820 = vst [vmem:[#allocation59_spill] sm:$0xff] %v5911_v2  ;;  %v1591_v30 = vpack.c.b16 %v1577_v52, %v1576_v57  ;;  %v2736_v2 = vunpack.c.l.b16 %v2511_v26  ;;  %v951_v57 = vunpack.c.l.b16 %v823_v46  ;;  %v909_v17 = vunpack.c.l.b16 %v684_v49  ;;  %v557_v49 = vld [vmem:[#allocation2 + $0x68] sm:$0xff] }
 0x1d5   :  { %2167 = vmatmul.bf16.gmra.mxu1 %v919_v5  ;;  %v685_v5 = vpack.c.bf16 %v669_v51, %v669_v51  ;;  %v1450_v26 = vpack.c.bf16 %v1434_v7, %v1434_v7  ;;  %v696_v51 = vld [vmem:[#allocation2 + $0x39] sm:$0xff]  ;;  %v2514_v46 = vpack.c.bf16 %v2498_v4, %v2498_v4  ;;  %v2513_v7 = vpack.c.bf16 %v2497_v20, %v2497_v20 }
 0x1d6   :  { %v2752_v10 = vpack.c.b16 %v2737_v21, %v2736_v2  ;;  %v1451_v2 = vpack.c.bf16 %v1435_v13, %v1435_v13  ;;  %v965_v52 = vpack.c.b16 %v952_v23, %v951_v57  ;;  %v697_v21 = vld [vmem:[#allocation2 + $0x41] sm:$0xff]  ;;  %v809_v22 = vmul.f32 %v6825_v28, %v696_v51  ;;  %v4333_v20 = vld [vmem:[%s6667_s8 + $0x198] sm:$0xff] }
 0x1d7   :  { %v910_v27 = vunpack.c.l.b16 %v685_v5  ;;  %v1578_v12 = vunpack.c.l.b16 %v1450_v26  ;;  %v670_v23 = vmul.f32 %v6827_v8, %v557_v49  ;;  %v2738_v59 = vunpack.c.l.b16 %v2513_v7  ;;  %v5961_v51 = vld [vmem:[#allocation2 + $0x41] sm:$0xff]  ;;  %v5967_v49 = vpop.permute.xlu0 %2452  ;;  %3013 = vmatpush.bf16.msra.mxu3 %v4333_v20  ;;  %v699_v20 = vld [vmem:[#allocation2 + $0x51] sm:$0xff] }
 0x1d8   :  { %v1579_v5 = vunpack.c.l.b16 %v1451_v2  ;;  %v687_v26 = vpack.c.bf16 %v671_v0, %v671_v0 }
 0x1d9   :  { %1910 = vmatmul.bf16.gmra.mxu3 %v1591_v30  ;;  %v920_v30 = vpack.c.b16 %v910_v27, %v909_v17  ;;  %v825_v27 = vpack.c.bf16 %v809_v22, %v809_v22  ;;  %v686_v2 = vpack.c.bf16 %v670_v23, %v670_v23 }
 0x1da   :  { %v5928_v50 = vpop.f32.mrf.mxu1  ;;  %v1592_v17 = vpack.c.b16 %v1579_v5, %v1578_v12  ;;  %v912_v23 = vunpack.c.l.b16 %v687_v26 }
 0x1db   :  { %3066 = vmatmul.bf16.vlgmr.msra.gmra.mxu0 %v2752_v10  ;;  %v6826_v10 = vld [vmem:[#allocation45_spill] sm:$0xff]  ;;  %v953_v5 = vunpack.c.l.b16 %v825_v27  ;;  %v911_v8 = vunpack.c.l.b16 %v686_v2 }
 0x1dc   :  { %v810_v13 = vmul.f32 %v6826_v10, %v697_v21  ;;  %v5963_v21 = vld [vmem:[#allocation2 + $0x49] sm:$0xff] }
 0x1dd   :  { %v6829_v10 = vld [vmem:[#allocation64_spill] sm:$0xff]  ;;  %v921_v26 = vpack.c.b16 %v912_v23, %v911_v8  ;;  %v6835_v8 = vld [vmem:[#allocation37_spill] sm:$0xff] }
 0x1de   :  { %v826_v4 = vpack.c.bf16 %v810_v13, %v810_v13  ;;  %v1436_v13 = vmul.f32 %v6829_v10, %v5961_v51  ;;  %v5984_v10 = vld [vmem:[#allocation2 + $0x80] sm:$0xff] }
 0x1e0   :  { %2206 = vmatmul.bf16.gmra.mxu2 %v965_v52  ;;  %v2739_v52 = vunpack.c.l.b16 %v2514_v46  ;;  %v1437_v46 = vmul.f32 %v5512_v40, %v5963_v21  ;;  %v954_v12 = vunpack.c.l.b16 %v826_v4  ;;  %v2500_v40 = vmul.f32 %v5781_v58, %v5845_v25  ;;  %v698_v4 = vld [vmem:[#allocation2 + $0x49] sm:$0xff] }
 0x1e1   :  { %v6831_v25 = vld [vmem:[#allocation44_spill] sm:$0xff] }
 0x1e2   :  { %v5947_v33 = vpop.f32.mrf.mxu1  ;;  %v1453_v37 = vpack.c.bf16 %v1437_v46, %v1437_v46  ;;  %v966_v0 = vpack.c.b16 %v954_v12, %v953_v5  ;;  %v811_v46 = vmul.f32 %v6831_v25, %v698_v4  ;;  %v6832_v5 = vld [vmem:[#allocation35_spill] sm:$0xff] }
 0x1e3   :  { %v1867_v57 = vpop.f32.mrf.mxu2 }
 0x1e4   :  { %v1581_v58 = vunpack.c.l.b16 %v1453_v37 }
 0x1e5   :  { %2172 = vmatmul.bf16.gmra.mxu1 %v920_v30  ;;  %v2753_v30 = vpack.c.b16 %v2739_v52, %v2738_v59  ;;  %v4349_v59 = vld [vmem:[%s6667_s8 + $0x218] sm:$0xff] }
 0x1e6   :  { %3111 = vmatpush.bf16.msrb.mxu1 %v4349_v59  ;;  %v4404_v52 = vld [vmem:[#allocation2 + $0x38] sm:$0xff] }
 0x1e9   :  { %1915 = vmatmul.bf16.gmra.mxu3 %v1592_v17  ;;  %v2499_v17 = vmul.f32 %v4404_v52, %v5709_v34  ;;  %v812_v34 = vmul.f32 %v6832_v5, %v699_v20 }
 0x1ea   :  { %v5956_v18 = vpop.f32.mrf.mxu1 }
 0x1eb   :  { %v1818_v28 = vpop.f32.mrf.mxu3  ;;  %v1869_v22 = vpop.f32.mrf.mxu2  ;;  %3071 = vmatmul.bf16.gmra.mxu0 %v2753_v30  ;;  %v2516_v30 = vpack.c.bf16 %v2500_v40, %v2500_v40  ;;  %v2515_v12 = vpack.c.bf16 %v2499_v17, %v2499_v17  ;;  %v6836_v40 = vld [vmem:[#allocation36_spill] sm:$0xff]  ;;  %v828_v4 = vpack.c.bf16 %v812_v34, %v812_v34 }
 0x1ec   :  { %v5971_v7 = vadd.f32 %v1867_v57, %v1818_v28  ;;  %v1452_v57 = vpack.c.bf16 %v1436_v13, %v1436_v13  ;;  %v5982_v28 = vld [vmem:[#allocation2 + $0x78] sm:$0xff] }
 0x1ed   :  { %v672_v23 = vmul.f32 %v5982_v28, %v6835_v8  ;;  %v2741_v37 = vunpack.c.l.b16 %v2516_v30  ;;  %v2740_v25 = vunpack.c.l.b16 %v2515_v12  ;;  %v6002_v8 = vld [vmem:[#allocation2 + $0x51] sm:$0xff] }
 0x1ee   :  { %6830 = vst [vmem:[#allocation11_spill] sm:$0xff] %v5971_v7  ;;  %v1580_v13 = vunpack.c.l.b16 %v1452_v57  ;;  %v827_v7 = vpack.c.bf16 %v811_v46, %v811_v46  ;;  %v1438_v30 = vmul.f32 %v5508_v38, %v6002_v8  ;;  %v956_v46 = vunpack.c.l.b16 %v828_v4 }
 0x1ef   :  { %v688_v57 = vpack.c.bf16 %v672_v23, %v672_v23 }
 0x1f0   :  { %2211 = vmatmul.bf16.gmra.mxu2 %v966_v0  ;;  %v5988_v0 = vpop.permute.xlu0 %2312  ;;  %v1454_v38 = vpack.c.bf16 %v1438_v30, %v1438_v30 }
 0x1f1   :  { %6833 = vst [vmem:[#allocation21_spill] sm:$0xff] %v5988_v0  ;;  %v6014_v0 = vld [vmem:[#allocation2 + $0x59] sm:$0xff] }
 0x1f2   :  { %v1857_v27 = vpop.f32.mrf.mxu1 }
 0x1f3   :  { %v5980_v2 = vadd.f32 %v1857_v27, %v5918_v62  ;;  %v1820_v59 = vpop.f32.mrf.mxu3  ;;  %v1872_v52 = vpop.f32.mrf.mxu2  ;;  %v673_v27 = vmul.f32 %v5984_v10, %v6836_v40  ;;  %v2754_v40 = vpack.c.b16 %v2741_v37, %v2740_v25  ;;  %v4405_v37 = vld [vmem:[#allocation2 + $0x50] sm:$0xff] }
 0x1f4   :  { %v5990_v62 = vadd.f32 %v1869_v22, %v1820_v59  ;;  %v4332_v22 = vld [vmem:[%s6667_s8 + $0x190] sm:$0xff]  ;;  %v1326_v59 = vld [vmem:[#allocation2 + $0x59] sm:$0xff]  ;;  %v2502_v25 = vmul.f32 %v4405_v37, %v5967_v49 }
 0x1f5   :  { %2177 = vmatmul.bf16.gmra.mxu1 %v921_v26  ;;  %v1593_v26 = vpack.c.b16 %v1581_v58, %v1580_v13  ;;  %v689_v5 = vpack.c.bf16 %v673_v27, %v673_v27  ;;  %v955_v58 = vunpack.c.l.b16 %v827_v7  ;;  %3014 = vmatpush.bf16.msra.mxu3 %v4332_v22  ;;  %v913_v27 = vunpack.c.l.b16 %v688_v57  ;;  %v4406_v22 = vld [vmem:[#allocation2 + $0x48] sm:$0xff] }
 0x1f6   :  { %6834 = vst [vmem:[#allocation60_spill] sm:$0xff] %v5990_v62  ;;  %v4347_v57 = vld [vmem:[%s6667_s8 + $0x208] sm:$0xff]  ;;  %v2518_v30 = vpack.c.bf16 %v2502_v25, %v2502_v25 }
 0x1f7   :  { %v967_v4 = vpack.c.b16 %v956_v46, %v955_v58  ;;  %v1582_v58 = vunpack.c.l.b16 %v1454_v38  ;;  %v6839_v46 = vld [vmem:[#allocation47_spill] sm:$0xff] }
 0x1f8   :  { %v2463_v7 = vpop.permute.xlu0 %2462  ;;  %v2743_v25 = vunpack.c.l.b16 %v2518_v30 }
 0x1f9   :  { %1920 = vmatmul.bf16.gmra.mxu3 %v1593_v26  ;;  %v914_v26 = vunpack.c.l.b16 %v689_v5 }
 0x1fa   :  { %v1859_v20 = vpop.f32.mrf.mxu1 }
 0x1fb   :  { %v5997_v17 = vadd.f32 %v1859_v20, %v5928_v50  ;;  %v1823_v34 = vpop.f32.mrf.mxu3  ;;  %v1874_v12 = vpop.f32.mrf.mxu2  ;;  %3076 = vmatmul.bf16.gmra.mxu0 %v2754_v40  ;;  %v6837_v50 = vld [vmem:[#allocation66_spill] sm:$0xff]  ;;  %v4348_v20 = vld [vmem:[%s6667_s8 + $0x210] sm:$0xff]  ;;  %v2501_v40 = vmul.f32 %v4406_v22, %v5758_v14  ;;  %v922_v49 = vpack.c.b16 %v914_v26, %v913_v27  ;;  %v813_v14 = vmul.f32 %v6014_v0, %v6839_v46 }
 0x1fc   :  { %v1439_v13 = vmul.f32 %v6837_v50, %v1326_v59  ;;  %v6007_v23 = vadd.f32 %v1872_v52, %v1823_v34  ;;  %3112 = vmatpush.bf16.msrb.mxu1 %v4348_v20  ;;  %v701_v59 = vld [vmem:[#allocation2 + $0x61] sm:$0xff]  ;;  %v2641_v26 = vmul.f32 %v5546_v11, %v5898_v42  ;;  %v1328_v11 = vld [vmem:[#allocation2 + $0x69] sm:$0xff] }
 0x1fd   :  { %v6840_v50 = vld [vmem:[#allocation46_spill] sm:$0xff]  ;;  %v2517_v37 = vpack.c.bf16 %v2501_v40, %v2501_v40  ;;  %v829_v40 = vpack.c.bf16 %v813_v14, %v813_v14  ;;  %v1441_v30 = vmul.f32 %v5550_v43, %v1328_v11 }
 0x1fe   :  { %6838 = vst [vmem:[#allocation52_spill] sm:$0xff] %v6007_v23  ;;  %v1455_v5 = vpack.c.bf16 %v1439_v13, %v1439_v13  ;;  %v814_v20 = vmul.f32 %v6840_v50, %v701_v59  ;;  %v2640_v13 = vmul.f32 %v5684_v15, %v5865_v44  ;;  %v4346_v27 = vld [vmem:[%s6667_s8 + $0x200] sm:$0xff] }
 0x1ff   :  { %v2742_v59 = vunpack.c.l.b16 %v2517_v37  ;;  %v6044_v42 = vld [vmem:[#allocation2 + $0x61] sm:$0xff]  ;;  %v957_v46 = vunpack.c.l.b16 %v829_v40 }
 0x200   :  { %2216 = vmatmul.bf16.gmra.mxu2 %v967_v4  ;;  %3113 = vmatpush.bf16.msrb.mxu1 %v4347_v57  ;;  %v1583_v62 = vunpack.c.l.b16 %v1455_v5  ;;  %v6027_v4 = vpop.f32.mrf.mxu0  ;;  %v2656_v5 = vpack.c.bf16 %v2640_v13, %v2640_v13  ;;  %v6036_v15 = vpop.permute.xlu0 %2322 }
 0x202   :  { %v1862_v52 = vpop.f32.mrf.mxu1  ;;  %v1594_v38 = vpack.c.b16 %v1583_v62, %v1582_v58  ;;  %v2755_v62 = vpack.c.b16 %v2743_v25, %v2742_v59  ;;  %v1440_v58 = vmul.f32 %v5554_v31, %v6044_v42 }
 0x203   :  { %v6020_v34 = vadd.f32 %v1862_v52, %v5947_v33  ;;  %v1825_v22 = vpop.f32.mrf.mxu3  ;;  %v1877_v23 = vpop.f32.mrf.mxu2  ;;  %v830_v52 = vpack.c.bf16 %v814_v20, %v814_v20  ;;  %v2784_v20 = vunpack.c.l.b16 %v2656_v5 }
 0x204   :  { %v6029_v33 = vadd.f32 %v1874_v12, %v1825_v22  ;;  %3114 = vmatpush.bf16.msrb.mxu1 %v4346_v27  ;;  %v4331_v12 = vld [vmem:[%s6667_s8 + $0x188] sm:$0xff]  ;;  %v2504_v22 = vmul.f32 %v2463_v7, %v5920_v1  ;;  %v1457_v27 = vpack.c.bf16 %v1441_v30, %v1441_v30  ;;  %v6842_v7 = vld [vmem:[#allocation50_spill] sm:$0xff] }
 0x205   :  { %2182 = vmatmul.bf16.gmra.mxu1 %v922_v49  ;;  %v2657_v49 = vpack.c.bf16 %v2641_v26, %v2641_v26  ;;  %v958_v14 = vunpack.c.l.b16 %v830_v52  ;;  %3015 = vmatpush.bf16.msra.mxu3 %v4331_v12  ;;  %v1456_v26 = vpack.c.bf16 %v1440_v58, %v1440_v58  ;;  %v6841_v12 = vld [vmem:[#allocation38_spill] sm:$0xff] }
 0x206   :  { %v2520_v59 = vpack.c.bf16 %v2504_v22, %v2504_v22  ;;  %v815_v1 = vmul.f32 %v5893_v60, %v6841_v12  ;;  %v4408_v12 = vld [vmem:[#allocation2 + $0x68] sm:$0xff] }
 0x207   :  { %v2785_v13 = vunpack.c.l.b16 %v2657_v49  ;;  %v968_v43 = vpack.c.b16 %v958_v14, %v957_v46  ;;  %v1584_v5 = vunpack.c.l.b16 %v1456_v26  ;;  %v816_v49 = vmul.f32 %v5888_v6, %v6842_v7  ;;  %v6080_v7 = vld [vmem:[#allocation2 + $0x79] sm:$0xff] }
 0x208   :  { %v6052_v25 = vpop.f32.mrf.mxu0  ;;  %v2745_v46 = vunpack.c.l.b16 %v2520_v59  ;;  %v2643_v14 = vmul.f32 %v5648_v45, %v5935_v53 }
 0x209   :  { %1925 = vmatmul.bf16.gmra.mxu3 %v1594_v38  ;;  %v4407_v38 = vld [vmem:[#allocation2 + $0x58] sm:$0xff]  ;;  %v2800_v52 = vpack.c.b16 %v2785_v13, %v2784_v20  ;;  %v831_v20 = vpack.c.bf16 %v815_v1, %v815_v1  ;;  %v832_v22 = vpack.c.bf16 %v816_v49, %v816_v49  ;;  %v2505_v1 = vmul.f32 %v4408_v12, %v5855_v29  ;;  %v705_v49 = vld [vmem:[#allocation2 + $0x81] sm:$0xff] }
 0x20a   :  { %v1864_v57 = vpop.f32.mrf.mxu1  ;;  %v2503_v31 = vmul.f32 %v4407_v38, %v5805_v19  ;;  %v2642_v19 = vmul.f32 %v5738_v9, %v5914_v55  ;;  %v4330_v9 = vld [vmem:[%s6667_s8 + $0x180] sm:$0xff]  ;;  %v2644_v29 = vmul.f32 %v5778_v24, %v5933_v36  ;;  %s4447_s8 = smov 8  }
 0x20b   :  { %v6039_v44 = vadd.f32 %v1864_v57, %v5956_v18  ;;  %v1828_v50 = vpop.f32.mrf.mxu3  ;;  %v1879_v18 = vpop.f32.mrf.mxu2  ;;  %3081 = vmatmul.bf16.gmra.mxu0 %v2755_v62  ;;  %v1585_v57 = vunpack.c.l.b16 %v1457_v27  ;;  %v959_v26 = vunpack.c.l.b16 %v831_v20  ;;  %3016 = vmatpush.bf16.msra.mxu3 %v4330_v9  ;;  %v2645_v9 = vmul.f32 %v5732_v3, %v5961_v51  ;;  %v1332_v3 = vld [vmem:[#allocation2 + $0x89] sm:$0xff] }
 0x20c   :  { %v6049_v37 = vadd.f32 %v1877_v23, %v1828_v50  ;;  %v2473_v23 = vpop.permute.xlu0 %2472  ;;  %v2519_v11 = vpack.c.bf16 %v2503_v31, %v2503_v31  ;;  %v2658_v13 = vpack.c.bf16 %v2642_v19, %v2642_v19 }
 0x20d   :  { %v1595_v50 = vpack.c.b16 %v1585_v57, %v1584_v5  ;;  %v2506_v59 = vmul.f32 %v2473_v23, %v5949_v48  ;;  %v2521_v23 = vpack.c.bf16 %v2505_v1, %v2505_v1  ;;  %v2661_v36 = vpack.c.bf16 %v2645_v9, %v2645_v9 }
 0x20e   :  { %v2744_v60 = vunpack.c.l.b16 %v2519_v11  ;;  %v2786_v38 = vunpack.c.l.b16 %v2658_v13 }
 0x210   :  { %2221 = vmatmul.bf16.gmra.mxu2 %v968_v43  ;;  %v6067_v27 = vpop.f32.mrf.mxu0  ;;  %v2756_v55 = vpack.c.b16 %v2745_v46, %v2744_v60  ;;  %v960_v43 = vunpack.c.l.b16 %v832_v22 }
 0x212   :  { %v6055_v40 = vpop.f32.mrf.mxu1  ;;  %v969_v5 = vpack.c.b16 %v960_v43, %v959_v26  ;;  %v2746_v43 = vunpack.c.l.b16 %v2521_v23 }
 0x213   :  { %v1830_v62 = vpop.f32.mrf.mxu3  ;;  %v1882_v30 = vpop.f32.mrf.mxu2 }
 0x214   :  { %v6063_v58 = vadd.f32 %v1879_v18, %v1830_v62  ;;  %v2659_v18 = vpack.c.bf16 %v2643_v14, %v2643_v14  ;;  %v6074_v31 = vpop.permute.xlu0 %2332  ;;  %v2522_v62 = vpack.c.bf16 %v2506_v59, %v2506_v59  ;;  %v6843_v14 = vld [vmem:[#allocation49_spill] sm:$0xff]  ;;  %v6845_v59 = vpack.c.b16 %v5626_v63, %v5621_v35 }
 0x215   :  { %3115 = vmatmul.bf16.vlgmr.msrb.gmra.mxu1 %v2800_v52 }
 0x216   :  { %v2787_v57 = vunpack.c.l.b16 %v2659_v18  ;;  %v2747_v13 = vunpack.c.l.b16 %v2522_v62 }
 0x218   :  { %v2801_v11 = vpack.c.b16 %v2787_v57, %v2786_v38  ;;  %v6082_v19 = vpop.f32.mrf.mxu0  ;;  %v2478_v38 = vpop.permute.xlu2 %2477  ;;  %v6098_v57 = vld [vmem:[#allocation2 + $0x81] sm:$0xff] }
 0x219   :  { %1930 = vmatmul.bf16.gmra.mxu3 %v1595_v50  ;;  %v6844_v50 = vld [vmem:[#allocation41_spill] sm:$0xff]  ;;  %v1444_v24 = vmul.f32 %v5586_v61, %v6098_v57  ;;  %v2789_v61 = vunpack.c.l.b16 %v2661_v36 }
 0x21a   :  { %v6069_v6 = vpop.f32.mrf.mxu1  ;;  %v818_v48 = vmul.f32 %v6844_v50, %v705_v49  ;;  %v1445_v49 = vmul.f32 %v5470_v32, %v1332_v3 }
 0x21b   :  { %v1833_v45 = vpop.f32.mrf.mxu3  ;;  %v1884_v53 = vpop.f32.mrf.mxu2  ;;  %3086 = vmatmul.bf16.gmra.mxu0 %v2756_v55 }
 0x21c   :  { %v6076_v52 = vadd.f32 %v1882_v30, %v1833_v45  ;;  %v817_v30 = vmul.f32 %v6080_v7, %v6843_v14  ;;  %v2483_v55 = vpop.permute.xlu0 %2482  ;;  %v834_v26 = vpack.c.bf16 %v818_v48, %v818_v48  ;;  %v2660_v45 = vpack.c.bf16 %v2644_v29, %v2644_v29 }
 0x21d   :  { %v2508_v14 = vmul.f32 %v2483_v55, %v5984_v10  ;;  %v2507_v48 = vmul.f32 %v2478_v38, %v5982_v28  ;;  %v1461_v23 = vpack.c.bf16 %v1445_v49, %v1445_v49  ;;  %v2646_v10 = vmul.f32 %v5816_v56, %v5963_v21 }
 0x21e   :  { %v833_v18 = vpack.c.bf16 %v817_v30, %v817_v30  ;;  %v962_v12 = vunpack.c.l.b16 %v834_v26  ;;  %v1460_v30 = vpack.c.bf16 %v1444_v24, %v1444_v24  ;;  %v2647_v38 = vmul.f32 %v5792_v41, %v6002_v8  ;;  %v4354_v41 = vld [vmem:[%s6663_s4] sm:$0xff] }
 0x21f   :  { %v2524_v32 = vpack.c.bf16 %v2508_v14, %v2508_v14  ;;  %v2662_v36 = vpack.c.bf16 %v2646_v10, %v2646_v10  ;;  %v4409_v8 = vld [vmem:[#allocation2] sm:$0xff]  ;;  %v2649_v10 = vmul.f32 %v5835_v47, %v6044_v42  ;;  %v4355_v47 = vld [vmem:[%s6663_s4 + $0x8] sm:$0xff] }
 0x220   :  { %2226 = vmatmul.bf16.gmra.mxu2 %v969_v5  ;;  %v2757_v5 = vpack.c.b16 %v2747_v13, %v2746_v43  ;;  %v6103_v62 = vpop.f32.mrf.mxu0  ;;  %v1588_v13 = vunpack.c.l.b16 %v1460_v30  ;;  %v6113_v9 = vpop.permute.xlu2 %2627  ;;  %v1589_v43 = vunpack.c.l.b16 %v1461_v23  ;;  %v2396_v30 = vld [vmem:[#allocation2 + $0x88] sm:$0xff] }
 0x221   :  { %v2749_v28 = vunpack.c.l.b16 %v2524_v32  ;;  %v2790_v56 = vunpack.c.l.b16 %v2662_v36  ;;  %v2665_v36 = vpack.c.bf16 %v2649_v10, %v2649_v10 }
 0x222   :  { %v6084_v46 = vpop.f32.mrf.mxu1 }
 0x223   :  { %v1835_v20 = vpop.f32.mrf.mxu3  ;;  %v1887_v22 = vpop.f32.mrf.mxu2  ;;  %v2793_v42 = vunpack.c.l.b16 %v2665_v36 }
 0x224   :  { %v6091_v60 = vadd.f32 %v1884_v53, %v1835_v20  ;;  %v961_v53 = vunpack.c.l.b16 %v833_v18  ;;  %v6111_v29 = vpop.permute.xlu0 %2342 }
 0x225   :  { %3120 = vmatmul.bf16.gmra.mxu1 %v2801_v11  ;;  %v2788_v11 = vunpack.c.l.b16 %v2660_v45  ;;  %v1597_v45 = vpack.c.b16 %v1589_v43, %v1588_v13 }
 0x226   :  { %v970_v50 = vpack.c.b16 %v962_v12, %v961_v53  ;;  %v2663_v12 = vpack.c.bf16 %v2647_v38, %v2647_v38  ;;  %v6846_v38 = vpack.c.b16 %v5669_v39, %v5676_v16 }
 0x227   :  { %v2802_v20 = vpack.c.b16 %v2789_v61, %v2788_v11 }
 0x228   :  { %v2488_v21 = vpop.permute.xlu2 %2487  ;;  %v2791_v14 = vunpack.c.l.b16 %v2663_v12 }
 0x229   :  { %1935 = vmatmul.bf16.gmra.mxu3 %v6845_v59  ;;  %v6121_v59 = vpop.f32.mrf.mxu0  ;;  %v2509_v61 = vmul.f32 %v2488_v21, %v2396_v30  ;;  %v6847_v30 = vld [vmem:[#allocation6_spill] sm:$0xff] }
 0x22a   :  { %v6107_v63 = vpop.f32.mrf.mxu1 }
 0x22b   :  { %v1889_v1 = vpop.f32.mrf.mxu2  ;;  %3091 = vmatmul.bf16.gmra.mxu0 %v2757_v5  ;;  %v2525_v32 = vpack.c.bf16 %v2509_v61, %v2509_v61  ;;  %v6848_v61 = vld [vmem:[#allocation7_spill] sm:$0xff] }
 0x22c   :  { %v1838_v51 = vpop.f32.mrf.mxu3  ;;  %v2493_v3 = vpop.permute.xlu0 %2492 }
 0x22d   :  { %v6105_v35 = vadd.f32 %v1887_v22, %v1838_v51  ;;  %v2523_v22 = vpack.c.bf16 %v2507_v48, %v2507_v48  ;;  %v2510_v11 = vmul.f32 %v4409_v8, %v2493_v3 }
 0x22f   :  { %v2748_v24 = vunpack.c.l.b16 %v2523_v22 }
 0x230   :  { %2231 = vmatmul.bf16.gmra.mxu2 %v970_v50  ;;  %v2803_v50 = vpack.c.b16 %v2791_v14, %v2790_v56  ;;  %v6155_v56 = vpop.permute.xlu1 %2337 }
 0x231   :  { %v2758_v53 = vpack.c.b16 %v2749_v28, %v2748_v24  ;;  %v6130_v48 = vpop.f32.mrf.mxu0  ;;  %v2750_v28 = vunpack.c.l.b16 %v2525_v32 }
 0x232   :  { %v6123_v5 = vpop.f32.mrf.mxu1 }
 0x233   :  { %v1892_v26 = vpop.f32.mrf.mxu2 }
 0x234   :  { %v1840_v18 = vpop.f32.mrf.mxu3 }
 0x235   :  { %3125 = vmatmul.bf16.gmra.mxu1 %v2802_v20  ;;  %v6117_v55 = vadd.f32 %v1889_v1, %v1840_v18  ;;  %v2526_v20 = vpack.c.bf16 %v2510_v11, %v2510_v11  ;;  %v2648_v18 = vmul.f32 %v5857_v54, %v6014_v0 }
 0x237   :  { %v2751_v43 = vunpack.c.l.b16 %v2526_v20 }
 0x239   :  { %1940 = vmatmul.bf16.gmra.mxu3 %v1597_v45  ;;  %v2664_v45 = vpack.c.bf16 %v2648_v18, %v2648_v18  ;;  %v2759_v24 = vpack.c.b16 %v2751_v43, %v2750_v28  ;;  %v2623_v18 = vpop.permute.xlu1 %2622  ;;  %v6850_v28 = vld [vmem:[#allocation53_spill] sm:$0xff] }
 0x23a   :  { %v6133_v23 = vpop.f32.mrf.mxu1  ;;  %v2652_v36 = vmul.f32 %v2623_v18, %v6080_v7  ;;  %v2541_v18 = vld [vmem:[#allocation2 + $0x89] sm:$0xff] }
 0x23b   :  { %v1894_v49 = vpop.f32.mrf.mxu2  ;;  %3096 = vmatmul.bf16.gmra.mxu0 %v2758_v53  ;;  %v6144_v53 = vpop.f32.mrf.mxu0  ;;  %v2792_v0 = vunpack.c.l.b16 %v2664_v45  ;;  %v6851_v45 = vld [vmem:[#allocation59_spill] sm:$0xff] }
 0x23c   :  { %v1843_v51 = vpop.f32.mrf.mxu3 }
 0x23d   :  { %v6125_v1 = vadd.f32 %v1892_v26, %v1843_v51  ;;  %v2804_v16 = vpack.c.b16 %v2793_v42, %v2792_v0  ;;  %v6853_v42 = vld [vmem:[#allocation55_spill] sm:$0xff] }
 0x240   :  { %4262 = vmatmul.msk.bf16.vlgmr.msra.gmra.mxu2 %vm3374_vm6, %v4354_v41 }
 0x241   :  { %v6192_v0 = vpop.permute.xlu1 %2347 }
 0x242   :  { %v6146_v12 = vpop.f32.mrf.mxu1 }
 0x243   :  { %v2197_v22 = vpop.f32.mrf.mxu2 }
 0x244   :  { %v1845_v13 = vpop.f32.mrf.mxu3 }
 0x245   :  { %3130 = vmatmul.bf16.gmra.mxu1 %v2803_v50  ;;  %v6137_v26 = vadd.f32 %v1894_v49, %v1845_v13  ;;  %v6169_v13 = vpop.f32.mrf.mxu0 }
 0x249   :  { %3017 = vmatmul.bf16.vlgmr.msra.gmra.mxu3 %v6846_v38  ;;  %v6852_v38 = vpack.c.b16 %v6850_v28, %v6851_v45 }
 0x24a   :  { %v6160_v11 = vpop.f32.mrf.mxu1 }
 0x24b   :  { %v2199_v54 = vpop.f32.mrf.mxu2  ;;  %3101 = vmatmul.bf16.gmra.mxu0 %v2759_v24 }
 0x24c   :  { %v1906_v3 = vpop.f32.mrf.mxu3 }
 0x24d   :  { %v1907_v51 = vadd.f32 %v1906_v3, %v5980_v2 }
 0x24f   :  { %v2100_v39 = vadd.f32 %v6027_v4, %v1907_v51  ;;  %v2668_v51 = vpack.c.bf16 %v2652_v36, %v2652_v36 }
 0x250   :  { %4263 = vmatmul.msk.bf16.gmra.mxu2 %vm3374_vm6, %v4355_v47 }
 0x251   :  { %v2149_v49 = vadd.f32 %v6055_v40, %v2100_v39  ;;  %v6849_v40 = vpack.c.b16 %v6847_v30, %v6848_v61  ;;  %v6854_v39 = vld [vmem:[#allocation51_spill] sm:$0xff] }
 0x253   :  { %v6157_v21 = vadd.f32 %v2197_v22, %v2149_v49  ;;  %v2202_v8 = vpop.f32.mrf.mxu2 }
 0x254   :  { %v1908_v41 = vpop.f32.mrf.mxu3 }
 0x255   :  { %3135 = vmatmul.bf16.gmra.mxu1 %v2804_v16  ;;  %v1909_v2 = vadd.f32 %v1908_v41, %v5997_v17  ;;  %v4356_v17 = vld [vmem:[%s6663_s4 + $0x10] sm:$0xff]  ;;  %v6855_v16 = vpack.c.b16 %v6853_v42, %v6854_v39  ;;  %v6862_v39 = vld [vmem:[#allocation21_spill] sm:$0xff] }
 0x256   :  { %v4411_v42 = vld [vmem:[#allocation2 + $0x57] sm:$0xff] }
 0x257   :  { %v2102_v14 = vadd.f32 %v6052_v25, %v1909_v2 }
 0x259   :  { %v2151_v4 = vadd.f32 %v6069_v6, %v2102_v14  ;;  %3022 = vmatmul.bf16.gmra.mxu3 %v6849_v40  ;;  %v6176_v6 = vpop.f32.mrf.mxu1  ;;  %v2633_v40 = vpop.permute.xlu1 %2632 }
 0x25a   :  { %v2654_v28 = vmul.f32 %v2633_v40, %v2541_v18 }
 0x25b   :  { %v6167_v50 = vadd.f32 %v2199_v54, %v2151_v4  ;;  %v2204_v32 = vpop.f32.mrf.mxu2  ;;  %v6189_v54 = vpop.f32.mrf.mxu0 }
 0x25c   :  { %v1911_v20 = vpop.f32.mrf.mxu3 }
 0x25d   :  { %v1912_v22 = vadd.f32 %v1911_v20, %v6020_v34  ;;  %v2638_v20 = vpop.permute.xlu2 %2637 }
 0x25f   :  { %v2105_v25 = vadd.f32 %v6067_v27, %v1912_v22  ;;  %v2653_v27 = vmul.f32 %v6113_v9, %v6098_v57  ;;  %v2796_v9 = vunpack.c.l.b16 %v2668_v51  ;;  %v6861_v51 = vld [vmem:[#allocation13_spill] sm:$0xff] }
 0x260   :  { %4264 = vmatmul.msk.bf16.gmra.mxu2 %vm3374_vm6, %v4356_v17  ;;  %v2542_v17 = vld [vmem:[#allocation2 + $0x91] sm:$0xff] }
 0x261   :  { %v2154_v43 = vadd.f32 %v6084_v46, %v2105_v25  ;;  %v6198_v49 = vpop.f32.mrf.mxu1  ;;  %v2669_v7 = vpack.c.bf16 %v2653_v27, %v2653_v27  ;;  %v6859_v27 = vld [vmem:[#allocation56_spill] sm:$0xff] }
 0x263   :  { %v6180_v10 = vadd.f32 %v2202_v8, %v2154_v43  ;;  %v2207_v24 = vpop.f32.mrf.mxu2  ;;  %v6856_v8 = vld [vmem:[#allocation11_spill] sm:$0xff]  ;;  %v2797_v14 = vunpack.c.l.b16 %v2669_v7  ;;  %v6207_v30 = vpop.f32.mrf.mxu0 }
 0x264   :  { %v1913_v34 = vpop.f32.mrf.mxu3 }
 0x265   :  { %3140 = vmatmul.bf16.gmra.mxu1 %v6852_v38  ;;  %v1914_v3 = vadd.f32 %v1913_v34, %v6039_v44  ;;  %v2806_v4 = vpack.c.b16 %v2797_v14, %v2796_v9  ;;  %v2655_v38 = vmul.f32 %v2638_v20, %v2542_v17 }
 0x267   :  { %v2107_v46 = vadd.f32 %v6082_v19, %v1914_v3  ;;  %v4357_v19 = vld [vmem:[%s6663_s4 + $0x18] sm:$0xff]  ;;  %v6858_v3 = vld [vmem:[#allocation48_spill] sm:$0xff]  ;;  %v2671_v7 = vpack.c.bf16 %v2655_v38, %v2655_v38 }
 0x269   :  { %v2156_v47 = vadd.f32 %v6107_v63, %v2107_v46  ;;  %3027 = vmatmul.bf16.gmra.mxu3 %v6855_v16  ;;  %v6213_v22 = vpop.f32.mrf.mxu1  ;;  %v4410_v46 = vld [vmem:[#allocation2 + $0x5f] sm:$0xff]  ;;  %v2358_v16 = vmul.f32 %v4411_v42, %v6862_v39  ;;  %v2799_v40 = vunpack.c.l.b16 %v2671_v7 }
 0x26b   :  { %v6200_v44 = vadd.f32 %v2204_v32, %v2156_v47  ;;  %v2209_v57 = vpop.f32.mrf.mxu2  ;;  %v2359_v47 = vmul.f32 %v4410_v46, %v6861_v51 }
 0x26c   :  { %v1916_v41 = vpop.f32.mrf.mxu3 }
 0x26d   :  { %v1917_v2 = vadd.f32 %v1916_v41, %v6856_v8  ;;  %v6223_v41 = vpop.f32.mrf.mxu0 }
 0x26f   :  { %v2110_v63 = vadd.f32 %v6103_v62, %v1917_v2  ;;  %v6857_v62 = vld [vmem:[#allocation60_spill] sm:$0xff] }
 0x270   :  { %4265 = vmatmul.msk.bf16.gmra.mxu2 %vm3374_vm6, %v4357_v19  ;;  %v6863_v19 = vld [vmem:[#allocation52_spill] sm:$0xff] }
 0x271   :  { %v2159_v61 = vadd.f32 %v6123_v5, %v2110_v63  ;;  %v2670_v5 = vpack.c.bf16 %v2654_v28, %v2654_v28  ;;  %v6228_v14 = vpop.f32.mrf.mxu1  ;;  %v4358_v63 = vld [vmem:[%s6663_s4 + $0x20] sm:$0xff] }
 0x273   :  { %v6211_v32 = vadd.f32 %v2207_v24, %v2159_v61  ;;  %v2212_v43 = vpop.f32.mrf.mxu2  ;;  %v6860_v24 = vpack.c.b16 %v6858_v3, %v6859_v27  ;;  %v2798_v2 = vunpack.c.l.b16 %v2670_v5  ;;  %v2374_v61 = vpack.c.bf16 %v2358_v16, %v2358_v16  ;;  %v4412_v3 = vld [vmem:[#allocation2 + $0x6f] sm:$0xff] }
 0x274   :  { %v1918_v25 = vpop.f32.mrf.mxu3  ;;  %v6864_v27 = vld [vmem:[#allocation12_spill] sm:$0xff] }
 0x275   :  { %3145 = vmatmul.bf16.gmra.mxu1 %v2806_v4  ;;  %v1919_v45 = vadd.f32 %v1918_v25, %v6857_v62  ;;  %v2375_v4 = vpack.c.bf16 %v2359_v47, %v2359_v47  ;;  %v2807_v17 = vpack.c.b16 %v2799_v40, %v2798_v2  ;;  %v2696_v25 = vunpack.c.l.b16 %v2374_v61  ;;  %v6238_v38 = vpop.f32.mrf.mxu0 }
 0x277   :  { %v2112_v34 = vadd.f32 %v6121_v59, %v1919_v45  ;;  %v2697_v18 = vunpack.c.l.b16 %v2375_v4 }
 0x279   :  { %v2161_v36 = vadd.f32 %v6133_v23, %v2112_v34  ;;  %3032 = vmatmul.bf16.gmra.mxu3 %v6860_v24  ;;  %v2708_v5 = vpack.c.b16 %v2697_v18, %v2696_v25  ;;  %v2361_v24 = vmul.f32 %v4412_v3, %v6864_v27 }
 0x27b   :  { %v6225_v9 = vadd.f32 %v2209_v57, %v2161_v36  ;;  %v2214_v59 = vpop.f32.mrf.mxu2  ;;  %v2377_v39 = vpack.c.bf16 %v2361_v24, %v2361_v24 }
 0x27c   :  { %v1921_v8 = vpop.f32.mrf.mxu3 }
 0x27d   :  { %v1922_v23 = vadd.f32 %v1921_v8, %v6863_v19 }
 0x27f   :  { %v2115_v20 = vadd.f32 %v6130_v48, %v1922_v23  ;;  %v6242_v48 = vpop.f32.mrf.mxu1 }
 0x280   :  { %4266 = vmatmul.msk.bf16.gmra.mxu2 %vm3374_vm6, %v4358_v63 }
 0x281   :  { %v2164_v57 = vadd.f32 %v6146_v12, %v2115_v20 }
 0x283   :  { %v6236_v28 = vadd.f32 %v2212_v43, %v2164_v57  ;;  %v2217_v45 = vpop.f32.mrf.mxu2  ;;  %v4413_v43 = vld [vmem:[#allocation2 + $0x67] sm:$0xff] }
 0x284   :  { %v1923_v62 = vpop.f32.mrf.mxu3  ;;  %v2360_v46 = vmul.f32 %v4413_v43, %v6036_v15  ;;  %v2699_v15 = vunpack.c.l.b16 %v2377_v39 }
 0x285   :  { %3150 = vmatmul.bf16.gmra.mxu1 %v2807_v17  ;;  %v1924_v34 = vadd.f32 %v1923_v62, %v6029_v33  ;;  %v4415_v17 = vld [vmem:[#allocation2 + $0x77] sm:$0xff] }
 0x286   :  { %v2376_v16 = vpack.c.bf16 %v2360_v46, %v2360_v46  ;;  %v2362_v57 = vmul.f32 %v4415_v17, %v6074_v31 }
 0x287   :  { %v2117_v36 = vadd.f32 %v6144_v53, %v1924_v34  ;;  %v4359_v53 = vld [vmem:[%s6663_s4 + $0x28] sm:$0xff]  ;;  %v6257_v2 = vpop.f32.mrf.mxu1 }
 0x289   :  { %v2166_v12 = vadd.f32 %v6160_v11, %v2117_v36  ;;  %3037 = vmatmul.bf16.gmra.mxu3 %v2708_v5  ;;  %v6253_v11 = vpop.f32.mrf.mxu0 }
 0x28b   :  { %v6247_v51 = vadd.f32 %v2214_v59, %v2166_v12  ;;  %v2219_v42 = vpop.f32.mrf.mxu2  ;;  %v2698_v59 = vunpack.c.l.b16 %v2376_v16 }
 0x28c   :  { %v1926_v47 = vpop.f32.mrf.mxu3 }
 0x28d   :  { %v1927_v33 = vadd.f32 %v1926_v47, %v6049_v37  ;;  %v2709_v4 = vpack.c.b16 %v2699_v15, %v2698_v59 }
 0x28f   :  { %v2120_v7 = vadd.f32 %v6169_v13, %v1927_v33  ;;  %v2183_v25 = vpop.f32.mrf.mxu1 }
 0x290   :  { %4267 = vmatmul.msk.bf16.gmra.mxu2 %vm3374_vm6, %v4359_v53 }
 0x291   :  { %v2169_v8 = vadd.f32 %v6176_v6, %v2120_v7  ;;  %v2134_v40 = vpop.f32.mrf.mxu0  ;;  %v4414_v6 = vld [vmem:[#allocation2 + $0x7f] sm:$0xff] }
 0x292   :  { %v2363_v20 = vmul.f32 %v4414_v6, %v6155_v56 }
 0x293   :  { %v6260_v19 = vadd.f32 %v2217_v45, %v2169_v8  ;;  %v2222_v23 = vpop.f32.mrf.mxu2 }
 0x294   :  { %v1928_v37 = vpop.f32.mrf.mxu3  ;;  %v2379_v34 = vpack.c.bf16 %v2363_v20, %v2363_v20 }
 0x295   :  { %v1929_v63 = vadd.f32 %v1928_v37, %v6063_v58 }
 0x296   :  { %v2701_v31 = vunpack.c.l.b16 %v2379_v34 }
 0x297   :  { %v2122_v61 = vadd.f32 %v6189_v54, %v1929_v63  ;;  %v4360_v54 = vld [vmem:[%s6663_s4 + $0x30] sm:$0xff]  ;;  %v2185_v43 = vpop.f32.mrf.mxu1 }
 0x299   :  { %v2171_v13 = vadd.f32 %v6198_v49, %v2122_v61  ;;  %3042 = vmatmul.bf16.gmra.mxu3 %v2709_v4  ;;  %v2378_v49 = vpack.c.bf16 %v2362_v57, %v2362_v57  ;;  %v2136_v12 = vpop.f32.mrf.mxu0 }
 0x29b   :  { %v6267_v18 = vadd.f32 %v2219_v42, %v2171_v13  ;;  %v2224_v45 = vpop.f32.mrf.mxu2  ;;  %v2700_v36 = vunpack.c.l.b16 %v2378_v49 }
 0x29c   :  { %v1931_v62 = vpop.f32.mrf.mxu3 }
 0x29d   :  { %v1932_v58 = vadd.f32 %v1931_v62, %v6076_v52  ;;  %v2710_v46 = vpack.c.b16 %v2701_v31, %v2700_v36 }
 0x29f   :  { %v2125_v5 = vadd.f32 %v6207_v30, %v1932_v58  ;;  %v2252_v30 = vld [vmem:[#allocation2 + $0x8f] sm:$0xff]  ;;  %v3116_v37 = vpop.f32.mrf.mxu1 }
 0x2a0   :  { %4268 = vmatmul.msk.bf16.gmra.mxu2 %vm3374_vm6, %v4360_v54  ;;  %v2365_v33 = vmul.f32 %v6192_v0, %v2252_v30 }
 0x2a1   :  { %v2174_v56 = vadd.f32 %v6213_v22, %v2125_v5  ;;  %v2251_v22 = vld [vmem:[#allocation2 + $0x87] sm:$0xff] }
 0x2a2   :  { %v2364_v53 = vmul.f32 %v6111_v29, %v2251_v22  ;;  %v2381_v15 = vpack.c.bf16 %v2365_v33, %v2365_v33 }
 0x2a3   :  { %v6276_v3 = vadd.f32 %v2222_v23, %v2174_v56  ;;  %v2227_v24 = vpop.f32.mrf.mxu2 }
 0x2a4   :  { %v1933_v27 = vpop.f32.mrf.mxu3  ;;  %v2703_v29 = vunpack.c.l.b16 %v2381_v15 }
 0x2a5   :  { %v1934_v52 = vadd.f32 %v1933_v27, %v6091_v60  ;;  %v4361_v60 = vld [vmem:[%s6663_s4 + $0x38] sm:$0xff] }
 0x2a7   :  { %v2127_v47 = vadd.f32 %v6223_v41, %v1934_v52  ;;  %v3067_v41 = vpop.f32.mrf.mxu0 }
 0x2a9   :  { %v2176_v42 = vadd.f32 %v6228_v14, %v2127_v47  ;;  %3047 = vmatmul.bf16.gmra.mxu3 %v2710_v46  ;;  %v2380_v14 = vpack.c.bf16 %v2364_v53, %v2364_v53 }
 0x2ab   :  { %v6283_v39 = vadd.f32 %v2224_v45, %v2176_v42  ;;  %v2229_v7 = vpop.f32.mrf.mxu2  ;;  %v2702_v23 = vunpack.c.l.b16 %v2380_v14 }
 0x2ac   :  { %v1936_v16 = vpop.f32.mrf.mxu3 }
 0x2ad   :  { %v1937_v8 = vadd.f32 %v1936_v16, %v6105_v35  ;;  %v2711_v13 = vpack.c.b16 %v2703_v29, %v2702_v23 }
 0x2af   :  { %v2130_v59 = vadd.f32 %v6238_v38, %v1937_v8  ;;  %v3069_v20 = vpop.f32.mrf.mxu0  ;;  %v3118_v38 = vpop.f32.mrf.mxu1 }
 0x2b0   :  { %4269 = vmatmul.msk.bf16.gmra.mxu2 %vm3374_vm6, %v4361_v60 }
 0x2b1   :  { %v2179_v0 = vadd.f32 %v6242_v48, %v2130_v59 }
 0x2b3   :  { %v6292_v63 = vadd.f32 %v2227_v24, %v2179_v0  ;;  %v2232_v35 = vpop.f32.mrf.mxu2 }
 0x2b4   :  { %v1938_v4 = vpop.f32.mrf.mxu3 }
 0x2b5   :  { %v1939_v61 = vadd.f32 %v1938_v4, %v6117_v55 }
 0x2b7   :  { %v2132_v6 = vadd.f32 %v6253_v11, %v1939_v61  ;;  %v3072_v34 = vpop.f32.mrf.mxu0  ;;  %v3121_v55 = vpop.f32.mrf.mxu1 }
 0x2b9   :  { %v2181_v17 = vadd.f32 %v6257_v2, %v2132_v6  ;;  %3052 = vmatmul.bf16.gmra.mxu3 %v2711_v13 }
 0x2bb   :  { %v6297_v57 = vadd.f32 %v2229_v7, %v2181_v17  ;;  %v2234_v45 = vpop.f32.mrf.mxu2 }
 0x2bc   :  { %v1941_v48 = vpop.f32.mrf.mxu3 }
 0x2bd   :  { %v1942_v62 = vadd.f32 %v1941_v48, %v6125_v1 }
 0x2bf   :  { %v2135_v58 = vadd.f32 %v2134_v40, %v1942_v62  ;;  %v3074_v27 = vpop.f32.mrf.mxu0  ;;  %v3123_v1 = vpop.f32.mrf.mxu1 }
 0x2c1   :  { %v2184_v54 = vadd.f32 %v2183_v25, %v2135_v58 }
 0x2c3   :  { %v6300_v49 = vadd.f32 %v2232_v35, %v2184_v54  ;;  %v6303_v31 = vpop.f32.mrf.mxu2 }
 0x2c4   :  { %v1943_v5 = vpop.f32.mrf.mxu3 }
 0x2c5   :  { %v1944_v11 = vadd.f32 %v1943_v5, %v6137_v26 }
 0x2c7   :  { %v2137_v56 = vadd.f32 %v2136_v12, %v1944_v11  ;;  %v3077_v30 = vpop.f32.mrf.mxu0  ;;  %v3126_v12 = vpop.f32.mrf.mxu1 }
 0x2c9   :  { %v2186_v2 = vadd.f32 %v2185_v43, %v2137_v56 }
 0x2cb   :  { %v6305_v36 = vadd.f32 %v2234_v45, %v2186_v2  ;;  %v6310_v25 = vpop.f32.mrf.mxu2 }
 0x2cc   :  { %v3018_v24 = vpop.f32.mrf.mxu3 }
 0x2cd   :  { %v3068_v52 = vadd.f32 %v3067_v41, %v3018_v24 }
 0x2cf   :  { %v3117_v46 = vadd.f32 %v3116_v37, %v3068_v52  ;;  %v3079_v7 = vpop.f32.mrf.mxu0 }
 0x2d1   :  { %v6308_v40 = vadd.f32 %v3117_v46, %v6157_v21  ;;  %v3128_v21 = vpop.f32.mrf.mxu1 }
 0x2d3   :  { %v6315_v33 = vpop.f32.mrf.mxu2  ;;  %v3196_v61 = vmul.f32 %v6308_v40, %v6308_v40 }
 0x2d4   :  { %v3020_v47 = vpop.f32.mrf.mxu3 }
 0x2d5   :  { %v3070_v42 = vadd.f32 %v3069_v20, %v3020_v47 }
 0x2d7   :  { %v3119_v26 = vadd.f32 %v3118_v38, %v3070_v42 }
 0x2d9   :  { %v6313_v22 = vadd.f32 %v3119_v26, %v6167_v50  ;;  %v3082_v50 = vpop.f32.mrf.mxu0  ;;  %v3131_v37 = vpop.f32.mrf.mxu1 }
 0x2db   :  { %v6320_v15 = vpop.f32.mrf.mxu2 }
 0x2dc   :  { %v3023_v43 = vpop.f32.mrf.mxu3 }
 0x2dd   :  { %v3073_v53 = vadd.f32 %v3072_v34, %v3023_v43 }
 0x2df   :  { %v3122_v16 = vadd.f32 %v3121_v55, %v3073_v53 }
 0x2e1   :  { %v6318_v8 = vadd.f32 %v3122_v16, %v6180_v10  ;;  %v3197_v10 = vmul.f32 %v6313_v22, %v6313_v22  ;;  %v3084_v6 = vpop.f32.mrf.mxu0 }
 0x2e3   :  { %v6325_v4 = vpop.f32.mrf.mxu2  ;;  %v3198_v13 = vmul.f32 %v6318_v8, %v6318_v8  ;;  %v3212_v17 = vadd.f32 %v3197_v10, %v3196_v61 }
 0x2e4   :  { %v3025_v60 = vpop.f32.mrf.mxu3 }
 0x2e5   :  { %v3075_v41 = vadd.f32 %v3074_v27, %v3025_v60  ;;  %v3213_v45 = vadd.f32 %v3212_v17, %v3198_v13 }
 0x2e7   :  { %v3124_v14 = vadd.f32 %v3123_v1, %v3075_v41 }
 0x2e9   :  { %v6323_v59 = vadd.f32 %v3124_v14, %v6200_v44  ;;  %v3174_v44 = vadd.f32 %v6313_v22, %v6308_v40  ;;  %v3087_v47 = vpop.f32.mrf.mxu0 }
 0x2eb   :  { %v3175_v38 = vadd.f32 %v3174_v44, %v6318_v8  ;;  %v3199_v48 = vmul.f32 %v6323_v59, %v6323_v59  ;;  %v6348_v56 = vpop.f32.mrf.mxu2 }
 0x2ec   :  { %v3028_v0 = vpop.f32.mrf.mxu3 }
 0x2ed   :  { %v3078_v29 = vadd.f32 %v3077_v30, %v3028_v0  ;;  %v3176_v58 = vadd.f32 %v3175_v38, %v6323_v59  ;;  %v3214_v55 = vadd.f32 %v3213_v45, %v3199_v48 }
 0x2ef   :  { %v3127_v23 = vadd.f32 %v3126_v12, %v3078_v29 }
 0x2f1   :  { %v6330_v35 = vadd.f32 %v3127_v23, %v6211_v32  ;;  %v3133_v32 = vpop.f32.mrf.mxu1  ;;  %v3089_v60 = vpop.f32.mrf.mxu0 }
 0x2f3   :  { %v3200_v54 = vmul.f32 %v6330_v35, %v6330_v35  ;;  %v3177_v5 = vadd.f32 %v3176_v58, %v6330_v35  ;;  %v6359_v43 = vpop.f32.mrf.mxu2 }
 0x2f4   :  { %v3030_v20 = vpop.f32.mrf.mxu3 }
 0x2f5   :  { %v3080_v62 = vadd.f32 %v3079_v7, %v3030_v20  ;;  %v3215_v2 = vadd.f32 %v3214_v55, %v3200_v54 }
 0x2f7   :  { %v3129_v34 = vadd.f32 %v3128_v21, %v3080_v62 }
 0x2f9   :  { %v6346_v11 = vadd.f32 %v3129_v34, %v6225_v9  ;;  %v3136_v30 = vpop.f32.mrf.mxu1  ;;  %v3092_v44 = vpop.f32.mrf.mxu0 }
 0x2fb   :  { %v3178_v27 = vadd.f32 %v3177_v5, %v6346_v11  ;;  %v3201_v24 = vmul.f32 %v6346_v11, %v6346_v11  ;;  %v6367_v23 = vpop.f32.mrf.mxu2 }
 0x2fc   :  { %v3033_v52 = vpop.f32.mrf.mxu3 }
 0x2fd   :  { %v3216_v1 = vadd.f32 %v3215_v2, %v3201_v24  ;;  %v3083_v46 = vadd.f32 %v3082_v50, %v3033_v52 }
 0x2ff   :  { %v3132_v42 = vadd.f32 %v3131_v37, %v3083_v46 }
 0x301   :  { %v6354_v26 = vadd.f32 %v3132_v42, %v6236_v28  ;;  %v3138_v14 = vpop.f32.mrf.mxu1  ;;  %v3094_v58 = vpop.f32.mrf.mxu0 }
 0x303   :  { %v3179_v9 = vadd.f32 %v3178_v27, %v6354_v26  ;;  %v3202_v12 = vmul.f32 %v6354_v26, %v6354_v26  ;;  %v6375_v62 = vpop.f32.mrf.mxu2 }
 0x304   :  { %v3035_v53 = vpop.f32.mrf.mxu3 }
 0x305   :  { %v3217_v16 = vadd.f32 %v3216_v1, %v3202_v12  ;;  %v3085_v7 = vadd.f32 %v3084_v6, %v3035_v53 }
 0x307   :  { %v3134_v21 = vadd.f32 %v3133_v32, %v3085_v7 }
 0x309   :  { %v6362_v41 = vadd.f32 %v3134_v21, %v6247_v51  ;;  %v3141_v6 = vpop.f32.mrf.mxu1  ;;  %v3097_v42 = vpop.f32.mrf.mxu0 }
 0x30b   :  { %v3180_v50 = vadd.f32 %v3179_v9, %v6362_v41  ;;  %v3203_v28 = vmul.f32 %v6362_v41, %v6362_v41  ;;  %v6386_v24 = vpop.f32.mrf.mxu2 }
 0x30c   :  { %v3038_v37 = vpop.f32.mrf.mxu3 }
 0x30d   :  { %v3218_v0 = vadd.f32 %v3217_v16, %v3203_v28  ;;  %v3088_v29 = vadd.f32 %v3087_v47, %v3038_v37 }
 0x30f   :  { %v3137_v10 = vadd.f32 %v3136_v30, %v3088_v29 }
 0x311   :  { %v6370_v61 = vadd.f32 %v3137_v10, %v6260_v19  ;;  %v3143_v5 = vpop.f32.mrf.mxu1 }
 0x313   :  { %v3181_v13 = vadd.f32 %v3180_v50, %v6370_v61  ;;  %v3204_v51 = vmul.f32 %v6370_v61, %v6370_v61  ;;  %v6397_v16 = vpop.f32.mrf.mxu2  ;;  %v3099_v50 = vpop.f32.mrf.mxu0 }
 0x314   :  { %v3040_v20 = vpop.f32.mrf.mxu3 }
 0x315   :  { %v3219_v17 = vadd.f32 %v3218_v0, %v3204_v51  ;;  %v3090_v38 = vadd.f32 %v3089_v60, %v3040_v20 }
 0x317   :  { %v3139_v48 = vadd.f32 %v3138_v14, %v3090_v38 }
 0x319   :  { %v6378_v32 = vadd.f32 %v3139_v48, %v6267_v18  ;;  %v3146_v9 = vpop.f32.mrf.mxu1 }
 0x31b   :  { %v3182_v45 = vadd.f32 %v3181_v13, %v6378_v32  ;;  %v3205_v19 = vmul.f32 %v6378_v32, %v6378_v32  ;;  %v6405_v13 = vpop.f32.mrf.mxu2  ;;  %v3102_v20 = vpop.f32.mrf.mxu0 }
 0x31c   :  { %v3043_v54 = vpop.f32.mrf.mxu3 }
 0x31d   :  { %v3220_v34 = vadd.f32 %v3219_v17, %v3205_v19  ;;  %v3093_v55 = vadd.f32 %v3092_v44, %v3043_v54  ;;  %v3476_v19 = vmul.f32 %v6310_v25, %v6310_v25 }
 0x31f   :  { %v3142_v2 = vadd.f32 %v3141_v6, %v3093_v55 }
 0x321   :  { %v6384_v27 = vadd.f32 %v3142_v2, %v6276_v3  ;;  %v3148_v37 = vpop.f32.mrf.mxu1  ;;  %v3477_v2 = vmul.f32 %v6315_v33, %v6315_v33 }
 0x323   :  { %v3183_v52 = vadd.f32 %v3182_v45, %v6384_v27  ;;  %v3206_v18 = vmul.f32 %v6384_v27, %v6384_v27  ;;  %v3475_v45 = vmul.f32 %v6303_v31, %v6303_v31  ;;  %v6419_v55 = vpop.f32.mrf.mxu2 }
 0x324   :  { %v3045_v1 = vpop.f32.mrf.mxu3 }
 0x325   :  { %v3221_v46 = vadd.f32 %v3220_v34, %v3206_v18  ;;  %v3095_v47 = vadd.f32 %v3094_v58, %v3045_v1  ;;  %v3478_v18 = vmul.f32 %v6320_v15, %v6320_v15 }
 0x327   :  { %v3144_v30 = vadd.f32 %v3143_v5, %v3095_v47  ;;  %v3491_v5 = vadd.f32 %v3476_v19, %v3475_v45 }
 0x329   :  { %v6392_v12 = vadd.f32 %v3144_v30, %v6283_v39  ;;  %v3151_v38 = vpop.f32.mrf.mxu1 }
 0x32b   :  { %v3184_v53 = vadd.f32 %v3183_v52, %v6392_v12  ;;  %v3207_v3 = vmul.f32 %v6392_v12, %v6392_v12 }
 0x32c   :  { %v3048_v7 = vpop.f32.mrf.mxu3 }
 0x32d   :  { %v3222_v21 = vadd.f32 %v3221_v46, %v3207_v3  ;;  %v3098_v60 = vadd.f32 %v3097_v42, %v3048_v7  ;;  %v3104_v42 = vpop.f32.mrf.mxu0 }
 0x32f   :  { %v3147_v14 = vadd.f32 %v3146_v9, %v3098_v60  ;;  %v3492_v9 = vadd.f32 %v3491_v5, %v3477_v2 }
 0x331   :  { %v6400_v28 = vadd.f32 %v3147_v14, %v6292_v63  ;;  %v3493_v60 = vadd.f32 %v3492_v9, %v3478_v18  ;;  %v3480_v14 = vmul.f32 %v6348_v56, %v6348_v56  ;;  %v3486_v9 = vmul.f32 %v6405_v13, %v6405_v13 }
 0x333   :  { %v3185_v0 = vadd.f32 %v3184_v53, %v6400_v28  ;;  %v3208_v39 = vmul.f32 %v6400_v28, %v6400_v28  ;;  %v3479_v53 = vmul.f32 %v6325_v4, %v6325_v4 }
 0x334   :  { %v3050_v29 = vpop.f32.mrf.mxu3 }
 0x335   :  { %v3223_v10 = vadd.f32 %v3222_v21, %v3208_v39  ;;  %v3100_v44 = vadd.f32 %v3099_v50, %v3050_v29  ;;  %v3153_v21 = vpop.f32.mrf.mxu1  ;;  %v3481_v39 = vmul.f32 %v6359_v43, %v6359_v43 }
 0x337   :  { %v3149_v51 = vadd.f32 %v3148_v37, %v3100_v44  ;;  %v6444_v44 = vpop.f32.mrf.mxu2 }
 0x339   :  { %v6408_v6 = vadd.f32 %v3149_v51, %v6297_v57  ;;  %v3453_v57 = vadd.f32 %v6310_v25, %v6303_v31 }
 0x33b   :  { %v3186_v17 = vadd.f32 %v3185_v0, %v6408_v6  ;;  %v3209_v63 = vmul.f32 %v6408_v6, %v6408_v6  ;;  %v3454_v47 = vadd.f32 %v3453_v57, %v6315_v33  ;;  %v3494_v0 = vadd.f32 %v3493_v60, %v3479_v53 }
 0x33c   :  { %v3053_v48 = vpop.f32.mrf.mxu3  ;;  %v3487_v60 = vmul.f32 %v6419_v55, %v6419_v55 }
 0x33d   :  { %v3224_v58 = vadd.f32 %v3223_v10, %v3209_v63  ;;  %v3103_v54 = vadd.f32 %v3102_v20, %v3053_v48  ;;  %v3495_v51 = vadd.f32 %v3494_v0, %v3480_v14  ;;  %v3482_v20 = vmul.f32 %v6367_v23, %v6367_v23 }
 0x33f   :  { %v3152_v34 = vadd.f32 %v3151_v38, %v3103_v54  ;;  %v3496_v48 = vadd.f32 %v3495_v51, %v3481_v39  ;;  %v3488_v39 = vmul.f32 %v6444_v44, %v6444_v44 }
 0x341   :  { %v6424_v52 = vadd.f32 %v3152_v34, %v6300_v49  ;;  %v3455_v49 = vadd.f32 %v3454_v47, %v6320_v15  ;;  %v3497_v54 = vadd.f32 %v3496_v48, %v3482_v20  ;;  %v3484_v34 = vmul.f32 %v6386_v24, %v6386_v24 }
 0x343   :  { %v3187_v1 = vadd.f32 %v3186_v17, %v6424_v52  ;;  %v3210_v46 = vmul.f32 %v6424_v52, %v6424_v52  ;;  %v3456_v37 = vadd.f32 %v3455_v49, %v6325_v4  ;;  %v6464_v49 = vpop.f32.mrf.mxu2 }
 0x344   :  { %v3055_v30 = vpop.f32.mrf.mxu3 }
 0x345   :  { %v3225_v3 = vadd.f32 %v3224_v58, %v3210_v46  ;;  %v3105_v7 = vadd.f32 %v3104_v42, %v3055_v30  ;;  %v3457_v10 = vadd.f32 %v3456_v37, %v6348_v56 }
 0x347   :  { %v3154_v50 = vadd.f32 %v3153_v21, %v3105_v7  ;;  %v3458_v38 = vadd.f32 %v3457_v10, %v6359_v43 }
 0x349   :  { %v6441_v29 = vadd.f32 %v3154_v50, %v6305_v36  ;;  %v3483_v36 = vmul.f32 %v6375_v62, %v6375_v62  ;;  %v3459_v58 = vadd.f32 %v3458_v38, %v6367_v23 }
 0x34b   :  { %v3188_v17 = vadd.f32 %v3187_v1, %v6441_v29  ;;  %v3211_v63 = vmul.f32 %v6441_v29, %v6441_v29  ;;  %v3460_v2 = vadd.f32 %v3459_v58, %v6375_v62  ;;  %v3498_v18 = vadd.f32 %v3497_v54, %v3483_v36 }
 0x34c   :  { %v3485_v1 = vmul.f32 %v6397_v16, %v6397_v16 }
 0x34d   :  { %v3189_v45 = vrot.slane %v3188_v17, 4  ;;  %v3226_v19 = vadd.f32 %v3225_v3, %v3211_v63  ;;  %v3461_v42 = vadd.f32 %v3460_v2, %v6386_v24  ;;  %v3499_v30 = vadd.f32 %v3498_v18, %v3484_v34  ;;  %v6865_v63 = vld [vmem:[#allocation57_spill] sm:$0xff] }
 0x34e   :  { %v3489_v34 = vmul.f32 %v6464_v49, %v6464_v49 }
 0x34f   :  { %v3190_v57 = vadd.f32 %v3189_v45, %v3188_v17  ;;  %v3227_v5 = vrot.slane %v3226_v19, 4  ;;  %v3462_v7 = vadd.f32 %v3461_v42, %v6397_v16  ;;  %v3500_v21 = vadd.f32 %v3499_v30, %v3485_v1  ;;  %v6500_v30 = vpop.f32.mrf.mxu2 }
 0x351   :  { %v3191_v46 = vrot.slane %v3190_v57, 2  ;;  %v3228_v47 = vadd.f32 %v3227_v5, %v3226_v19  ;;  %v3463_v37 = vadd.f32 %v3462_v7, %v6405_v13  ;;  %v3501_v0 = vadd.f32 %v3500_v21, %v3486_v9 }
 0x353   :  { %v3192_v53 = vadd.f32 %v3191_v46, %v3190_v57  ;;  %v3229_v3 = vrot.slane %v3228_v47, 2  ;;  %v3464_v20 = vadd.f32 %v3463_v37, %v6419_v55  ;;  %v3502_v17 = vadd.f32 %v3501_v0, %v3487_v60 }
 0x355   :  { %v3193_v14 = vrot.slane %v3192_v53, 1  ;;  %v3230_v50 = vadd.f32 %v3229_v3, %v3228_v47  ;;  %v3465_v36 = vadd.f32 %v3464_v20, %v6444_v44  ;;  %v3503_v45 = vadd.f32 %v3502_v17, %v3488_v39 }
 0x357   :  { %v3194_v10 = vadd.f32 %v3193_v14, %v3192_v53  ;;  %v3231_v51 = vrot.slane %v3230_v50, 1  ;;  %v3466_v54 = vadd.f32 %v3465_v36, %v6464_v49  ;;  %v3504_v9 = vadd.f32 %v3503_v45, %v3489_v34 }
 0x359   :  { %v6473_v38 = vmul.f32 %v3194_v10, %v6865_v63  ;;  %v3232_v48 = vadd.f32 %v3231_v51, %v3230_v50 }
 0x35b   :  { %v3233_v19 = vmul.f32 %v3232_v48, %v6865_v63  ;;  %v3234_v58 = vmul.f32 %v6473_v38, %v6473_v38  ;;  %v3240_v57 = vsub.f32 %v6330_v35, %v6473_v38  ;;  %v3241_v5 = vsub.f32 %v6346_v11, %v6473_v38 }
 0x35c   :  { %v3242_v18 = vsub.f32 %v6354_v26, %v6473_v38  ;;  %v3243_v1 = vsub.f32 %v6362_v41, %v6473_v38  ;;  %v3244_v46 = vsub.f32 %v6370_v61, %v6473_v38  ;;  %v3245_v47 = vsub.f32 %v6378_v32, %v6473_v38 }
 0x35d   :  { %v3235_v2 = vsub.f32 %v3233_v19, %v3234_v58  ;;  %v3246_v42 = vsub.f32 %v6384_v27, %v6473_v38  ;;  %v3247_v35 = vsub.f32 %v6392_v12, %v6473_v38  ;;  %v3248_v11 = vsub.f32 %v6400_v28, %v6473_v38 }
 0x35e   :  { %v3249_v26 = vsub.f32 %v6408_v6, %v6473_v38  ;;  %v3250_v41 = vsub.f32 %v6424_v52, %v6473_v38  ;;  %v3251_v61 = vsub.f32 %v6441_v29, %v6473_v38  ;;  %v3467_v27 = vadd.f32 %v3466_v54, %v6500_v30 }
 0x35f   :  { %v3252_v32 = vadd.f32 1e-05, %v3235_v2  ;;  %v3490_v12 = vmul.f32 %v6500_v30, %v6500_v30  ;;  %v3236_v48 = vsub.f32 %v6308_v40, %v6473_v38  ;;  %v3237_v36 = vsub.f32 %v6313_v22, %v6473_v38 }
 0x360   :  { %v3468_v28 = vrot.slane %v3467_v27, 4  ;;  %v3238_v45 = vsub.f32 %v6318_v8, %v6473_v38  ;;  %v3239_v19 = vsub.f32 %v6323_v59, %v6473_v38 }
 0x361   :  { %4397 = vrsqrt.f32 %v3252_v32  ;;  %v3505_v53 = vadd.f32 %v3504_v9, %v3490_v12  ;;  %vm3259_vm8 = vweird.f32 %v3252_v32 }
 0x362   :  { %v3469_v3 = vadd.f32 %v3468_v28, %v3467_v27 }
 0x363   :  { %v3506_v7 = vrot.slane %v3505_v53, 4 }
 0x364   :  { %v3470_v21 = vrot.slane %v3469_v3, 2 }
 0x365   :  { %v3507_v6 = vadd.f32 %v3506_v7, %v3505_v53 }
 0x366   :  { %v3471_v52 = vadd.f32 %v3470_v21, %v3469_v3 }
 0x367   :  { %v4398_v60 = vpop.eup %4397  ;;  %v3508_v50 = vrot.slane %v3507_v6, 2 }
 0x368   :  { %v3254_v14 = vmul.f32 %v4398_v60, %v3252_v32  ;;  %v3472_v29 = vrot.slane %v3471_v52, 1  ;;  %vm3260_vm7 = vweird.f32 %v4398_v60 }
 0x369   :  { %v3509_v0 = vadd.f32 %v3508_v50, %v3507_v6  ;;  %vm3261_vm9 = vmor %vm3259_vm8, %vm3260_vm7 }
 0x36a   :  { %v3255_v37 = vmul.f32 %v4398_v60, %v3254_v14  ;;  %v3473_v51 = vadd.f32 %v3472_v29, %v3471_v52 }
 0x36b   :  { %v3510_v20 = vrot.slane %v3509_v0, 1 }
 0x36c   :  { %v3256_v39 = vmul.f32 0.5, %v3255_v37  ;;  %v6520_v54 = vmul.f32 %v3473_v51, %v6865_v63 }
 0x36d   :  { %v3511_v34 = vadd.f32 %v3510_v20, %v3509_v0 }
 0x36e   :  { %v3257_v10 = vsub.f32 1.5, %v3256_v39  ;;  %v3513_v14 = vmul.f32 %v6520_v54, %v6520_v54 }
 0x370   :  { %v3258_v17 = vmul.f32 %v4398_v60, %v3257_v10 }
 0x372   :  { %v3262_v58 = vsel %vm3261_vm9, %v4398_v60, %v3258_v17  ;;  %v3512_v60 = vmul.f32 %v3511_v34, %v6865_v63  ;;  %v3517_v63 = vsub.f32 %v6315_v33, %v6520_v54  ;;  %v6545_v33 = vld [vmem:[%s6669_s10] ss:$0 sm:$0xff] }
 0x373   :  { %v3263_v2 = vmul.f32 %v3262_v58, %v3236_v48  ;;  %v3264_v32 = vmul.f32 %v3262_v58, %v3237_v36  ;;  %v3265_v9 = vmul.f32 %v3262_v58, %v3238_v45  ;;  %v3266_v27 = vmul.f32 %v3262_v58, %v3239_v19 }
 0x374   :  { %v3267_v40 = vmul.f32 %v3262_v58, %v3240_v57  ;;  %v3268_v12 = vmul.f32 %v3262_v58, %v3241_v5  ;;  %v3269_v28 = vmul.f32 %v3262_v58, %v3242_v18  ;;  %v3270_v22 = vmul.f32 %v3262_v58, %v3243_v1  ;;  %v4389_v5 = vld [vmem:[%s6668_s9] ss:$0 sm:$0xff] }
 0x375   :  { %v3271_v53 = vmul.f32 %v3262_v58, %v3244_v46  ;;  %v3272_v3 = vmul.f32 %v3262_v58, %v3245_v47  ;;  %v3273_v8 = vmul.f32 %v3262_v58, %v3246_v42  ;;  %v3274_v7 = vmul.f32 %v3262_v58, %v3247_v35 }
 0x376   :  { %v3275_v21 = vmul.f32 %v3262_v58, %v3248_v11  ;;  %v3276_v59 = vmul.f32 %v3262_v58, %v3249_v26  ;;  %v3277_v38 = vmul.f32 %v3262_v58, %v3250_v41  ;;  %v3278_v6 = vmul.f32 %v3262_v58, %v3251_v61 }
 0x377   :  { %v3514_v52 = vsub.f32 %v3512_v60, %v3513_v14  ;;  %v3515_v1 = vsub.f32 %v6303_v31, %v6520_v54  ;;  %v3516_v46 = vsub.f32 %v6310_v25, %v6520_v54  ;;  %v3518_v42 = vsub.f32 %v6320_v15, %v6520_v54 }
 0x378   :  { %v3519_v35 = vsub.f32 %v6325_v4, %v6520_v54  ;;  %v3520_v11 = vsub.f32 %v6348_v56, %v6520_v54  ;;  %v3282_v26 = vmul.f32 %v4389_v5, %v3263_v2  ;;  %v3283_v41 = vmul.f32 %v4389_v5, %v3264_v32 }
 0x379   :  { %v3531_v50 = vadd.f32 1e-05, %v3514_v52  ;;  %v3521_v31 = vsub.f32 %v6359_v43, %v6520_v54  ;;  %v3284_v25 = vmul.f32 %v4389_v5, %v3265_v9  ;;  %v3285_v37 = vmul.f32 %v4389_v5, %v3266_v27 }
 0x37a   :  { %v3286_v29 = vmul.f32 %v4389_v5, %v3267_v40  ;;  %v3287_v0 = vmul.f32 %v4389_v5, %v3268_v12  ;;  %v3288_v15 = vmul.f32 %v4389_v5, %v3269_v28  ;;  %v3289_v4 = vmul.f32 %v4389_v5, %v3270_v22 }
 0x37b   :  { %4399 = vrsqrt.f32 %v3531_v50  ;;  %v3290_v56 = vmul.f32 %v4389_v5, %v3271_v53  ;;  %v3291_v10 = vmul.f32 %v4389_v5, %v3272_v3  ;;  %v3292_v51 = vmul.f32 %v4389_v5, %v3273_v8 }
 0x37c   :  { %v3293_v20 = vmul.f32 %v4389_v5, %v3274_v7  ;;  %v6547_v17 = vmul.f32 %v4389_v5, %v3275_v21  ;;  %v3295_v43 = vmul.f32 %v4389_v5, %v3276_v59  ;;  %vm3538_vm11 = vweird.f32 %v3531_v50 }
 0x37d   :  { %v6549_v36 = vmul.f32 %v4389_v5, %v3277_v38  ;;  %v6551_v45 = vmul.f32 %v4389_v5, %v3278_v6  ;;  %v3301_v19 = vadd.f32 %v6545_v33, %v3282_v26  ;;  %v3302_v58 = vadd.f32 %v6545_v33, %v3283_v41  ;;  %v6587_v6 = vld [vmem:[%s6665_s6] ss:$0 sm:$0xff] }
 0x37e   :  { %v3303_v34 = vadd.f32 %v6545_v33, %v3284_v25  ;;  %v3304_v2 = vadd.f32 %v6545_v33, %v3285_v37  ;;  %v6558_v32 = vadd.f32 %v6545_v33, %v3286_v29  ;;  %v6561_v27 = vadd.f32 %v6545_v33, %v3287_v0 }
 0x37f   :  { %v6564_v40 = vadd.f32 %v6545_v33, %v3288_v15  ;;  %v6567_v12 = vadd.f32 %v6545_v33, %v3289_v4  ;;  %v6570_v28 = vadd.f32 %v6545_v33, %v3290_v56  ;;  %v6573_v22 = vadd.f32 %v6545_v33, %v3291_v10 }
 0x380   :  { %v6576_v53 = vadd.f32 %v6545_v33, %v3292_v51  ;;  %v6579_v3 = vadd.f32 %v6545_v33, %v3293_v20  ;;  %v3314_v8 = vadd.f32 %v6545_v33, %v3295_v43  ;;  %v3522_v7 = vsub.f32 %v6367_v23, %v6520_v54 }
 0x381   :  { %v4400_v57 = vpop.eup %4399  ;;  %v3523_v60 = vsub.f32 %v6375_v62, %v6520_v54  ;;  %v3524_v14 = vsub.f32 %v6386_v24, %v6520_v54  ;;  %v3528_v52 = vsub.f32 %v6444_v44, %v6520_v54  ;;  %v3525_v23 = vsub.f32 %v6397_v16, %v6520_v54 }
 0x382   :  { %v3533_v18 = vmul.f32 %v4400_v57, %v3531_v50  ;;  %vm3539_vm10 = vweird.f32 %v4400_v57  ;;  %v3527_v5 = vsub.f32 %v6419_v55, %v6520_v54  ;;  %v3529_v62 = vsub.f32 %v6464_v49, %v6520_v54 }
 0x383   :  { %vm3540_vm12 = vmor %vm3538_vm11, %vm3539_vm10  ;;  %v3530_v24 = vsub.f32 %v6500_v30, %v6520_v54 }
 0x384   :  { %v3534_v47 = vmul.f32 %v4400_v57, %v3533_v18 }
 0x386   :  { %v3535_v61 = vmul.f32 0.5, %v3534_v47 }
 0x388   :  { %v3536_v39 = vsub.f32 1.5, %v3535_v61 }
 0x38a   :  { %v3537_v48 = vmul.f32 %v4400_v57, %v3536_v39 }
 0x38c   :  { %v3541_v9 = vsel %vm3540_vm12, %v4400_v57, %v3537_v48  ;;  %v3526_v57 = vsub.f32 %v6405_v13, %v6520_v54  ;;  %v6611_v13 = vld [vmem:[%s6666_s7] ss:$0 sm:$0xff]  ;;  %s4445_s7 = smov [#allocation3]  }
 0x38d   :  { %v3542_v21 = vmul.f32 %v3541_v9, %v3515_v1  ;;  %v3543_v59 = vmul.f32 %v3541_v9, %v3516_v46  ;;  %v3544_v38 = vmul.f32 %v3541_v9, %v3517_v63  ;;  %v3545_v50 = vmul.f32 %v3541_v9, %v3518_v42  ;;  %s3648_s28 = sshll.u32 %s4445_s7, 4  ;;  %s3649_s28 = int_to_ptr.vmem [resolvable:$true] %s3648_s28 }
 0x38e   :  { %v3546_v18 = vmul.f32 %v3541_v9, %v3519_v35  ;;  %v3547_v1 = vmul.f32 %v3541_v9, %v3520_v11  ;;  %v3555_v46 = vmul.f32 %v3541_v9, %v3528_v52  ;;  %v3548_v44 = vmul.f32 %v3541_v9, %v3521_v31 }
 0x38f   :  { %v3561_v47 = vmul.f32 %v6587_v6, %v3542_v21  ;;  %v3562_v16 = vmul.f32 %v6587_v6, %v3543_v59  ;;  %v3563_v63 = vmul.f32 %v6587_v6, %v3544_v38  ;;  %v3549_v55 = vmul.f32 %v3541_v9, %v3522_v7 }
 0x390   :  { %v3550_v42 = vmul.f32 %v3541_v9, %v3523_v60  ;;  %v3551_v49 = vmul.f32 %v3541_v9, %v3524_v14  ;;  %v3564_v35 = vmul.f32 %v6587_v6, %v3545_v50  ;;  %v3552_v30 = vmul.f32 %v3541_v9, %v3525_v23 }
 0x391   :  { %v3553_v54 = vmul.f32 %v3541_v9, %v3526_v57  ;;  %v3554_v11 = vmul.f32 %v3541_v9, %v3527_v5  ;;  %v3565_v26 = vmul.f32 %v6587_v6, %v3546_v18  ;;  %v3556_v41 = vmul.f32 %v3541_v9, %v3529_v62 }
 0x392   :  { %v3557_v31 = vmul.f32 %v3541_v9, %v3530_v24  ;;  %v3566_v61 = vmul.f32 %v6587_v6, %v3547_v1  ;;  %v3574_v25 = vmul.f32 %v6587_v6, %v3555_v46  ;;  %v3567_v37 = vmul.f32 %v6587_v6, %v3548_v44 }
 0x393   :  { %v3580_v29 = vadd.f32 %v6611_v13, %v3561_v47  ;;  %v3581_v0 = vadd.f32 %v6611_v13, %v3562_v16  ;;  %v3582_v15 = vadd.f32 %v6611_v13, %v3563_v63  ;;  %v3568_v4 = vmul.f32 %v6587_v6, %v3549_v55 }
 0x394   :  { %v3569_v39 = vmul.f32 %v6587_v6, %v3550_v42  ;;  %v3570_v56 = vmul.f32 %v6587_v6, %v3551_v49  ;;  %v3583_v10 = vadd.f32 %v6611_v13, %v3564_v35  ;;  %v3584_v51 = vadd.f32 %v6611_v13, %v3565_v26 }
 0x395   :  { %v3596_v20 = vadd.f32 %v3580_v29, %v3301_v19  ;;  %v3597_v43 = vadd.f32 %v3581_v0, %v3302_v58  ;;  %v3598_v48 = vadd.f32 %v3582_v15, %v3303_v34  ;;  %v3571_v9 = vmul.f32 %v6587_v6, %v3552_v30 }
 0x396   :  { %v3585_v7 = vadd.f32 %v6611_v13, %v3566_v61  ;;  %v3593_v21 = vadd.f32 %v6611_v13, %v3574_v25  ;;  %v3599_v59 = vadd.f32 %v3583_v10, %v3304_v2  ;;  %v3572_v38 = vmul.f32 %v6587_v6, %v3553_v54 }
 0x397   :  { %v3573_v60 = vmul.f32 %v6587_v6, %v3554_v11  ;;  %v3586_v14 = vadd.f32 %v6611_v13, %v3567_v37  ;;  %v3600_v52 = vadd.f32 %v3584_v51, %v6558_v32  ;;  %v3587_v50 = vadd.f32 %v6611_v13, %v3568_v4 }
 0x398   :  { %v3588_v19 = vadd.f32 %v6611_v13, %v3569_v39  ;;  %v3601_v58 = vadd.f32 %v3585_v7, %v6561_v27  ;;  %v3609_v34 = vadd.f32 %v3593_v21, %v3314_v8  ;;  %v3612_v57 = vmax.f32 %v3596_v20, 0.0 }
 0x399   :  { %v3602_v23 = vadd.f32 %v3586_v14, %v6564_v40  ;;  %v3613_v5 = vmax.f32 %v3597_v43, 0.0  ;;  %v3614_v2 = vmax.f32 %v3598_v48, 0.0  ;;  %v3313_v18 = vadd.f32 %v6545_v33, %v6547_v17 }
 0x39a   :  { %v3589_v62 = vadd.f32 %v6611_v13, %v3570_v56  ;;  %v3603_v24 = vadd.f32 %v3587_v50, %v6567_v12  ;;  %v3615_v32 = vmax.f32 %v3599_v59, 0.0  ;;  %v3575_v1 = vmul.f32 %v6587_v6, %v3556_v41  ;;  %3628 = vst [vmem:[#allocation3] sm:$0xff] %v3612_v57 }
 0x39b   :  { %v3590_v46 = vadd.f32 %v6611_v13, %v3571_v9  ;;  %v3604_v27 = vadd.f32 %v3588_v19, %v6570_v28  ;;  %v3616_v8 = vmax.f32 %v3600_v52, 0.0  ;;  %v3576_v40 = vmul.f32 %v6587_v6, %v3557_v31  ;;  %3629 = vst [vmem:[#allocation3 + $0x8] sm:$0xff] %v3613_v5 }
 0x39c   :  { %v3591_v44 = vadd.f32 %v6611_v13, %v3572_v38  ;;  %v3605_v47 = vadd.f32 %v3589_v62, %v6573_v22  ;;  %v3617_v17 = vmax.f32 %v3601_v58, 0.0  ;;  %v3315_v12 = vadd.f32 %v6545_v33, %v6549_v36  ;;  %3630 = vst [vmem:[#allocation3 + $0x10] sm:$0xff] %v3614_v2 }
 0x39d   :  { %v3592_v16 = vadd.f32 %v6611_v13, %v3573_v60  ;;  %v3606_v63 = vadd.f32 %v3590_v46, %v6576_v53  ;;  %v3618_v55 = vmax.f32 %v3602_v23, 0.0  ;;  %v3316_v28 = vadd.f32 %v6545_v33, %v6551_v45  ;;  %3631 = vst [vmem:[#allocation3 + $0x18] sm:$0xff] %v3615_v32 }
 0x39e   :  { %v3607_v6 = vadd.f32 %v3591_v44, %v6579_v3  ;;  %v3619_v42 = vmax.f32 %v3603_v24, 0.0  ;;  %v3594_v22 = vadd.f32 %v6611_v13, %v3575_v1  ;;  %v3620_v35 = vmax.f32 %v3604_v27, 0.0  ;;  %3632 = vst [vmem:[#allocation3 + $0x20] sm:$0xff] %v3616_v8 }
 0x39f   :  { %v3608_v49 = vadd.f32 %v3592_v16, %v3313_v18  ;;  %v3595_v36 = vadd.f32 %v6611_v13, %v3576_v40  ;;  %v3621_v30 = vmax.f32 %v3605_v47, 0.0  ;;  %3633 = vst [vmem:[#allocation3 + $0x28] sm:$0xff] %v3617_v17  ;;  %v3622_v53 = vmax.f32 %v3606_v63, 0.0 }
 0x3a0   :  { %v3610_v54 = vadd.f32 %v3594_v22, %v3315_v12  ;;  %3634 = vst [vmem:[#allocation3 + $0x30] sm:$0xff] %v3618_v55  ;;  %v3623_v26 = vmax.f32 %v3607_v6, 0.0  ;;  %v3625_v45 = vmax.f32 %v3609_v34, 0.0 }
 0x3a1   :  { %v3611_v11 = vadd.f32 %v3595_v36, %v3316_v28  ;;  %3635 = vst [vmem:[#allocation3 + $0x38] sm:$0xff] %v3619_v42  ;;  %v3624_v33 = vmax.f32 %v3608_v49, 0.0 }
 0x3a2   :  { %3636 = vst [vmem:[#allocation3 + $0x40] sm:$0xff] %v3620_v35  ;;  %v3626_v3 = vmax.f32 %v3610_v54, 0.0 }
 0x3a3   :  { %3637 = vst [vmem:[#allocation3 + $0x48] sm:$0xff] %v3621_v30  ;;  %v3627_v13 = vmax.f32 %v3611_v11, 0.0 }
 0x3a4   :  { %3638 = vst [vmem:[#allocation3 + $0x50] sm:$0xff] %v3622_v53 }
 0x3a5   :  { %3639 = vst [vmem:[#allocation3 + $0x58] sm:$0xff] %v3623_v26 }
 0x3a6   :  { %3640 = vst [vmem:[#allocation3 + $0x60] sm:$0xff] %v3624_v33 }
 0x3a7   :  { %3641 = vst [vmem:[#allocation3 + $0x68] sm:$0xff] %v3625_v45 }
 0x3a8   :  { %3642 = vst [vmem:[#allocation3 + $0x70] sm:$0xff] %v3626_v3 }
 0x3a9   :  { %3643 = vst [vmem:[#allocation3 + $0x78] sm:$0xff] %v3627_v13 }
 0x3aa   :  { %3656 = dma.vmem_to_hbm [thread:$0]  %s3649_s28, 2048, %s3651_s11, [#allocation4], %s4446_s30, %s4446_s30, %s4447_s8  }
 0x3ab   :  { %4440 = dma.done.wait [#allocation4], 2048  }
 0x3ac   :  { %4441 = vsyncadd [#allocation4], 4294965248 }
 0x3ad   :  { %3661 = vsyncpa [#allocation4], 1 }

</bundles_post_ra>
